<compile_context>
chip_gen: v7x
topology: tpu7x:2x2x1
jax: 0.10.0
libtpu: 0.0.40
codegen_flags: <defaults>
</compile_context>

<pallas_src>
import functools

import jax
import jax.numpy as jnp
from jax.experimental import pallas as pl
from jax.experimental.pallas import tpu as pltpu

MIN_VALUE = 2.701 + 1e-06
MAX_VALUE = 2.999 - 1e-06


# ----------------------------------------------------------------------------
# Pallas kernel: one grid step == one sub-pixel output phase.
#   x_ref : (M, K)       shared shifted-window slab (block index constant ->
#                        fetched once, stays VMEM-resident for all phases)
#   w_ref : (1, K, OC)   this phase's weight slab (unused shift blocks are 0)
#   b_ref : (1, OC)      bias
#   o_ref : (1, M, OC)   this phase's output rows (lane-dense OC-minor store)
# ----------------------------------------------------------------------------
def _phase_gemm_kernel(x_ref, w_ref, b_ref, o_ref, *, clamp_min, clamp_max):
    acc = jnp.dot(x_ref[...], w_ref[0], preferred_element_type=jnp.float32)
    acc = acc + b_ref[...]
    if clamp_min is not None:
        acc = jnp.clip(acc, clamp_min, clamp_max)
    o_ref[0] = acc.astype(o_ref.dtype)


def _phase_gemm(xs, w_all, bias, clamp_min=None, clamp_max=None):
    """xs (M, K) @ w_all (P, K, OC) + bias, one phase per grid step."""
    M, K = xs.shape
    P, Kw, OC = w_all.shape
    assert Kw == K
    b2 = bias.reshape(1, OC).astype(jnp.float32)
    kernel = functools.partial(_phase_gemm_kernel,
                               clamp_min=clamp_min, clamp_max=clamp_max)
    return pl.pallas_call(
        kernel,
        out_shape=jax.ShapeDtypeStruct((P, M, OC), jnp.float32),
        grid=(P,),
        in_specs=[
            pl.BlockSpec((M, K), lambda ph: (0, 0)),        # resident slab
            pl.BlockSpec((1, K, OC), lambda ph: (ph, 0, 0)),
            pl.BlockSpec((1, OC), lambda ph: (0, 0)),
        ],
        out_specs=pl.BlockSpec((1, M, OC), lambda ph: (ph, 0, 0)),
        compiler_params=pltpu.CompilerParams(
            dimension_semantics=("parallel",)),              # megacore on v7x
    )(xs.astype(jnp.float32), w_all, b2)


# ----------------------------------------------------------------------------
# JAX-side operand construction (small: <= ~1 MB even on the last layer)
# ----------------------------------------------------------------------------
def _shift_slabs(x, shifts, MY, MX):
    """Concatenate shifted (MY, MX) windows of x along channels.

    x: (N, H, W, C) NHWC.  Returns (N*MY*MX, S*C), window s reading original
    rows [dy, dy+MY) / cols [dx, dx+MX) of zero-extended x.
    """
    N, H, W, C = x.shape
    dys = [d[0] for d in shifts]
    dxs = [d[1] for d in shifts]
    pad_t = max(0, -min(dys))
    pad_b = max(0, MY - 1 + max(dys) - (H - 1))
    pad_l = max(0, -min(dxs))
    pad_r = max(0, MX - 1 + max(dxs) - (W - 1))
    xp = jnp.pad(x, ((0, 0), (pad_t, pad_b), (pad_l, pad_r), (0, 0)))
    slabs = [xp[:, dy + pad_t: dy + pad_t + MY,
                dx + pad_l: dx + pad_l + MX, :]
             for dy, dx in shifts]
    cat = jnp.concatenate(slabs, axis=-1)                    # (N, MY, MX, S*C)
    return cat.reshape(N * MY * MX, len(shifts) * C)


def _phase_weights(tap_table, shifts, C, OC):
    """Per-phase (S*C, OC) weight slabs; unused shift blocks stay zero."""
    sid = {d: i for i, d in enumerate(shifts)}
    S = len(shifts)
    rows = []
    for taps in tap_table:
        blocks = [jnp.zeros((C, OC), jnp.float32)] * S
        for d, w2 in taps:
            i = sid[d]
            blocks[i] = blocks[i] + w2.astype(jnp.float32)
        rows.append(jnp.concatenate(blocks, axis=0))         # (S*C, OC)
    return jnp.stack(rows, axis=0)                           # (P, S*C, OC)


# ----------------------------------------------------------------------------
# Layers (NHWC activations); heavy compute in the Pallas phase-GEMM
# ----------------------------------------------------------------------------
def conv2d_nhwc(x, w, b, padding):
    """Stride-1 conv.  x: (N,H,W,C), w: (OC,C,KH,KW) [PyTorch layout]."""
    N, H, W, C = x.shape
    OC, _, KH, KW = w.shape
    OH = H + 2 * padding - KH + 1
    OW = W + 2 * padding - KW + 1
    taps = [((kh - padding, kw - padding), w[:, :, kh, kw].T)   # (C, OC)
            for kh in range(KH) for kw in range(KW)]
    shifts = sorted({d for d, _ in taps})
    xs = _shift_slabs(x, shifts, OH, OW)
    w_all = _phase_weights([taps], shifts, C, OC)
    out = _phase_gemm(xs, w_all, b)                           # (1, N*OH*OW, OC)
    return out.reshape(N, OH, OW, OC)


def conv_transpose2d_nhwc(x, w_t, b, stride, padding,
                          clamp_min=None, clamp_max=None):
    """ConvTranspose2d via sub-pixel phase decomposition.

    x: (N,H,W,C), w_t: (C_in, C_out, KH, KW) [PyTorch layout].
    Returns (phase-major tensor (s, s, N, MY, MX, OC), OH, OW).
    """
    N, H, W, C = x.shape
    _, OC, KH, KW = w_t.shape
    s, p = stride, padding
    assert KH >= s and KW >= s, "phase decomposition needs kernel >= stride"
    OH = (H - 1) * s - 2 * p + KH
    OW = (W - 1) * s - 2 * p + KW
    MY, MX = -(-OH // s), -(-OW // s)

    def taps_1d(c, K):
        # taps k contributing to output phase c, with integer input shift d
        return [(k, (c + p - k) // s) for k in range(K) if (k - c - p) % s == 0]

    tap_table, shifts_set = [], set()
    for cy in range(s):
        ty = taps_1d(cy, KH)
        for cx in range(s):
            tx = taps_1d(cx, KW)
            taps = [((dy, dx), w_t[:, :, ky, kx])             # (C, OC)
                    for ky, dy in ty for kx, dx in tx]
            tap_table.append(taps)
            shifts_set.update(d for d, _ in taps)
    shifts = sorted(shifts_set)

    xs = _shift_slabs(x, shifts, MY, MX)
    w_all = _phase_weights(tap_table, shifts, C, OC)
    out = _phase_gemm(xs, w_all, b, clamp_min, clamp_max)     # (s*s, M, OC)
    return out.reshape(s, s, N, MY, MX, OC), OH, OW


def _interleave_to_nhwc(out6, OH, OW):
    s1, s2, N, MY, MX, OC = out6.shape
    o = out6.transpose(2, 3, 0, 4, 1, 5).reshape(N, MY * s1, MX * s2, OC)
    return o[:, :OH, :OW, :]


def _interleave_to_nchw(out6, OH, OW):
    # Single shuffle: phase interleave fused with the NHWC->NCHW boundary
    # conversion required by the PyTorch module's output layout.
    s1, s2, N, MY, MX, OC = out6.shape
    o = out6.transpose(2, 5, 3, 0, 4, 1).reshape(N, OC, MY * s1, MX * s2)
    return o[:, :, :OH, :OW]


# ----------------------------------------------------------------------------
# Model: conv1 -> 3x conv_transpose -> clamp (clamp fused into the last GEMM)
# ----------------------------------------------------------------------------
def model_forward(x_nchw, params):
    x = x_nchw.transpose(0, 2, 3, 1)                          # NCHW -> NHWC
    v1 = conv2d_nhwc(x, params["w1"], params["b1"], padding=2)
    o2, oh, ow = conv_transpose2d_nhwc(v1, params["wt1"], params["bt1"], 2, 1)
    v2 = _interleave_to_nhwc(o2, oh, ow)
    o3, oh, ow = conv_transpose2d_nhwc(v2, params["wt2"], params["bt2"], 2, 1)
    v3 = _interleave_to_nhwc(o3, oh, ow)
    o4, oh, ow = conv_transpose2d_nhwc(v3, params["wt3"], params["bt3"], 4, 2,
                                       clamp_min=MIN_VALUE,
                                       clamp_max=MAX_VALUE)
    return _interleave_to_nchw(o4, oh, ow)                    # NCHW out


def init_params(key):
    ks = jax.random.split(key, 8)

    def u(k, shape, fan_in):
        bound = 1.0 / jnp.sqrt(fan_in)
        return jax.random.uniform(k, shape, jnp.float32, -bound, bound)

    return {
        # Conv2d(3, 5, 5): weight (5,3,5,5)
        "w1": u(ks[0], (5, 3, 5, 5), 3 * 5 * 5),
        "b1": u(ks[1], (5,), 3 * 5 * 5),
        # ConvTranspose2d(5, 8, 3): weight (5,8,3,3)
        "wt1": u(ks[2], (5, 8, 3, 3), 5 * 3 * 3),
        "bt1": u(ks[3], (8,), 5 * 3 * 3),
        # ConvTranspose2d(8, 32, 4): weight (8,32,4,4)
        "wt2": u(ks[4], (8, 32, 4, 4), 8 * 4 * 4),
        "bt2": u(ks[5], (32,), 8 * 4 * 4),
        # ConvTranspose2d(32, 128, 5): weight (32,128,5,5)
        "wt3": u(ks[6], (32, 128, 5, 5), 32 * 5 * 5),
        "bt3": u(ks[7], (128,), 32 * 5 * 5),
    }


# ----------------------------------------------------------------------------
# Pure-JAX (lax.conv) reference for correctness checking
# ----------------------------------------------------------------------------
def _ref_forward(x, p):
    dn = ("NCHW", "OIHW", "NCHW")

    def conv(x, w, b, pad):
        o = jax.lax.conv_general_dilated(x, w, (1, 1), [(pad, pad)] * 2,
                                         dimension_numbers=dn)
        return o + b[None, :, None, None]

    def convt(x, wt, b, s, pad):
        k = wt.shape[2]
        w = jnp.flip(wt, (2, 3)).transpose(1, 0, 2, 3)
        o = jax.lax.conv_general_dilated(
            x, w, (1, 1), [(k - 1 - pad, k - 1 - pad)] * 2,
            lhs_dilation=(s, s), dimension_numbers=dn)
        return o + b[None, :, None, None]

    v1 = conv(x, p["w1"], p["b1"], 2)
    v2 = convt(v1, p["wt1"], p["bt1"], 2, 1)
    v3 = convt(v2, p["wt2"], p["bt2"], 2, 1)
    v4 = convt(v3, p["wt3"], p["bt3"], 4, 2)
    return jnp.clip(v4, MIN_VALUE, MAX_VALUE)


if __name__ == "__main__":
    key = jax.random.PRNGKey(0)
    pkey, xkey = jax.random.split(key)
    params = init_params(pkey)

    # input: (batch=2, channels=3, 8, 8) -> output (2, 128, 117, 117)
    x = jax.random.normal(xkey, (2, 3, 8, 8), jnp.float32)

    fwd = jax.jit(model_forward)
    out = jax.block_until_ready(fwd(x, params))

    ref = _ref_forward(x, params)
    assert out.shape == ref.shape == (2, 128, 117, 117), out.shape
    assert jnp.allclose(out, ref, atol=1e-3, rtol=1e-3), "mismatch vs reference"

    print("KERNEL_OK")
</pallas_src>

<mosaic_0001>
module attributes {stable_mosaic.version = 11 : i64} {
  func.func @_phase_gemm_kernel(%arg0: i32, %arg1: memref<128x75xf32, #tpu.memory_space<vmem>>, %arg2: memref<1x75x5xf32, #tpu.memory_space<vmem>>, %arg3: memref<1x5xf32, #tpu.memory_space<vmem>>, %arg4: memref<1x128x5xf32, #tpu.memory_space<vmem>>) attributes {dimension_semantics = [#tpu.dimension_semantics<parallel>], iteration_bounds = array<i64: 1>, scalar_prefetch = 0 : i64, scratch_operands = 0 : i64, tpu.core_type = #tpu.core_type<tc>, window_params = [{pipeline_mode = #tpu.pipeline_mode<synchronous>, transform_indices = @transform_0, window_bounds = array<i64: 128, 75>}, {transform_indices = @transform_1, window_bounds = array<i64: 1, 75, 5>}, {pipeline_mode = #tpu.pipeline_mode<synchronous>, transform_indices = @transform_2, window_bounds = array<i64: 1, 5>}, {transform_indices = @transform_3, window_bounds = array<i64: 1, 128, 5>}]} {
    %c0 = arith.constant 0 : index
    %c0_0 = arith.constant 0 : index
    %0 = vector.load %arg1[%c0, %c0_0] : memref<128x75xf32, #tpu.memory_space<vmem>>, vector<128x75xf32>
    %c0_1 = arith.constant 0 : index
    %c0_2 = arith.constant 0 : index
    %c0_3 = arith.constant 0 : index
    %1 = vector.load %arg2[%c0_1, %c0_2, %c0_3] : memref<1x75x5xf32, #tpu.memory_space<vmem>>, vector<1x75x5xf32>
    %2 = vector.shape_cast %1 : vector<1x75x5xf32> to vector<75x5xf32>
    %cst = arith.constant dense<0.000000e+00> : vector<128x5xf32>
    %3 = tpu.matmul %0, %2, %cst {dimension_numbers = #tpu.dot_dimension_numbers<[1], [0], [0], [1], [0, 0, 1, 1], [], []>} : vector<128x75xf32>, vector<75x5xf32>, vector<128x5xf32> -> vector<128x5xf32>
    %c0_4 = arith.constant 0 : index
    %c0_5 = arith.constant 0 : index
    %4 = vector.load %arg3[%c0_4, %c0_5] : memref<1x5xf32, #tpu.memory_space<vmem>>, vector<1x5xf32>
    %5 = vector.broadcast %4 : vector<1x5xf32> to vector<128x5xf32>
    %6 = arith.addf %3, %5 : vector<128x5xf32>
    %c0_6 = arith.constant 0 : index
    %c0_7 = arith.constant 0 : index
    %c0_8 = arith.constant 0 : index
    %7 = vector.load %arg4[%c0_6, %c0_7, %c0_8] : memref<1x128x5xf32, #tpu.memory_space<vmem>>, vector<1x128x5xf32>
    %8 = vector.shape_cast %7 : vector<1x128x5xf32> to vector<128x5xf32>
    %9 = vector.shape_cast %6 : vector<128x5xf32> to vector<1x128x5xf32>
    tpu.vector_store %arg4[%c0_6, %c0_7, %c0_8], %9 {strides = array<i32>} : memref<1x128x5xf32, #tpu.memory_space<vmem>>, vector<1x128x5xf32>,
    return
  }
  func.func @transform_0(%arg0: i32) -> (i32, i32) {
    %c0_i32 = arith.constant 0 : i32
    %c0_i32_0 = arith.constant 0 : i32
    %c0_i32_1 = arith.constant 0 : i32
    return %c0_i32, %c0_i32_0 : i32, i32
  }
  func.func @transform_1(%arg0: i32) -> (i32, i32, i32) {
    %c0_i32 = arith.constant 0 : i32
    %c0_i32_0 = arith.constant 0 : i32
    %c0_i32_1 = arith.constant 0 : i32
    return %arg0, %c0_i32, %c0_i32_0 : i32, i32, i32
  }
  func.func @transform_2(%arg0: i32) -> (i32, i32) {
    %c0_i32 = arith.constant 0 : i32
    %c0_i32_0 = arith.constant 0 : i32
    %c0_i32_1 = arith.constant 0 : i32
    return %c0_i32, %c0_i32_0 : i32, i32
  }
  func.func @transform_3(%arg0: i32) -> (i32, i32, i32) {
    %c0_i32 = arith.constant 0 : i32
    %c0_i32_0 = arith.constant 0 : i32
    %c0_i32_1 = arith.constant 0 : i32
    return %arg0, %c0_i32, %c0_i32_0 : i32, i32, i32
  }
}

module attributes {stable_mosaic.version = 11 : i64} {
  func.func @_phase_gemm_kernel(%arg0: i32, %arg1: memref<128x20xf32, #tpu.memory_space<vmem>>, %arg2: memref<1x20x8xf32, #tpu.memory_space<vmem>>, %arg3: memref<1x8xf32, #tpu.memory_space<vmem>>, %arg4: memref<1x128x8xf32, #tpu.memory_space<vmem>>) attributes {dimension_semantics = [#tpu.dimension_semantics<parallel>], iteration_bounds = array<i64: 4>, scalar_prefetch = 0 : i64, scratch_operands = 0 : i64, tpu.core_type = #tpu.core_type<tc>, window_params = [{pipeline_mode = #tpu.pipeline_mode<synchronous>, transform_indices = @transform_0, window_bounds = array<i64: 128, 20>}, {transform_indices = @transform_1, window_bounds = array<i64: 1, 20, 8>}, {pipeline_mode = #tpu.pipeline_mode<synchronous>, transform_indices = @transform_2, window_bounds = array<i64: 1, 8>}, {transform_indices = @transform_3, window_bounds = array<i64: 1, 128, 8>}]} {
    %c0 = arith.constant 0 : index
    %c0_0 = arith.constant 0 : index
    %0 = vector.load %arg1[%c0, %c0_0] : memref<128x20xf32, #tpu.memory_space<vmem>>, vector<128x20xf32>
    %c0_1 = arith.constant 0 : index
    %c0_2 = arith.constant 0 : index
    %c0_3 = arith.constant 0 : index
    %1 = vector.load %arg2[%c0_1, %c0_2, %c0_3] : memref<1x20x8xf32, #tpu.memory_space<vmem>>, vector<1x20x8xf32>
    %2 = vector.shape_cast %1 : vector<1x20x8xf32> to vector<20x8xf32>
    %cst = arith.constant dense<0.000000e+00> : vector<128x8xf32>
    %3 = tpu.matmul %0, %2, %cst {dimension_numbers = #tpu.dot_dimension_numbers<[1], [0], [0], [1], [0, 0, 1, 1], [], []>} : vector<128x20xf32>, vector<20x8xf32>, vector<128x8xf32> -> vector<128x8xf32>
    %c0_4 = arith.constant 0 : index
    %c0_5 = arith.constant 0 : index
    %4 = vector.load %arg3[%c0_4, %c0_5] : memref<1x8xf32, #tpu.memory_space<vmem>>, vector<1x8xf32>
    %5 = vector.broadcast %4 : vector<1x8xf32> to vector<128x8xf32>
    %6 = arith.addf %3, %5 : vector<128x8xf32>
    %c0_6 = arith.constant 0 : index
    %c0_7 = arith.constant 0 : index
    %c0_8 = arith.constant 0 : index
    %7 = vector.load %arg4[%c0_6, %c0_7, %c0_8] : memref<1x128x8xf32, #tpu.memory_space<vmem>>, vector<1x128x8xf32>
    %8 = vector.shape_cast %7 : vector<1x128x8xf32> to vector<128x8xf32>
    %9 = vector.shape_cast %6 : vector<128x8xf32> to vector<1x128x8xf32>
    tpu.vector_store %arg4[%c0_6, %c0_7, %c0_8], %9 {strides = array<i32>} : memref<1x128x8xf32, #tpu.memory_space<vmem>>, vector<1x128x8xf32>,
    return
  }
  func.func @transform_0(%arg0: i32) -> (i32, i32) {
    %c0_i32 = arith.constant 0 : i32
    %c0_i32_0 = arith.constant 0 : i32
    %c0_i32_1 = arith.constant 0 : i32
    return %c0_i32, %c0_i32_0 : i32, i32
  }
  func.func @transform_1(%arg0: i32) -> (i32, i32, i32) {
    %c0_i32 = arith.constant 0 : i32
    %c0_i32_0 = arith.constant 0 : i32
    %c0_i32_1 = arith.constant 0 : i32
    return %arg0, %c0_i32, %c0_i32_0 : i32, i32, i32
  }
  func.func @transform_2(%arg0: i32) -> (i32, i32) {
    %c0_i32 = arith.constant 0 : i32
    %c0_i32_0 = arith.constant 0 : i32
    %c0_i32_1 = arith.constant 0 : i32
    return %c0_i32, %c0_i32_0 : i32, i32
  }
  func.func @transform_3(%arg0: i32) -> (i32, i32, i32) {
    %c0_i32 = arith.constant 0 : i32
    %c0_i32_0 = arith.constant 0 : i32
    %c0_i32_1 = arith.constant 0 : i32
    return %arg0, %c0_i32, %c0_i32_0 : i32, i32, i32
  }
}

module attributes {stable_mosaic.version = 11 : i64} {
  func.func @_phase_gemm_kernel(%arg0: i32, %arg1: memref<450x72xf32, #tpu.memory_space<vmem>>, %arg2: memref<1x72x32xf32, #tpu.memory_space<vmem>>, %arg3: memref<1x32xf32, #tpu.memory_space<vmem>>, %arg4: memref<1x450x32xf32, #tpu.memory_space<vmem>>) attributes {dimension_semantics = [#tpu.dimension_semantics<parallel>], iteration_bounds = array<i64: 4>, scalar_prefetch = 0 : i64, scratch_operands = 0 : i64, tpu.core_type = #tpu.core_type<tc>, window_params = [{pipeline_mode = #tpu.pipeline_mode<synchronous>, transform_indices = @transform_0, window_bounds = array<i64: 450, 72>}, {transform_indices = @transform_1, window_bounds = array<i64: 1, 72, 32>}, {pipeline_mode = #tpu.pipeline_mode<synchronous>, transform_indices = @transform_2, window_bounds = array<i64: 1, 32>}, {transform_indices = @transform_3, window_bounds = array<i64: 1, 450, 32>}]} {
    %c0 = arith.constant 0 : index
    %c0_0 = arith.constant 0 : index
    %0 = vector.load %arg1[%c0, %c0_0] : memref<450x72xf32, #tpu.memory_space<vmem>>, vector<450x72xf32>
    %c0_1 = arith.constant 0 : index
    %c0_2 = arith.constant 0 : index
    %c0_3 = arith.constant 0 : index
    %1 = vector.load %arg2[%c0_1, %c0_2, %c0_3] : memref<1x72x32xf32, #tpu.memory_space<vmem>>, vector<1x72x32xf32>
    %2 = vector.shape_cast %1 : vector<1x72x32xf32> to vector<72x32xf32>
    %cst = arith.constant dense<0.000000e+00> : vector<450x32xf32>
    %3 = tpu.matmul %0, %2, %cst {dimension_numbers = #tpu.dot_dimension_numbers<[1], [0], [0], [1], [0, 0, 1, 1], [], []>} : vector<450x72xf32>, vector<72x32xf32>, vector<450x32xf32> -> vector<450x32xf32>
    %c0_4 = arith.constant 0 : index
    %c0_5 = arith.constant 0 : index
    %4 = vector.load %arg3[%c0_4, %c0_5] : memref<1x32xf32, #tpu.memory_space<vmem>>, vector<1x32xf32>
    %5 = vector.broadcast %4 : vector<1x32xf32> to vector<450x32xf32>
    %6 = arith.addf %3, %5 : vector<450x32xf32>
    %c0_6 = arith.constant 0 : index
    %c0_7 = arith.constant 0 : index
    %c0_8 = arith.constant 0 : index
    %7 = vector.load %arg4[%c0_6, %c0_7, %c0_8] : memref<1x450x32xf32, #tpu.memory_space<vmem>>, vector<1x450x32xf32>
    %8 = vector.shape_cast %7 : vector<1x450x32xf32> to vector<450x32xf32>
    %9 = vector.shape_cast %6 : vector<450x32xf32> to vector<1x450x32xf32>
    tpu.vector_store %arg4[%c0_6, %c0_7, %c0_8], %9 {strides = array<i32>} : memref<1x450x32xf32, #tpu.memory_space<vmem>>, vector<1x450x32xf32>,
    return
  }
  func.func @transform_0(%arg0: i32) -> (i32, i32) {
    %c0_i32 = arith.constant 0 : i32
    %c0_i32_0 = arith.constant 0 : i32
    %c0_i32_1 = arith.constant 0 : i32
    return %c0_i32, %c0_i32_0 : i32, i32
  }
  func.func @transform_1(%arg0: i32) -> (i32, i32, i32) {
    %c0_i32 = arith.constant 0 : i32
    %c0_i32_0 = arith.constant 0 : i32
    %c0_i32_1 = arith.constant 0 : i32
    return %arg0, %c0_i32, %c0_i32_0 : i32, i32, i32
  }
  func.func @transform_2(%arg0: i32) -> (i32, i32) {
    %c0_i32 = arith.constant 0 : i32
    %c0_i32_0 = arith.constant 0 : i32
    %c0_i32_1 = arith.constant 0 : i32
    return %c0_i32, %c0_i32_0 : i32, i32
  }
  func.func @transform_3(%arg0: i32) -> (i32, i32, i32) {
    %c0_i32 = arith.constant 0 : i32
    %c0_i32_0 = arith.constant 0 : i32
    %c0_i32_1 = arith.constant 0 : i32
    return %arg0, %c0_i32, %c0_i32_0 : i32, i32, i32
  }
}

module attributes {stable_mosaic.version = 11 : i64} {
  func.func @_phase_gemm_kernel(%arg0: i32, %arg1: memref<1800x128xf32, #tpu.memory_space<vmem>>, %arg2: memref<1x128x128xf32, #tpu.memory_space<vmem>>, %arg3: memref<1x128xf32, #tpu.memory_space<vmem>>, %arg4: memref<1x1800x128xf32, #tpu.memory_space<vmem>>) attributes {dimension_semantics = [#tpu.dimension_semantics<parallel>], iteration_bounds = array<i64: 16>, scalar_prefetch = 0 : i64, scratch_operands = 0 : i64, tpu.core_type = #tpu.core_type<tc>, window_params = [{pipeline_mode = #tpu.pipeline_mode<synchronous>, transform_indices = @transform_0, window_bounds = array<i64: 1800, 128>}, {transform_indices = @transform_1, window_bounds = array<i64: 1, 128, 128>}, {pipeline_mode = #tpu.pipeline_mode<synchronous>, transform_indices = @transform_2, window_bounds = array<i64: 1, 128>}, {transform_indices = @transform_3, window_bounds = array<i64: 1, 1800, 128>}]} {
    %c0 = arith.constant 0 : index
    %c0_0 = arith.constant 0 : index
    %0 = vector.load %arg1[%c0, %c0_0] : memref<1800x128xf32, #tpu.memory_space<vmem>>, vector<1800x128xf32>
    %c0_1 = arith.constant 0 : index
    %c0_2 = arith.constant 0 : index
    %c0_3 = arith.constant 0 : index
    %1 = vector.load %arg2[%c0_1, %c0_2, %c0_3] : memref<1x128x128xf32, #tpu.memory_space<vmem>>, vector<1x128x128xf32>
    %2 = vector.shape_cast %1 : vector<1x128x128xf32> to vector<128x128xf32>
    %cst = arith.constant dense<0.000000e+00> : vector<1800x128xf32>
    %3 = tpu.matmul %0, %2, %cst {dimension_numbers = #tpu.dot_dimension_numbers<[1], [0], [0], [1], [0, 0, 1, 1], [], []>} : vector<1800x128xf32>, vector<128x128xf32>, vector<1800x128xf32> -> vector<1800x128xf32>
    %c0_4 = arith.constant 0 : index
    %c0_5 = arith.constant 0 : index
    %4 = vector.load %arg3[%c0_4, %c0_5] : memref<1x128xf32, #tpu.memory_space<vmem>>, vector<1x128xf32>
    %5 = vector.broadcast %4 : vector<1x128xf32> to vector<1800x128xf32>
    %6 = arith.addf %3, %5 : vector<1800x128xf32>
    %cst_6 = arith.constant 2.70100093 : f32
    %cst_7 = arith.constant 2.99899912 : f32
    %7 = vector.broadcast %cst_6 : f32 to vector<1800x128xf32>
    %8 = arith.maximumf %7, %6 : vector<1800x128xf32>
    %9 = vector.broadcast %cst_7 : f32 to vector<1800x128xf32>
    %10 = arith.minimumf %9, %8 : vector<1800x128xf32>
    %c0_8 = arith.constant 0 : index
    %c0_9 = arith.constant 0 : index
    %c0_10 = arith.constant 0 : index
    %11 = vector.load %arg4[%c0_8, %c0_9, %c0_10] : memref<1x1800x128xf32, #tpu.memory_space<vmem>>, vector<1x1800x128xf32>
    %12 = vector.shape_cast %11 : vector<1x1800x128xf32> to vector<1800x128xf32>
    %13 = vector.shape_cast %10 : vector<1800x128xf32> to vector<1x1800x128xf32>
    tpu.vector_store %arg4[%c0_8, %c0_9, %c0_10], %13 {strides = array<i32>} : memref<1x1800x128xf32, #tpu.memory_space<vmem>>, vector<1x1800x128xf32>,
    return
  }
  func.func @transform_0(%arg0: i32) -> (i32, i32) {
    %c0_i32 = arith.constant 0 : i32
    %c0_i32_0 = arith.constant 0 : i32
    %c0_i32_1 = arith.constant 0 : i32
    return %c0_i32, %c0_i32_0 : i32, i32
  }
  func.func @transform_1(%arg0: i32) -> (i32, i32, i32) {
    %c0_i32 = arith.constant 0 : i32
    %c0_i32_0 = arith.constant 0 : i32
    %c0_i32_1 = arith.constant 0 : i32
    return %arg0, %c0_i32, %c0_i32_0 : i32, i32, i32
  }
  func.func @transform_2(%arg0: i32) -> (i32, i32) {
    %c0_i32 = arith.constant 0 : i32
    %c0_i32_0 = arith.constant 0 : i32
    %c0_i32_1 = arith.constant 0 : i32
    return %c0_i32, %c0_i32_0 : i32, i32
  }
  func.func @transform_3(%arg0: i32) -> (i32, i32, i32) {
    %c0_i32 = arith.constant 0 : i32
    %c0_i32_0 = arith.constant 0 : i32
    %c0_i32_1 = arith.constant 0 : i32
    return %arg0, %c0_i32, %c0_i32_0 : i32, i32, i32
  }
}

</mosaic_0001>

<bundles_post_ra>
// kernel: model_forward.4
= control target key start
LH: loop header
LB: loop body
LE: loop exit
PB: predicated region body
PF: predicated region fallthrough
CT: control target
= control target key end

     0   :  { %8 = vsyncpa [#allocation3], 0  ;;  %s425_s12 = smov [#allocation2]   ;;  %s617_s0 = inlined_call_operand.vmem [shape: f32[128,75], index: 0, kind: input, shape index: {}]   ;;  %s618_s1 = inlined_call_operand.vmem [shape: f32[1,75,5], index: 1, kind: input, shape index: {}]   ;;  %s619_s2 = inlined_call_operand.hbm [shape: f32[1,5], index: 2, kind: input, shape index: {}]   ;;  %s620_s3 = inlined_call_operand.vmem [shape: f32[1,128,5], index: 3, kind: output, shape index: {}]  }
   0x1   :  { %s19_s13 = sshll.u32 %s425_s12, 4  ;;  %s401_s16 = scalar_lea.hbm %s619_s2, 16  ;;  %s20_s13 = int_to_ptr.vmem [resolvable:$true] %s19_s13 }
   0x2   :  { %p402_p0 = scmp.ne.s32.totalorder %s619_s2, %s401_s16  ;;  %p405_p1 = scmp.lt.u32.totalorder %s401_s16, %s619_s2 }
   0x4   :  { %p407_p2 = pnand %p405_p1, %p402_p0 }
   0x6   :  { %410 = shalt.err (!%p407_p2)
}
   0x7   :  { %s411_s21 = scalar_lea.vmem %s20_s13, 16  ;;  %s415_s22 = scalar_lea.vmem %s20_s13, 32 }
   0x8   :  { %p412_p3 = scmp.ne.s32.totalorder %s20_s13, %s411_s21  ;;  %p416_p4 = scmp.lt.s32.totalorder %s20_s13, %s20_s13 }
   0x9   :  { %p417_p5 = scmp.lt.s32.totalorder %s415_s22, %s411_s21 }
   0xb   :  { %p418_p6 = por %p417_p5, %p416_p4 }
   0xd   :  { %p419_p7 = pnand %p418_p6, %p412_p3 }
   0xf   :  { %422 = shalt.err (!%p419_p7)
}
  0x10   :  { %22 = dma.hbm_to_vmem [thread:$0]  %s619_s2, 16, %s20_s13, [#allocation3]  }
  0x11   :  { %423 = dma.done.wait [#allocation3], 16  }
  0x12   :  { %424 = vsyncadd [#allocation3], 4294967280  ;;  %v42_v0 = vld [vmem:[%s618_s1] sm:$0xff]  ;;  %v43_v1 = vld [vmem:[%s618_s1 + $0x8] sm:$0xff]  ;;  %vm59_vm0 = vcmask 613376   ;;  %vm108_vm1 = vcmask 1042432  }
  0x13   :  { %v44_v2 = vld [vmem:[%s618_s1 + $0x10] sm:$0xff]  ;;  %v367_v3 = vpack.c.bf16 %v43_v1, %v42_v0  ;;  %v45_v4 = vld [vmem:[%s618_s1 + $0x18] sm:$0xff]  ;;  %v46_v6 = vld [vmem:[%s618_s1 + $0x20] sm:$0xff]  ;;  %vm426_vm2 = vmmov 1   ;;  %vm257_vm4 = vcmask 39936  }
  0x14   :  { %v371_v5 = vpack.c.bf16 %v45_v4, %v44_v2  ;;  %v47_v7 = vld [vmem:[%s618_s1 + $0x28] sm:$0xff]  ;;  %v26_v8 = vld [vmem:[%s617_s0] sm:$0xff]  ;;  %v48_v11 = vld [vmem:[%s618_s1 + $0x30] sm:$0xff] }
  0x15   :  { %368 = vmatprep.subr.bf16.mxu0 %v367_v3  ;;  %389 = vmatprep.subr.bf16.mxu1 %v367_v3  ;;  %v34_v9 = vld [vmem:[%s617_s0 + $0x40] sm:$0xff]  ;;  %v375_v10 = vpack.c.bf16 %v47_v7, %v46_v6  ;;  %v49_v12 = vld [vmem:[%s618_s1 + $0x38] sm:$0xff]  ;;  %v51_v15 = vld [vmem:[%s618_s1 + $0x48] sm:$0x7] }
  0x16   :  { %370 = vmatpush3.bf16.msra.mxu0 %v367_v3  ;;  %394 = vmatpush3.bf16.msra.mxu1 %v367_v3  ;;  %v379_v13 = vpack.c.bf16 %v49_v12, %v48_v11  ;;  %v50_v14 = vld [vmem:[%s618_s1 + $0x40] sm:$0xff]  ;;  %vm384_vm3 = vmpackc.low %vm108_vm1, %vm426_vm2  ;;  %v27_v17 = vld [vmem:[%s617_s0 + $0x8] sm:$0xff] }
  0x17   :  { %372 = vmatprep.subr.bf16.mxu0 %v371_v5  ;;  %390 = vmatprep.subr.bf16.mxu1 %v371_v5  ;;  %v383_v16 = vpack.c.bf16 %v51_v15, %v50_v14  ;;  %v35_v18 = vld [vmem:[%s617_s0 + $0x48] sm:$0xff]  ;;  %v28_v19 = vld [vmem:[%s617_s0 + $0x10] sm:$0xff]  ;;  %v29_v21 = vld [vmem:[%s617_s0 + $0x18] sm:$0xff] }
  0x18   :  { %343 = vmatprep.mubr.msk.f32.mxu0 %vm59_vm0, %v26_v8  ;;  %355 = vmatprep.mubr.msk.f32.mxu1 %vm59_vm0, %v34_v9  ;;  %v36_v20 = vld [vmem:[%s617_s0 + $0x50] sm:$0xff]  ;;  %v37_v22 = vld [vmem:[%s617_s0 + $0x58] sm:$0xff]  ;;  %v30_v23 = vld [vmem:[%s617_s0 + $0x20] sm:$0xff] }
  0x19   :  { %v38_v24 = vld [vmem:[%s617_s0 + $0x60] sm:$0xff]  ;;  %v31_v25 = vld [vmem:[%s617_s0 + $0x28] sm:$0xff]  ;;  %v32_v27 = vld [vmem:[%s617_s0 + $0x30] sm:$0xff] }
  0x1a   :  { %374 = vmatpush3.bf16.msra.mxu0 %v371_v5  ;;  %395 = vmatpush3.bf16.msra.mxu1 %v371_v5  ;;  %v39_v26 = vld [vmem:[%s617_s0 + $0x68] sm:$0xff]  ;;  %v40_v28 = vld [vmem:[%s617_s0 + $0x70] sm:$0xff]  ;;  %v33_v29 = vld [vmem:[%s617_s0 + $0x38] sm:$0xff] }
  0x1b   :  { %376 = vmatprep.subr.bf16.mxu0 %v375_v10  ;;  %391 = vmatprep.subr.bf16.mxu1 %v375_v10  ;;  %v41_v30 = vld [vmem:[%s617_s0 + $0x78] sm:$0xff]  ;;  %v279_v31 = vld [vmem:[#allocation2] ss:$0 sm:$0xff] }
  0x1e   :  { %378 = vmatpush3.bf16.msra.mxu0 %v375_v10  ;;  %396 = vmatpush3.bf16.msra.mxu1 %v375_v10 }
  0x1f   :  { %380 = vmatprep.subr.bf16.mxu0 %v379_v13  ;;  %392 = vmatprep.subr.bf16.mxu1 %v379_v13 }
  0x22   :  { %382 = vmatpush3.bf16.msra.mxu0 %v379_v13  ;;  %397 = vmatpush3.bf16.msra.mxu1 %v379_v13 }
  0x23   :  { %385 = vmatprep.subr.msk.bf16.mxu0 %vm384_vm3, %v383_v16  ;;  %393 = vmatprep.subr.msk.bf16.mxu1 %vm384_vm3, %v383_v16 }
  0x26   :  { %388 = vmatpush3.bf16.msk.msra.mxu0 %vm384_vm3, %v383_v16  ;;  %398 = vmatpush3.bf16.msk.msra.mxu1 %vm384_vm3, %v383_v16 }
  0x29   :  { %344 = vmatmul.mubr.msk.f32.vlgmr.msra.gmra.mrb[0].mxu0 %vm59_vm0, %v27_v17  ;;  %356 = vmatmul.mubr.msk.f32.vlgmr.msra.gmra.mrb[0].mxu1 %vm59_vm0, %v35_v18 }
  0x2a   :  { %346 = vmatprep.mubr.msk.f32.mxu0 %vm59_vm0, %v28_v19  ;;  %358 = vmatprep.mubr.msk.f32.mxu1 %vm59_vm0, %v36_v20 }
  0x2d   :  { %347 = vmatmul.mubr.msk.f32.gmra.mrb[2].mxu0 %vm59_vm0, %v29_v21  ;;  %359 = vmatmul.mubr.msk.f32.gmra.mrb[2].mxu1 %vm59_vm0, %v37_v22 }
  0x2e   :  { %349 = vmatprep.mubr.msk.f32.mxu0 %vm59_vm0, %v30_v23  ;;  %361 = vmatprep.mubr.msk.f32.mxu1 %vm59_vm0, %v38_v24 }
  0x31   :  { %350 = vmatmul.mubr.msk.f32.gmra.mrb[4].mxu0 %vm59_vm0, %v31_v25  ;;  %362 = vmatmul.mubr.msk.f32.gmra.mrb[4].mxu1 %vm59_vm0, %v39_v26 }
  0x32   :  { %352 = vmatprep.mubr.msk.f32.mxu0 %vm59_vm0, %v32_v27  ;;  %364 = vmatprep.mubr.msk.f32.mxu1 %vm59_vm0, %v40_v28 }
  0x35   :  { %353 = vmatmul.mubr.msk.f32.gmra.mrb[6].mxu0 %vm59_vm0, %v33_v29  ;;  %365 = vmatmul.mubr.msk.f32.gmra.mrb[6].mxu1 %vm59_vm0, %v41_v30 }
  0xfc   :  { %v345_v32 = vpop.f32.mrb[0].mxu0  ;;  %v357_v33 = vpop.f32.mrb[0].mxu1 }
  0xfd   :  { %v184_v34 = vadd.f32 %v345_v32, %v279_v31  ;;  %v224_v35 = vadd.f32 %v357_v33, %v279_v31  ;;  %v178_v36 = vpop.f32.mrb[1].mxu0  ;;  %v218_v37 = vpop.f32.mrb[1].mxu1 }
  0xfe   :  { %v179_v38 = vadd.f32 %v279_v31, %v178_v36  ;;  %v219_v39 = vadd.f32 %v279_v31, %v218_v37 }
  0xff   :  { %259 = vst.msk [vmem:[%s620_s3 + $0x8] sm:$0xff] %vm257_vm4, %v184_v34  ;;  %267 = vst.msk [vmem:[%s620_s3 + $0x48] sm:$0xff] %vm257_vm4, %v224_v35 }
 0x100   :  { %258 = vst.msk [vmem:[%s620_s3] sm:$0xff] %vm257_vm4, %v179_v38  ;;  %266 = vst.msk [vmem:[%s620_s3 + $0x40] sm:$0xff] %vm257_vm4, %v219_v39  ;;  %v348_v40 = vpop.f32.mrb[2].mxu0  ;;  %v360_v41 = vpop.f32.mrb[2].mxu1 }
 0x101   :  { %v194_v42 = vadd.f32 %v348_v40, %v279_v31  ;;  %v234_v43 = vadd.f32 %v360_v41, %v279_v31  ;;  %v188_v44 = vpop.f32.mrb[3].mxu0  ;;  %v228_v45 = vpop.f32.mrb[3].mxu1 }
 0x102   :  { %v189_v46 = vadd.f32 %v279_v31, %v188_v44  ;;  %v229_v47 = vadd.f32 %v279_v31, %v228_v45 }
 0x103   :  { %261 = vst.msk [vmem:[%s620_s3 + $0x18] sm:$0xff] %vm257_vm4, %v194_v42  ;;  %269 = vst.msk [vmem:[%s620_s3 + $0x58] sm:$0xff] %vm257_vm4, %v234_v43 }
 0x104   :  { %260 = vst.msk [vmem:[%s620_s3 + $0x10] sm:$0xff] %vm257_vm4, %v189_v46  ;;  %268 = vst.msk [vmem:[%s620_s3 + $0x50] sm:$0xff] %vm257_vm4, %v229_v47  ;;  %v351_v48 = vpop.f32.mrb[4].mxu0  ;;  %v363_v49 = vpop.f32.mrb[4].mxu1 }
 0x105   :  { %v204_v50 = vadd.f32 %v351_v48, %v279_v31  ;;  %v244_v51 = vadd.f32 %v363_v49, %v279_v31  ;;  %v198_v52 = vpop.f32.mrb[5].mxu0  ;;  %v238_v53 = vpop.f32.mrb[5].mxu1 }
 0x106   :  { %v199_v54 = vadd.f32 %v279_v31, %v198_v52  ;;  %v239_v55 = vadd.f32 %v279_v31, %v238_v53 }
 0x107   :  { %263 = vst.msk [vmem:[%s620_s3 + $0x28] sm:$0xff] %vm257_vm4, %v204_v50  ;;  %271 = vst.msk [vmem:[%s620_s3 + $0x68] sm:$0xff] %vm257_vm4, %v244_v51 }
 0x108   :  { %262 = vst.msk [vmem:[%s620_s3 + $0x20] sm:$0xff] %vm257_vm4, %v199_v54  ;;  %270 = vst.msk [vmem:[%s620_s3 + $0x60] sm:$0xff] %vm257_vm4, %v239_v55  ;;  %v354_v56 = vpop.f32.mrb[6].mxu0  ;;  %v366_v57 = vpop.f32.mrb[6].mxu1 }
 0x109   :  { %v214_v58 = vadd.f32 %v354_v56, %v279_v31  ;;  %v254_v59 = vadd.f32 %v366_v57, %v279_v31  ;;  %v208_v60 = vpop.f32.mrb[7].mxu0  ;;  %v248_v61 = vpop.f32.mrb[7].mxu1 }
 0x10a   :  { %v209_v62 = vadd.f32 %v279_v31, %v208_v60  ;;  %v249_v63 = vadd.f32 %v279_v31, %v248_v61 }
 0x10b   :  { %265 = vst.msk [vmem:[%s620_s3 + $0x38] sm:$0xff] %vm257_vm4, %v214_v58  ;;  %273 = vst.msk [vmem:[%s620_s3 + $0x78] sm:$0xff] %vm257_vm4, %v254_v59 }
 0x10c   :  { %264 = vst.msk [vmem:[%s620_s3 + $0x30] sm:$0xff] %vm257_vm4, %v209_v62  ;;  %272 = vst.msk [vmem:[%s620_s3 + $0x70] sm:$0xff] %vm257_vm4, %v249_v63 }
 0x10d   :  { %278 = vsyncpa [#allocation3], 1 }

// kernel: model_forward.5
= control target key start
LH: loop header
LB: loop body
LE: loop exit
PB: predicated region body
PF: predicated region fallthrough
CT: control target
= control target key end

     0   :  { %8 = vsyncpa [#allocation3], 0  ;;  %s661_s12 = smov 0   ;;  %s819_s0 = inlined_call_operand.vmem [shape: f32[128,20], index: 0, kind: input, shape index: {}]   ;;  %s820_s1 = inlined_call_operand.vmem [shape: f32[4,20,8], index: 1, kind: input, shape index: {}]   ;;  %s821_s2 = inlined_call_operand.hbm [shape: f32[1,8], index: 2, kind: input, shape index: {}]   ;;  %s822_s3 = inlined_call_operand.vmem [shape: f32[4,128,8], index: 3, kind: output, shape index: {}]  }
   0x1 LB: > { %s667_s13 = sadd.s32 4294967295, %s638_s12   ;;  %p494_p0 = scmp.ge.s32.totalorder %s638_s12, 1  ;;  %s638_s12 = sphi %s661_s12, %s14_s12  }
   0x2   : > { %p113_p1 = scmp.lt.s32.totalorder %s638_s12, 5  ;;  %p823_p3 = scmp.eq.s32.totalorder %s667_s13, 0 }
   0x3   : > { %s640_s15 = smov [#allocation2]   ;;  %s600_s20 = scalar_lea.hbm %s821_s2, 16 }
   0x4   : > { %p671_p2 = pnand %p494_p0, %p113_p1  ;;  %s129_s16 = sshll.u32 %s640_s15, 4  ;;  %s130_s16 = int_to_ptr.vmem [resolvable:$true] %s129_s16 }
   0x5   : > { %p601_p6 = scmp.ne.s32.totalorder %s821_s2, %s600_s20  ;;  %p607_p10 = scmp.lt.u32.totalorder %s600_s20, %s821_s2 }
   0x6   : > { %s825_s14 = scalar_select %p671_p2, 1, 0 }
   0x7   : > { %p585_p4 = pneg %p671_p2 }
   0x9   : > { %p680_p5 = pnand %p823_p3, %p585_p4 }
   0xb   : > { %p602_p7 = pneg %p680_p5 }
   0xd   : > { %p603_p8 = pnand %p602_p7, %p601_p6 }
   0xf   : > { %p604_p9 = pneg %p603_p8 }
  0x11   : > { %p609_p11 = pnand %p607_p10, %p604_p9 }
  0x13   : > { %612 = shalt.err (!%p609_p11)
}
  0x14   : > { %s613_s25 = scalar_lea.vmem %s130_s16, 16  ;;  %s620_s26 = scalar_lea.vmem %s130_s16, 32 }
  0x15   : > { %p614_p12 = scmp.ne.s32.totalorder %s130_s16, %s613_s25  ;;  %p621_p1 = scmp.lt.s32.totalorder %s130_s16, %s130_s16 }
  0x16   : > { %p622_p4 = scmp.lt.s32.totalorder %s620_s26, %s613_s25 }
  0x17   : > { %p616_p13 = pnand %p614_p12, %p602_p7 }
  0x18   : > { %p623_p3 = por %p622_p4, %p621_p1 }
  0x19   : > { %p617_p0 = pneg %p616_p13 }
  0x1b   : > { %p624_p2 = pnand %p623_p3, %p617_p0 }
  0x1d   : > { %627 = shalt.err (!%p624_p2)
}
  0x1e   : > { %588 = dma.hbm_to_vmem [thread:$0]  (!%p680_p5), %s821_s2, 16, %s130_s16, [#allocation3]  }
  0x1f   : > { %p827_p6 = scmp.ne.s32.totalorder %s825_s14, 0 }
  0x20   : > { %p828_p8 = scmp.eq.s32.totalorder (!%p827_p6), %s667_s13, 0 }
  0x21   : > { %150 = sbr.rel (%p827_p6) target bundleno = 284 (0x11c), region = 32 }
  0x28   : > { %633 = dma.done.wait (%p828_p8), [#allocation3], 16   ;;  %p829_p7 = pmov %p828_p8 }
  0x29   : > { %p174_p9 = scmp.lt.s32.totalorder %s667_s13, 3  ;;  %vm210_vm0 = vcmask 162816   ;;  %v184_v3 = vld [vmem:[%s819_s0] sm:$0xff]  ;;  %vm259_vm1 = vcmask 1043456   ;;  %v185_v6 = vld [vmem:[%s819_s0 + $0x8] sm:$0xff]  ;;  %v186_v8 = vld [vmem:[%s819_s0 + $0x10] sm:$0xff] }
  0x2a   : > { %635 = vsyncadd (%p829_p7), [#allocation3], 4294967280  ;;  %v192_v4 = vld [vmem:[%s819_s0 + $0x40] sm:$0xff]  ;;  %548 = vmatprep.mubr.msk.f32.mxu0 %vm210_vm0, %v184_v3  ;;  %v193_v7 = vld [vmem:[%s819_s0 + $0x48] sm:$0xff]  ;;  %vm408_vm2 = vcmask 64512  }
  0x2b   : > { %s831_s13 = smov (!%p174_p9, %s667_s13), 3  ;;  %560 = vmatprep.mubr.msk.f32.mxu1 %vm210_vm0, %v192_v4  ;;  %v194_v9 = vld [vmem:[%s819_s0 + $0x50] sm:$0xff]  ;;  %v187_v10 = vld [vmem:[%s819_s0 + $0x18] sm:$0xff]  ;;  %v188_v12 = vld [vmem:[%s819_s0 + $0x20] sm:$0xff] }
  0x2c   : > { %s580_s29 = smul.u32 24, %s831_s13  ;;  %v195_v11 = vld [vmem:[%s819_s0 + $0x58] sm:$0xff]  ;;  %v196_v13 = vld [vmem:[%s819_s0 + $0x60] sm:$0xff]  ;;  %v189_v14 = vld [vmem:[%s819_s0 + $0x28] sm:$0xff]  ;;  %s522_s15 = sshll.u32 %s831_s13, 7 }
  0x2d   : > { %v197_v15 = vld [vmem:[%s819_s0 + $0x68] sm:$0xff]  ;;  %v190_v16 = vld [vmem:[%s819_s0 + $0x30] sm:$0xff]  ;;  %v191_v18 = vld [vmem:[%s819_s0 + $0x38] sm:$0xff]  ;;  %s782_s18 = scalar_lea.vmem %s822_s3, %s522_s15 }
  0x2e   : > { %s178_s5 = scalar_lea.vmem %s820_s1, %s580_s29  ;;  %v198_v17 = vld [vmem:[%s819_s0 + $0x70] sm:$0xff]  ;;  %v199_v19 = vld [vmem:[%s819_s0 + $0x78] sm:$0xff]  ;;  %v502_v20 = vld [vmem:[#allocation2] ss:$0 sm:$0xff] }
  0x2f   : > { %v200_v0 = vld [vmem:[%s178_s5] sm:$0xff]  ;;  %v201_v1 = vld [vmem:[%s178_s5 + $0x8] sm:$0xff]  ;;  %v202_v5 = vld [vmem:[%s178_s5 + $0x10] sm:$0xf] }
  0x30   : > { %v572_v2 = vpack.c.bf16 %v201_v1, %v200_v0 }
  0x32   : > { %573 = vmatprep.subr.bf16.mxu0 %v572_v2  ;;  %576 = vmatprep.subr.bf16.mxu1 %v572_v2 }
  0x33   : > { %575 = vmatpush3.bf16.msra.mxu0 %v572_v2  ;;  %578 = vmatpush3.bf16.msra.mxu1 %v572_v2 }
  0x34   : > { %546 = vmatprep.subr.msk.mxu0 %vm259_vm1, %v202_v5  ;;  %577 = vmatprep.subr.msk.mxu1 %vm259_vm1, %v202_v5 }
  0x37   : > { %547 = vmatpush3.msk.msra.mxu0 %vm259_vm1, %v202_v5  ;;  %579 = vmatpush3.msk.msra.mxu1 %vm259_vm1, %v202_v5 }
  0x38   : > { %549 = vmatmul.mubr.msk.f32.vlgmr.msra.gmra.mrb[0].mxu0 %vm210_vm0, %v185_v6  ;;  %561 = vmatmul.mubr.msk.f32.vlgmr.msra.gmra.mrb[0].mxu1 %vm210_vm0, %v193_v7 }
  0x39   : > { %551 = vmatprep.mubr.msk.f32.mxu0 %vm210_vm0, %v186_v8  ;;  %563 = vmatprep.mubr.msk.f32.mxu1 %vm210_vm0, %v194_v9 }
  0x3c   : > { %552 = vmatmul.mubr.msk.f32.gmra.mrb[2].mxu0 %vm210_vm0, %v187_v10  ;;  %564 = vmatmul.mubr.msk.f32.gmra.mrb[2].mxu1 %vm210_vm0, %v195_v11 }
  0x3d   : > { %554 = vmatprep.mubr.msk.f32.mxu0 %vm210_vm0, %v188_v12  ;;  %566 = vmatprep.mubr.msk.f32.mxu1 %vm210_vm0, %v196_v13 }
  0x40   : > { %555 = vmatmul.mubr.msk.f32.gmra.mrb[4].mxu0 %vm210_vm0, %v189_v14  ;;  %567 = vmatmul.mubr.msk.f32.gmra.mrb[4].mxu1 %vm210_vm0, %v197_v15 }
  0x41   : > { %557 = vmatprep.mubr.msk.f32.mxu0 %vm210_vm0, %v190_v16  ;;  %569 = vmatprep.mubr.msk.f32.mxu1 %vm210_vm0, %v198_v17 }
  0x44   : > { %558 = vmatmul.mubr.msk.f32.gmra.mrb[6].mxu0 %vm210_vm0, %v191_v18  ;;  %570 = vmatmul.mubr.msk.f32.gmra.mrb[6].mxu1 %vm210_vm0, %v199_v19 }
 0x10b   : > { %v550_v21 = vpop.f32.mrb[0].mxu0  ;;  %v562_v22 = vpop.f32.mrb[0].mxu1 }
 0x10c   : > { %v335_v23 = vadd.f32 %v550_v21, %v502_v20  ;;  %v375_v24 = vadd.f32 %v562_v22, %v502_v20  ;;  %v329_v25 = vpop.f32.mrb[1].mxu0  ;;  %v369_v26 = vpop.f32.mrb[1].mxu1 }
 0x10d   : > { %v330_v27 = vadd.f32 %v502_v20, %v329_v25  ;;  %v370_v28 = vadd.f32 %v502_v20, %v369_v26 }
 0x10e   : > { %410 = vst.msk [vmem:[%s782_s18 + $0x8] sm:$0xff] %vm408_vm2, %v335_v23  ;;  %418 = vst.msk [vmem:[%s782_s18 + $0x48] sm:$0xff] %vm408_vm2, %v375_v24 }
 0x10f   : > { %409 = vst.msk [vmem:[%s782_s18] sm:$0xff] %vm408_vm2, %v330_v27  ;;  %417 = vst.msk [vmem:[%s782_s18 + $0x40] sm:$0xff] %vm408_vm2, %v370_v28  ;;  %v553_v29 = vpop.f32.mrb[2].mxu0  ;;  %v565_v30 = vpop.f32.mrb[2].mxu1 }
 0x110   : > { %v345_v31 = vadd.f32 %v553_v29, %v502_v20  ;;  %v385_v32 = vadd.f32 %v565_v30, %v502_v20  ;;  %v339_v33 = vpop.f32.mrb[3].mxu0  ;;  %v379_v34 = vpop.f32.mrb[3].mxu1 }
 0x111   : > { %v340_v35 = vadd.f32 %v502_v20, %v339_v33  ;;  %v380_v36 = vadd.f32 %v502_v20, %v379_v34 }
 0x112   : > { %412 = vst.msk [vmem:[%s782_s18 + $0x18] sm:$0xff] %vm408_vm2, %v345_v31  ;;  %420 = vst.msk [vmem:[%s782_s18 + $0x58] sm:$0xff] %vm408_vm2, %v385_v32 }
 0x113   : > { %411 = vst.msk [vmem:[%s782_s18 + $0x10] sm:$0xff] %vm408_vm2, %v340_v35  ;;  %419 = vst.msk [vmem:[%s782_s18 + $0x50] sm:$0xff] %vm408_vm2, %v380_v36  ;;  %v556_v37 = vpop.f32.mrb[4].mxu0  ;;  %v568_v38 = vpop.f32.mrb[4].mxu1 }
 0x114   : > { %v355_v39 = vadd.f32 %v556_v37, %v502_v20  ;;  %v395_v40 = vadd.f32 %v568_v38, %v502_v20  ;;  %v349_v41 = vpop.f32.mrb[5].mxu0  ;;  %v389_v42 = vpop.f32.mrb[5].mxu1 }
 0x115   : > { %v350_v43 = vadd.f32 %v502_v20, %v349_v41  ;;  %v390_v44 = vadd.f32 %v502_v20, %v389_v42 }
 0x116   : > { %414 = vst.msk [vmem:[%s782_s18 + $0x28] sm:$0xff] %vm408_vm2, %v355_v39  ;;  %422 = vst.msk [vmem:[%s782_s18 + $0x68] sm:$0xff] %vm408_vm2, %v395_v40 }
 0x117   : > { %413 = vst.msk [vmem:[%s782_s18 + $0x20] sm:$0xff] %vm408_vm2, %v350_v43  ;;  %421 = vst.msk [vmem:[%s782_s18 + $0x60] sm:$0xff] %vm408_vm2, %v390_v44  ;;  %v559_v45 = vpop.f32.mrb[6].mxu0  ;;  %v571_v46 = vpop.f32.mrb[6].mxu1 }
 0x118   : > { %v365_v47 = vadd.f32 %v559_v45, %v502_v20  ;;  %v405_v48 = vadd.f32 %v571_v46, %v502_v20  ;;  %v359_v49 = vpop.f32.mrb[7].mxu0  ;;  %v399_v50 = vpop.f32.mrb[7].mxu1 }
 0x119   : > { %v360_v51 = vadd.f32 %v502_v20, %v359_v49  ;;  %v400_v52 = vadd.f32 %v502_v20, %v399_v50 }
 0x11a   : > { %416 = vst.msk [vmem:[%s782_s18 + $0x38] sm:$0xff] %vm408_vm2, %v365_v47  ;;  %424 = vst.msk [vmem:[%s782_s18 + $0x78] sm:$0xff] %vm408_vm2, %v405_v48 }
 0x11b   : > { %415 = vst.msk [vmem:[%s782_s18 + $0x30] sm:$0xff] %vm408_vm2, %v360_v51  ;;  %423 = vst.msk [vmem:[%s782_s18 + $0x70] sm:$0xff] %vm408_vm2, %v400_v52 }
 0x11c PF: > { %s14_s12 = sadd.s32 1, %s638_s12  }
 0x11d   : > { %p11_p2 = scmp.ge.s32.totalorder %s14_s12, 6  }
 0x11f   :  { %13 = sbr.rel (!%p11_p2) target bundleno = 1 (0x1), region = 67 }
 0x126   :  { %446 = vsyncpa [#allocation3], 1 }
 0x127   :  { %448 = vsyncpa [#allocation3 + $0x1], 1 }

// kernel: model_forward.6
= control target key start
LH: loop header
LB: loop body
LE: loop exit
PB: predicated region body
PF: predicated region fallthrough
CT: control target
= control target key end

     0   :  { %s1268_s12 = smov 0   ;;  %s1810_s0 = inlined_call_operand.vmem [shape: f32[450,72], index: 0, kind: input, shape index: {}]   ;;  %s1811_s1 = inlined_call_operand.vmem [shape: f32[4,72,32], index: 1, kind: input, shape index: {}]   ;;  %s1812_s2 = inlined_call_operand.vmem [shape: f32[1,32], index: 2, kind: input, shape index: {}]   ;;  %s1813_s3 = inlined_call_operand.vmem [shape: f32[4,450,32], index: 3, kind: output, shape index: {}]  }
   0x1 LB: > { %s880_s13 = sadd.s32 4294967295, %s1243_s12   ;;  %p884_p0 = scmp.ge.s32.totalorder %s1243_s12, 1  ;;  %s1243_s12 = sphi %s1268_s12, %s13_s12  }
   0x2   : > { %p137_p1 = scmp.lt.s32.totalorder %s1243_s12, 5 }
   0x4   : > { %p138_p2 = pnand %p884_p0, %p137_p1 }
   0x5   : > { %p161_p3 = scmp.lt.s32.totalorder (!%p138_p2), %s880_s13, 3  ;;  %v1245_v0 = vmov (!%p138_p2), 0.0|0.0   ;;  %vm1246_vm0 = vmmov (!%p138_p2), 0   ;;  %v1247_v1 = vmov (!%p138_p2), 0.0   ;;  %v171_v15 = vld [vmem:[%s1810_s0] sm:$0xff] (!%p138_p2)  ;;  %vm244_vm1 = vcmask (!%p138_p2), 588800  }
   0x6   : > { %141 = sbr.rel (%p138_p2) target bundleno = 364 (0x16c), region = 32  ;;  %1202 = vmatprep.subr.bf16.mxu0 (!%p138_p2), %v1245_v0  ;;  %1214 = vmatprep.subr.bf16.mxu1 (!%p138_p2), %v1245_v0  ;;  %v200_v16 = vld [vmem:[%s1810_s0 + $0xe8] sm:$0xff] (!%p138_p2)  ;;  %v201_v18 = vld [vmem:[%s1810_s0 + $0xf0] sm:$0xff] (!%p138_p2)  ;;  %v202_v20 = vld [vmem:[%s1810_s0 + $0xf8] sm:$0xff] (!%p138_p2)  ;;  %vm766_vm2 = vcmask (!%p138_p2), 261120   ;;  %vm823_vm3 = vcmask (!%p138_p2), 254976  }
   0x7   : > { %1031 = vmatprep.mubr.msk.f32.mxu0 (!%p138_p2), %vm1246_vm0, %v1247_v1  ;;  %1118 = vmatprep.mubr.msk.f32.mxu1 (!%p138_p2), %vm1246_vm0, %v1247_v1  ;;  %v172_v17 = vld [vmem:[%s1810_s0 + $0x8] sm:$0xff] (!%p138_p2)  ;;  %v173_v19 = vld [vmem:[%s1810_s0 + $0x10] sm:$0xff] (!%p138_p2)  ;;  %v174_v21 = vld [vmem:[%s1810_s0 + $0x18] sm:$0xff] (!%p138_p2) }
   0x8   : > { %v203_v22 = vld [vmem:[%s1810_s0 + $0x100] sm:$0xff] (!%p138_p2)  ;;  %v204_v24 = vld [vmem:[%s1810_s0 + $0x108] sm:$0xff] (!%p138_p2)  ;;  %v205_v26 = vld [vmem:[%s1810_s0 + $0x110] sm:$0xff] (!%p138_p2) }
   0x9   : > { %v175_v23 = vld [vmem:[%s1810_s0 + $0x20] sm:$0xff] (!%p138_p2)  ;;  %v176_v25 = vld [vmem:[%s1810_s0 + $0x28] sm:$0xff] (!%p138_p2)  ;;  %v177_v27 = vld [vmem:[%s1810_s0 + $0x30] sm:$0xff] (!%p138_p2) }
   0xa   : > { %v206_v28 = vld [vmem:[%s1810_s0 + $0x118] sm:$0xff] (!%p138_p2)  ;;  %v207_v30 = vld [vmem:[%s1810_s0 + $0x120] sm:$0xff] (!%p138_p2)  ;;  %v208_v32 = vld [vmem:[%s1810_s0 + $0x128] sm:$0xff] (!%p138_p2) }
   0xb   : > { %v178_v29 = vld [vmem:[%s1810_s0 + $0x38] sm:$0xff] (!%p138_p2)  ;;  %v179_v31 = vld [vmem:[%s1810_s0 + $0x40] sm:$0xff] (!%p138_p2)  ;;  %v180_v33 = vld [vmem:[%s1810_s0 + $0x48] sm:$0xff] (!%p138_p2) }
   0xc   : > { %v209_v34 = vld [vmem:[%s1810_s0 + $0x130] sm:$0xff] (!%p138_p2)  ;;  %v210_v36 = vld [vmem:[%s1810_s0 + $0x138] sm:$0xff] (!%p138_p2)  ;;  %v211_v38 = vld [vmem:[%s1810_s0 + $0x140] sm:$0xff] (!%p138_p2) }
   0xd   : > { %s1815_s13 = smov (!%p161_p3, %s880_s13), 3  ;;  %v181_v35 = vld [vmem:[%s1810_s0 + $0x50] sm:$0xff]  ;;  %v182_v37 = vld [vmem:[%s1810_s0 + $0x58] sm:$0xff]  ;;  %v183_v39 = vld [vmem:[%s1810_s0 + $0x60] sm:$0xff] }
   0xe   : > { %s1224_s14 = smul.u32 72, %s1815_s13  ;;  %v212_v40 = vld [vmem:[%s1810_s0 + $0x148] sm:$0xff]  ;;  %v213_v42 = vld [vmem:[%s1810_s0 + $0x150] sm:$0xff]  ;;  %v214_v44 = vld [vmem:[%s1810_s0 + $0x158] sm:$0xff] }
   0xf   : > { %v184_v41 = vld [vmem:[%s1810_s0 + $0x68] sm:$0xff]  ;;  %v185_v43 = vld [vmem:[%s1810_s0 + $0x70] sm:$0xff]  ;;  %v186_v45 = vld [vmem:[%s1810_s0 + $0x78] sm:$0xff]  ;;  %s1225_s5 = smul.u32 456, %s1815_s13 }
  0x10   : > { %s165_s17 = scalar_lea.vmem %s1811_s1, %s1224_s14  ;;  %v215_v46 = vld [vmem:[%s1810_s0 + $0x160] sm:$0xff]  ;;  %v216_v48 = vld [vmem:[%s1810_s0 + $0x168] sm:$0xff]  ;;  %v217_v50 = vld [vmem:[%s1810_s0 + $0x170] sm:$0xff] }
  0x11   : > { %v228_v2 = vld [vmem:[%s165_s17] sm:$0xff]  ;;  %v229_v3 = vld [vmem:[%s165_s17 + $0x8] sm:$0xff]  ;;  %v230_v4 = vld [vmem:[%s165_s17 + $0x10] sm:$0xff]  ;;  %s1635_s10 = scalar_lea.vmem %s1813_s3, %s1225_s5 }
  0x12   : > { %v1203_v5 = vpack.c.bf16 %v229_v3, %v228_v2  ;;  %v231_v6 = vld [vmem:[%s165_s17 + $0x18] sm:$0xff]  ;;  %v232_v8 = vld [vmem:[%s165_s17 + $0x20] sm:$0xff]  ;;  %v233_v9 = vld [vmem:[%s165_s17 + $0x28] sm:$0xff] }
  0x13   : > { %v1206_v7 = vpack.c.bf16 %v231_v6, %v230_v4  ;;  %v1209_v10 = vpack.c.bf16 %v233_v9, %v232_v8  ;;  %v234_v11 = vld [vmem:[%s165_s17 + $0x30] sm:$0xff]  ;;  %v235_v12 = vld [vmem:[%s165_s17 + $0x38] sm:$0xff]  ;;  %v236_v14 = vld [vmem:[%s165_s17 + $0x40] sm:$0xff] }
  0x14   : > { %1204 = vmatpush3.bf16.msra.mxu0 %v1203_v5  ;;  %1219 = vmatpush3.bf16.msra.mxu1 %v1203_v5  ;;  %v1212_v13 = vpack.c.bf16 %v235_v12, %v234_v11  ;;  %v187_v47 = vld [vmem:[%s1810_s0 + $0x80] sm:$0xff]  ;;  %v188_v49 = vld [vmem:[%s1810_s0 + $0x88] sm:$0xff]  ;;  %v189_v51 = vld [vmem:[%s1810_s0 + $0x90] sm:$0xff] }
  0x15   : > { %1205 = vmatprep.subr.bf16.mxu0 %v1245_v0  ;;  %1215 = vmatprep.subr.bf16.mxu1 %v1245_v0  ;;  %v218_v52 = vld [vmem:[%s1810_s0 + $0x178] sm:$0xff]  ;;  %v219_v54 = vld [vmem:[%s1810_s0 + $0x180] sm:$0xff]  ;;  %v220_v56 = vld [vmem:[%s1810_s0 + $0x188] sm:$0xff] }
  0x16   : > { %v190_v53 = vld [vmem:[%s1810_s0 + $0x98] sm:$0xff]  ;;  %v191_v55 = vld [vmem:[%s1810_s0 + $0xa0] sm:$0xff]  ;;  %v192_v57 = vld [vmem:[%s1810_s0 + $0xa8] sm:$0xff] }
  0x17   : > { %v221_v58 = vld [vmem:[%s1810_s0 + $0x190] sm:$0xff]  ;;  %v222_v60 = vld [vmem:[%s1810_s0 + $0x198] sm:$0xff]  ;;  %v223_v62 = vld [vmem:[%s1810_s0 + $0x1a0] sm:$0xff] }
  0x18   : > { %1207 = vmatpush3.bf16.msra.mxu0 %v1206_v7  ;;  %1220 = vmatpush3.bf16.msra.mxu1 %v1206_v7  ;;  %v193_v59 = vld [vmem:[%s1810_s0 + $0xb0] sm:$0xff]  ;;  %v194_v61 = vld [vmem:[%s1810_s0 + $0xb8] sm:$0xff]  ;;  %v195_v63 = vld [vmem:[%s1810_s0 + $0xc0] sm:$0xff] }
  0x19   : > { %1208 = vmatprep.subr.bf16.mxu0 %v1245_v0  ;;  %1216 = vmatprep.subr.bf16.mxu1 %v1245_v0  ;;  %v196_v2 = vld [vmem:[%s1810_s0 + $0xc8] sm:$0xff]  ;;  %v225_v3 = vld [vmem:[%s1810_s0 + $0x1b0] sm:$0xff]  ;;  %v226_v5 = vld [vmem:[%s1810_s0 + $0x1b8] sm:$0xff] }
  0x1a   : > { %v197_v4 = vld [vmem:[%s1810_s0 + $0xd0] sm:$0xff]  ;;  %v198_v6 = vld [vmem:[%s1810_s0 + $0xd8] sm:$0xff]  ;;  %v227_v7 = vld [vmem:[%s1810_s0 + $0x1c0] sm:$0x3] }
  0x1b   : > { %v199_v8 = vld [vmem:[%s1810_s0 + $0xe0] sm:$0xff] }
  0x1c   : > { %1210 = vmatpush3.bf16.msra.mxu0 %v1209_v10  ;;  %1221 = vmatpush3.bf16.msra.mxu1 %v1209_v10  ;;  %v1630_v9 = vld [vmem:[%s1812_s2] ss:$0 sm:$0xff] }
  0x1d   : > { %1211 = vmatprep.subr.bf16.mxu0 %v1245_v0  ;;  %1217 = vmatprep.subr.bf16.mxu1 %v1245_v0  ;;  %v224_v0 = vld [vmem:[%s1810_s0 + $0x1a8] sm:$0xff] }
  0x20   : > { %1213 = vmatpush3.bf16.msra.mxu0 %v1212_v13  ;;  %1222 = vmatpush3.bf16.msra.mxu1 %v1212_v13 }
  0x21   : > { %1029 = vmatprep.subr.mxu0 %v1247_v1  ;;  %1218 = vmatprep.subr.mxu1 %v1247_v1 }
  0x24   : > { %1030 = vmatpush3.msra.mxu0 %v236_v14  ;;  %1223 = vmatpush3.msra.mxu1 %v236_v14 }
  0x25   : > { %1032 = vmatmul.mubr.msk.f32.vlgmr.msra.gmra.mrb[0].mxu0 %vm244_vm1, %v171_v15  ;;  %1119 = vmatmul.mubr.msk.f32.vlgmr.msra.gmra.mrb[0].mxu1 %vm244_vm1, %v200_v16 }
  0x26   : > { %1034 = vmatprep.mubr.msk.f32.mxu0 %vm1246_vm0, %v1247_v1  ;;  %1121 = vmatprep.mubr.msk.f32.mxu1 %vm1246_vm0, %v1247_v1 }
  0x29   : > { %1035 = vmatmul.mubr.msk.f32.gmra.mrb[2].mxu0 %vm244_vm1, %v172_v17  ;;  %1122 = vmatmul.mubr.msk.f32.gmra.mrb[2].mxu1 %vm244_vm1, %v201_v18 }
  0x2a   : > { %1037 = vmatprep.mubr.msk.f32.mxu0 %vm1246_vm0, %v1247_v1  ;;  %1124 = vmatprep.mubr.msk.f32.mxu1 %vm1246_vm0, %v1247_v1 }
  0x2d   : > { %1038 = vmatmul.mubr.msk.f32.gmra.mrb[4].mxu0 %vm244_vm1, %v173_v19  ;;  %1125 = vmatmul.mubr.msk.f32.gmra.mrb[4].mxu1 %vm244_vm1, %v202_v20 }
  0x2e   : > { %1040 = vmatprep.mubr.msk.f32.mxu0 %vm1246_vm0, %v1247_v1  ;;  %1127 = vmatprep.mubr.msk.f32.mxu1 %vm1246_vm0, %v1247_v1 }
  0x31   : > { %1041 = vmatmul.mubr.msk.f32.gmra.mrb[6].mxu0 %vm244_vm1, %v174_v21  ;;  %1128 = vmatmul.mubr.msk.f32.gmra.mrb[6].mxu1 %vm244_vm1, %v203_v22 }
  0x32   : > { %1043 = vmatprep.mubr.msk.f32.mxu0 %vm1246_vm0, %v1247_v1  ;;  %1130 = vmatprep.mubr.msk.f32.mxu1 %vm1246_vm0, %v1247_v1 }
  0x35   : > { %1044 = vmatmul.mubr.msk.f32.gmra.mrb[8].mxu0 %vm244_vm1, %v175_v23  ;;  %1131 = vmatmul.mubr.msk.f32.gmra.mrb[8].mxu1 %vm244_vm1, %v204_v24 }
  0x36   : > { %1046 = vmatprep.mubr.msk.f32.mxu0 %vm1246_vm0, %v1247_v1  ;;  %1133 = vmatprep.mubr.msk.f32.mxu1 %vm1246_vm0, %v1247_v1 }
  0x39   : > { %1047 = vmatmul.mubr.msk.f32.gmra.mrb[10].mxu0 %vm244_vm1, %v176_v25  ;;  %1134 = vmatmul.mubr.msk.f32.gmra.mrb[10].mxu1 %vm244_vm1, %v205_v26 }
  0x3a   : > { %1049 = vmatprep.mubr.msk.f32.mxu0 %vm1246_vm0, %v1247_v1  ;;  %1136 = vmatprep.mubr.msk.f32.mxu1 %vm1246_vm0, %v1247_v1 }
  0x3d   : > { %1050 = vmatmul.mubr.msk.f32.gmra.mrb[12].mxu0 %vm244_vm1, %v177_v27  ;;  %1137 = vmatmul.mubr.msk.f32.gmra.mrb[12].mxu1 %vm244_vm1, %v206_v28 }
  0x3e   : > { %1052 = vmatprep.mubr.msk.f32.mxu0 %vm1246_vm0, %v1247_v1  ;;  %1139 = vmatprep.mubr.msk.f32.mxu1 %vm1246_vm0, %v1247_v1 }
  0x41   : > { %1053 = vmatmul.mubr.msk.f32.gmra.mrb[14].mxu0 %vm244_vm1, %v178_v29  ;;  %1140 = vmatmul.mubr.msk.f32.gmra.mrb[14].mxu1 %vm244_vm1, %v207_v30 }
  0x42   : > { %1055 = vmatprep.mubr.msk.f32.mxu0 %vm1246_vm0, %v1247_v1  ;;  %1142 = vmatprep.mubr.msk.f32.mxu1 %vm1246_vm0, %v1247_v1 }
  0x45   : > { %1056 = vmatmul.mubr.msk.f32.gmra.mrb[16].mxu0 %vm244_vm1, %v179_v31  ;;  %1143 = vmatmul.mubr.msk.f32.gmra.mrb[16].mxu1 %vm244_vm1, %v208_v32 }
  0x46   : > { %1058 = vmatprep.mubr.msk.f32.mxu0 %vm1246_vm0, %v1247_v1  ;;  %1145 = vmatprep.mubr.msk.f32.mxu1 %vm1246_vm0, %v1247_v1 }
  0x49   : > { %1059 = vmatmul.mubr.msk.f32.gmra.mrb[18].mxu0 %vm244_vm1, %v180_v33  ;;  %1146 = vmatmul.mubr.msk.f32.gmra.mrb[18].mxu1 %vm244_vm1, %v209_v34 }
  0x4a   : > { %1061 = vmatprep.mubr.msk.f32.mxu0 %vm1246_vm0, %v1247_v1  ;;  %1148 = vmatprep.mubr.msk.f32.mxu1 %vm1246_vm0, %v1247_v1 }
  0x4d   : > { %1062 = vmatmul.mubr.msk.f32.gmra.mrb[20].mxu0 %vm244_vm1, %v181_v35  ;;  %1149 = vmatmul.mubr.msk.f32.gmra.mrb[20].mxu1 %vm244_vm1, %v210_v36 }
  0x4e   : > { %1064 = vmatprep.mubr.msk.f32.mxu0 %vm1246_vm0, %v1247_v1  ;;  %1151 = vmatprep.mubr.msk.f32.mxu1 %vm1246_vm0, %v1247_v1 }
  0x51   : > { %1065 = vmatmul.mubr.msk.f32.gmra.mrb[22].mxu0 %vm244_vm1, %v182_v37  ;;  %1152 = vmatmul.mubr.msk.f32.gmra.mrb[22].mxu1 %vm244_vm1, %v211_v38 }
  0x52   : > { %1067 = vmatprep.mubr.msk.f32.mxu0 %vm1246_vm0, %v1247_v1  ;;  %1154 = vmatprep.mubr.msk.f32.mxu1 %vm1246_vm0, %v1247_v1 }
  0x55   : > { %1068 = vmatmul.mubr.msk.f32.gmra.mrb[24].mxu0 %vm244_vm1, %v183_v39  ;;  %1155 = vmatmul.mubr.msk.f32.gmra.mrb[24].mxu1 %vm244_vm1, %v212_v40 }
  0x56   : > { %1070 = vmatprep.mubr.msk.f32.mxu0 %vm1246_vm0, %v1247_v1  ;;  %1157 = vmatprep.mubr.msk.f32.mxu1 %vm1246_vm0, %v1247_v1 }
  0x59   : > { %1071 = vmatmul.mubr.msk.f32.gmra.mrb[26].mxu0 %vm244_vm1, %v184_v41  ;;  %1158 = vmatmul.mubr.msk.f32.gmra.mrb[26].mxu1 %vm244_vm1, %v213_v42 }
  0x5a   : > { %1073 = vmatprep.mubr.msk.f32.mxu0 %vm1246_vm0, %v1247_v1  ;;  %1160 = vmatprep.mubr.msk.f32.mxu1 %vm1246_vm0, %v1247_v1 }
  0x5d   : > { %1074 = vmatmul.mubr.msk.f32.gmra.mrb[28].mxu0 %vm244_vm1, %v185_v43  ;;  %1161 = vmatmul.mubr.msk.f32.gmra.mrb[28].mxu1 %vm244_vm1, %v214_v44 }
  0x5e   : > { %1076 = vmatprep.mubr.msk.f32.mxu0 %vm1246_vm0, %v1247_v1  ;;  %1163 = vmatprep.mubr.msk.f32.mxu1 %vm1246_vm0, %v1247_v1 }
  0x61   : > { %1077 = vmatmul.mubr.msk.f32.gmra.mrb[30].mxu0 %vm244_vm1, %v186_v45  ;;  %1164 = vmatmul.mubr.msk.f32.gmra.mrb[30].mxu1 %vm244_vm1, %v215_v46 }
  0x62   : > { %1079 = vmatprep.mubr.msk.f32.mxu0 %vm1246_vm0, %v1247_v1  ;;  %1166 = vmatprep.mubr.msk.f32.mxu1 %vm1246_vm0, %v1247_v1 }
  0x65   : > { %1080 = vmatmul.mubr.msk.f32.gmra.mrb[32].mxu0 %vm244_vm1, %v187_v47  ;;  %1167 = vmatmul.mubr.msk.f32.gmra.mrb[32].mxu1 %vm244_vm1, %v216_v48 }
  0x66   : > { %1082 = vmatprep.mubr.msk.f32.mxu0 %vm1246_vm0, %v1247_v1  ;;  %1169 = vmatprep.mubr.msk.f32.mxu1 %vm1246_vm0, %v1247_v1 }
  0x69   : > { %1083 = vmatmul.mubr.msk.f32.gmra.mrb[34].mxu0 %vm244_vm1, %v188_v49  ;;  %1170 = vmatmul.mubr.msk.f32.gmra.mrb[34].mxu1 %vm244_vm1, %v217_v50 }
  0x6a   : > { %1085 = vmatprep.mubr.msk.f32.mxu0 %vm1246_vm0, %v1247_v1  ;;  %1172 = vmatprep.mubr.msk.f32.mxu1 %vm1246_vm0, %v1247_v1 }
  0x6d   : > { %1086 = vmatmul.mubr.msk.f32.gmra.mrb[36].mxu0 %vm244_vm1, %v189_v51  ;;  %1173 = vmatmul.mubr.msk.f32.gmra.mrb[36].mxu1 %vm244_vm1, %v218_v52 }
  0x6e   : > { %1088 = vmatprep.mubr.msk.f32.mxu0 %vm1246_vm0, %v1247_v1  ;;  %1175 = vmatprep.mubr.msk.f32.mxu1 %vm1246_vm0, %v1247_v1 }
  0x71   : > { %1089 = vmatmul.mubr.msk.f32.gmra.mrb[38].mxu0 %vm244_vm1, %v190_v53  ;;  %1176 = vmatmul.mubr.msk.f32.gmra.mrb[38].mxu1 %vm244_vm1, %v219_v54 }
  0x72   : > { %1091 = vmatprep.mubr.msk.f32.mxu0 %vm1246_vm0, %v1247_v1  ;;  %1178 = vmatprep.mubr.msk.f32.mxu1 %vm1246_vm0, %v1247_v1 }
  0x75   : > { %1092 = vmatmul.mubr.msk.f32.gmra.mrb[40].mxu0 %vm244_vm1, %v191_v55  ;;  %1179 = vmatmul.mubr.msk.f32.gmra.mrb[40].mxu1 %vm244_vm1, %v220_v56 }
  0x76   : > { %1094 = vmatprep.mubr.msk.f32.mxu0 %vm1246_vm0, %v1247_v1  ;;  %1181 = vmatprep.mubr.msk.f32.mxu1 %vm1246_vm0, %v1247_v1 }
  0x79   : > { %1095 = vmatmul.mubr.msk.f32.gmra.mrb[42].mxu0 %vm244_vm1, %v192_v57  ;;  %1182 = vmatmul.mubr.msk.f32.gmra.mrb[42].mxu1 %vm244_vm1, %v221_v58 }
  0x7a   : > { %1097 = vmatprep.mubr.msk.f32.mxu0 %vm1246_vm0, %v1247_v1  ;;  %1184 = vmatprep.mubr.msk.f32.mxu1 %vm1246_vm0, %v1247_v1 }
  0x7d   : > { %1098 = vmatmul.mubr.msk.f32.gmra.mrb[44].mxu0 %vm244_vm1, %v193_v59  ;;  %1185 = vmatmul.mubr.msk.f32.gmra.mrb[44].mxu1 %vm244_vm1, %v222_v60 }
  0x7e   : > { %1100 = vmatprep.mubr.msk.f32.mxu0 %vm1246_vm0, %v1247_v1  ;;  %1187 = vmatprep.mubr.msk.f32.mxu1 %vm1246_vm0, %v1247_v1 }
  0x81   : > { %1101 = vmatmul.mubr.msk.f32.gmra.mrb[46].mxu0 %vm244_vm1, %v194_v61  ;;  %1188 = vmatmul.mubr.msk.f32.gmra.mrb[46].mxu1 %vm244_vm1, %v223_v62 }
  0x82   : > { %1103 = vmatprep.mubr.msk.f32.mxu0 %vm1246_vm0, %v1247_v1  ;;  %1190 = vmatprep.mubr.msk.f32.mxu1 %vm1246_vm0, %v1247_v1 }
  0x85   : > { %1104 = vmatmul.mubr.msk.f32.gmra.mrb[48].mxu0 %vm244_vm1, %v195_v63  ;;  %1191 = vmatmul.mubr.msk.f32.gmra.mrb[48].mxu1 %vm244_vm1, %v224_v0 }
  0x86   : > { %1106 = vmatprep.mubr.msk.f32.mxu0 %vm1246_vm0, %v1247_v1  ;;  %1193 = vmatprep.mubr.msk.f32.mxu1 %vm1246_vm0, %v1247_v1 }
  0x89   : > { %1107 = vmatmul.mubr.msk.f32.gmra.mrb[50].mxu0 %vm244_vm1, %v196_v2  ;;  %1194 = vmatmul.mubr.msk.f32.gmra.mrb[50].mxu1 %vm244_vm1, %v225_v3 }
  0x8a   : > { %1109 = vmatprep.mubr.msk.f32.mxu0 %vm1246_vm0, %v1247_v1  ;;  %1196 = vmatprep.mubr.msk.f32.mxu1 %vm1246_vm0, %v1247_v1 }
  0x8d   : > { %1110 = vmatmul.mubr.msk.f32.gmra.mrb[52].mxu0 %vm244_vm1, %v197_v4  ;;  %1197 = vmatmul.mubr.msk.f32.gmra.mrb[52].mxu1 %vm244_vm1, %v226_v5 }
  0x8e   : > { %1112 = vmatprep.mubr.msk.f32.mxu0 %vm1246_vm0, %v1247_v1  ;;  %1199 = vmatprep.mubr.msk.f32.mxu1 %vm1246_vm0, %v1247_v1 }
  0x91   : > { %1113 = vmatmul.mubr.msk.f32.gmra.mrb[54].mxu0 %vm244_vm1, %v198_v6  ;;  %1200 = vmatmul.mubr.msk.f32.gmra.mrb[54].mxu1 %vm244_vm1, %v227_v7 }
  0x92   : > { %1115 = vmatprep.mubr.msk.f32.mxu0 %vm1246_vm0, %v1247_v1 }
  0x95   : > { %1116 = vmatmul.mubr.msk.f32.gmra.mrb[56].mxu0 %vm244_vm1, %v199_v8 }
  0xf8   : > { %v482_v1 = vpop.f32.mrb[0].mxu0  ;;  %v627_v10 = vpop.f32.mrb[0].mxu1 }
  0xf9   : > { %v483_v11 = vadd.f32 %v1630_v9, %v482_v1  ;;  %v1033_v12 = vpop.f32.mrb[1].mxu0  ;;  %v628_v13 = vadd.f32 %v1630_v9, %v627_v10  ;;  %v1120_v14 = vpop.f32.mrb[1].mxu1 }
  0xfb   : > { %767 = vst.msk [vmem:[%s1635_s10] sm:$0xff] %vm766_vm2, %v483_v11  ;;  %796 = vst.msk [vmem:[%s1635_s10 + $0xe8] sm:$0xff] %vm766_vm2, %v628_v13 }
  0xfc   : > { %v487_v15 = vpop.f32.mrb[2].mxu0  ;;  %v632_v16 = vpop.f32.mrb[2].mxu1 }
  0xfd   : > { %v488_v17 = vadd.f32 %v1630_v9, %v487_v15  ;;  %v1036_v18 = vpop.f32.mrb[3].mxu0  ;;  %v633_v19 = vadd.f32 %v1630_v9, %v632_v16  ;;  %v1123_v20 = vpop.f32.mrb[3].mxu1 }
  0xff   : > { %768 = vst.msk [vmem:[%s1635_s10 + $0x8] sm:$0xff] %vm766_vm2, %v488_v17  ;;  %797 = vst.msk [vmem:[%s1635_s10 + $0xf0] sm:$0xff] %vm766_vm2, %v633_v19 }
 0x100   : > { %v492_v21 = vpop.f32.mrb[4].mxu0  ;;  %v637_v22 = vpop.f32.mrb[4].mxu1 }
 0x101   : > { %v493_v23 = vadd.f32 %v1630_v9, %v492_v21  ;;  %v1039_v24 = vpop.f32.mrb[5].mxu0  ;;  %v638_v25 = vadd.f32 %v1630_v9, %v637_v22  ;;  %v1126_v26 = vpop.f32.mrb[5].mxu1 }
 0x103   : > { %769 = vst.msk [vmem:[%s1635_s10 + $0x10] sm:$0xff] %vm766_vm2, %v493_v23  ;;  %798 = vst.msk [vmem:[%s1635_s10 + $0xf8] sm:$0xff] %vm766_vm2, %v638_v25 }
 0x104   : > { %v497_v27 = vpop.f32.mrb[6].mxu0  ;;  %v642_v28 = vpop.f32.mrb[6].mxu1 }
 0x105   : > { %v498_v29 = vadd.f32 %v1630_v9, %v497_v27  ;;  %v1042_v30 = vpop.f32.mrb[7].mxu0  ;;  %v643_v31 = vadd.f32 %v1630_v9, %v642_v28  ;;  %v1129_v32 = vpop.f32.mrb[7].mxu1 }
 0x107   : > { %770 = vst.msk [vmem:[%s1635_s10 + $0x18] sm:$0xff] %vm766_vm2, %v498_v29  ;;  %799 = vst.msk [vmem:[%s1635_s10 + $0x100] sm:$0xff] %vm766_vm2, %v643_v31 }
 0x108   : > { %v502_v33 = vpop.f32.mrb[8].mxu0  ;;  %v647_v34 = vpop.f32.mrb[8].mxu1 }
 0x109   : > { %v503_v35 = vadd.f32 %v1630_v9, %v502_v33  ;;  %v1045_v36 = vpop.f32.mrb[9].mxu0  ;;  %v648_v37 = vadd.f32 %v1630_v9, %v647_v34  ;;  %v1132_v38 = vpop.f32.mrb[9].mxu1 }
 0x10b   : > { %771 = vst.msk [vmem:[%s1635_s10 + $0x20] sm:$0xff] %vm766_vm2, %v503_v35  ;;  %800 = vst.msk [vmem:[%s1635_s10 + $0x108] sm:$0xff] %vm766_vm2, %v648_v37 }
 0x10c   : > { %v507_v39 = vpop.f32.mrb[10].mxu0  ;;  %v652_v40 = vpop.f32.mrb[10].mxu1 }
 0x10d   : > { %v508_v41 = vadd.f32 %v1630_v9, %v507_v39  ;;  %v1048_v42 = vpop.f32.mrb[11].mxu0  ;;  %v653_v43 = vadd.f32 %v1630_v9, %v652_v40  ;;  %v1135_v44 = vpop.f32.mrb[11].mxu1 }
 0x10f   : > { %772 = vst.msk [vmem:[%s1635_s10 + $0x28] sm:$0xff] %vm766_vm2, %v508_v41  ;;  %801 = vst.msk [vmem:[%s1635_s10 + $0x110] sm:$0xff] %vm766_vm2, %v653_v43 }
 0x110   : > { %v512_v45 = vpop.f32.mrb[12].mxu0  ;;  %v657_v46 = vpop.f32.mrb[12].mxu1 }
 0x111   : > { %v513_v47 = vadd.f32 %v1630_v9, %v512_v45  ;;  %v1051_v48 = vpop.f32.mrb[13].mxu0  ;;  %v658_v49 = vadd.f32 %v1630_v9, %v657_v46  ;;  %v1138_v50 = vpop.f32.mrb[13].mxu1 }
 0x113   : > { %773 = vst.msk [vmem:[%s1635_s10 + $0x30] sm:$0xff] %vm766_vm2, %v513_v47  ;;  %802 = vst.msk [vmem:[%s1635_s10 + $0x118] sm:$0xff] %vm766_vm2, %v658_v49 }
 0x114   : > { %v517_v51 = vpop.f32.mrb[14].mxu0  ;;  %v662_v52 = vpop.f32.mrb[14].mxu1 }
 0x115   : > { %v518_v53 = vadd.f32 %v1630_v9, %v517_v51  ;;  %v1054_v54 = vpop.f32.mrb[15].mxu0  ;;  %v663_v55 = vadd.f32 %v1630_v9, %v662_v52  ;;  %v1141_v56 = vpop.f32.mrb[15].mxu1 }
 0x117   : > { %774 = vst.msk [vmem:[%s1635_s10 + $0x38] sm:$0xff] %vm766_vm2, %v518_v53  ;;  %803 = vst.msk [vmem:[%s1635_s10 + $0x120] sm:$0xff] %vm766_vm2, %v663_v55 }
 0x118   : > { %v522_v57 = vpop.f32.mrb[16].mxu0  ;;  %v667_v58 = vpop.f32.mrb[16].mxu1 }
 0x119   : > { %v523_v59 = vadd.f32 %v1630_v9, %v522_v57  ;;  %v1057_v60 = vpop.f32.mrb[17].mxu0  ;;  %v668_v61 = vadd.f32 %v1630_v9, %v667_v58  ;;  %v1144_v62 = vpop.f32.mrb[17].mxu1 }
 0x11b   : > { %775 = vst.msk [vmem:[%s1635_s10 + $0x40] sm:$0xff] %vm766_vm2, %v523_v59  ;;  %804 = vst.msk [vmem:[%s1635_s10 + $0x128] sm:$0xff] %vm766_vm2, %v668_v61 }
 0x11c   : > { %v527_v63 = vpop.f32.mrb[18].mxu0  ;;  %v672_v0 = vpop.f32.mrb[18].mxu1 }
 0x11d   : > { %v528_v2 = vadd.f32 %v1630_v9, %v527_v63  ;;  %v1060_v3 = vpop.f32.mrb[19].mxu0  ;;  %v673_v4 = vadd.f32 %v1630_v9, %v672_v0  ;;  %v1147_v5 = vpop.f32.mrb[19].mxu1 }
 0x11f   : > { %776 = vst.msk [vmem:[%s1635_s10 + $0x48] sm:$0xff] %vm766_vm2, %v528_v2  ;;  %805 = vst.msk [vmem:[%s1635_s10 + $0x130] sm:$0xff] %vm766_vm2, %v673_v4 }
 0x120   : > { %v532_v6 = vpop.f32.mrb[20].mxu0  ;;  %v677_v7 = vpop.f32.mrb[20].mxu1 }
 0x121   : > { %v533_v8 = vadd.f32 %v1630_v9, %v532_v6  ;;  %v1063_v1 = vpop.f32.mrb[21].mxu0  ;;  %v678_v10 = vadd.f32 %v1630_v9, %v677_v7  ;;  %v1150_v11 = vpop.f32.mrb[21].mxu1 }
 0x123   : > { %777 = vst.msk [vmem:[%s1635_s10 + $0x50] sm:$0xff] %vm766_vm2, %v533_v8  ;;  %806 = vst.msk [vmem:[%s1635_s10 + $0x138] sm:$0xff] %vm766_vm2, %v678_v10 }
 0x124   : > { %v537_v12 = vpop.f32.mrb[22].mxu0  ;;  %v682_v13 = vpop.f32.mrb[22].mxu1 }
 0x125   : > { %v538_v14 = vadd.f32 %v1630_v9, %v537_v12  ;;  %v1066_v15 = vpop.f32.mrb[23].mxu0  ;;  %v683_v16 = vadd.f32 %v1630_v9, %v682_v13  ;;  %v1153_v17 = vpop.f32.mrb[23].mxu1 }
 0x127   : > { %778 = vst.msk [vmem:[%s1635_s10 + $0x58] sm:$0xff] %vm766_vm2, %v538_v14  ;;  %807 = vst.msk [vmem:[%s1635_s10 + $0x140] sm:$0xff] %vm766_vm2, %v683_v16 }
 0x128   : > { %v542_v18 = vpop.f32.mrb[24].mxu0  ;;  %v687_v19 = vpop.f32.mrb[24].mxu1 }
 0x129   : > { %v543_v20 = vadd.f32 %v1630_v9, %v542_v18  ;;  %v1069_v21 = vpop.f32.mrb[25].mxu0  ;;  %v688_v22 = vadd.f32 %v1630_v9, %v687_v19  ;;  %v1156_v23 = vpop.f32.mrb[25].mxu1 }
 0x12b   : > { %779 = vst.msk [vmem:[%s1635_s10 + $0x60] sm:$0xff] %vm766_vm2, %v543_v20  ;;  %808 = vst.msk [vmem:[%s1635_s10 + $0x148] sm:$0xff] %vm766_vm2, %v688_v22 }
 0x12c   : > { %v547_v24 = vpop.f32.mrb[26].mxu0  ;;  %v692_v25 = vpop.f32.mrb[26].mxu1 }
 0x12d   : > { %v548_v26 = vadd.f32 %v1630_v9, %v547_v24  ;;  %v1072_v27 = vpop.f32.mrb[27].mxu0  ;;  %v693_v28 = vadd.f32 %v1630_v9, %v692_v25  ;;  %v1159_v29 = vpop.f32.mrb[27].mxu1 }
 0x12f   : > { %780 = vst.msk [vmem:[%s1635_s10 + $0x68] sm:$0xff] %vm766_vm2, %v548_v26  ;;  %809 = vst.msk [vmem:[%s1635_s10 + $0x150] sm:$0xff] %vm766_vm2, %v693_v28 }
 0x130   : > { %v552_v30 = vpop.f32.mrb[28].mxu0  ;;  %v697_v31 = vpop.f32.mrb[28].mxu1 }
 0x131   : > { %v553_v32 = vadd.f32 %v1630_v9, %v552_v30  ;;  %v1075_v33 = vpop.f32.mrb[29].mxu0  ;;  %v698_v34 = vadd.f32 %v1630_v9, %v697_v31  ;;  %v1162_v35 = vpop.f32.mrb[29].mxu1 }
 0x133   : > { %781 = vst.msk [vmem:[%s1635_s10 + $0x70] sm:$0xff] %vm766_vm2, %v553_v32  ;;  %810 = vst.msk [vmem:[%s1635_s10 + $0x158] sm:$0xff] %vm766_vm2, %v698_v34 }
 0x134   : > { %v557_v36 = vpop.f32.mrb[30].mxu0  ;;  %v702_v37 = vpop.f32.mrb[30].mxu1 }
 0x135   : > { %v558_v38 = vadd.f32 %v1630_v9, %v557_v36  ;;  %v1078_v39 = vpop.f32.mrb[31].mxu0  ;;  %v703_v40 = vadd.f32 %v1630_v9, %v702_v37  ;;  %v1165_v41 = vpop.f32.mrb[31].mxu1 }
 0x137   : > { %782 = vst.msk [vmem:[%s1635_s10 + $0x78] sm:$0xff] %vm766_vm2, %v558_v38  ;;  %811 = vst.msk [vmem:[%s1635_s10 + $0x160] sm:$0xff] %vm766_vm2, %v703_v40 }
 0x138   : > { %v562_v42 = vpop.f32.mrb[32].mxu0  ;;  %v707_v43 = vpop.f32.mrb[32].mxu1 }
 0x139   : > { %v563_v44 = vadd.f32 %v1630_v9, %v562_v42  ;;  %v1081_v45 = vpop.f32.mrb[33].mxu0  ;;  %v708_v46 = vadd.f32 %v1630_v9, %v707_v43  ;;  %v1168_v47 = vpop.f32.mrb[33].mxu1 }
 0x13b   : > { %783 = vst.msk [vmem:[%s1635_s10 + $0x80] sm:$0xff] %vm766_vm2, %v563_v44  ;;  %812 = vst.msk [vmem:[%s1635_s10 + $0x168] sm:$0xff] %vm766_vm2, %v708_v46 }
 0x13c   : > { %v567_v48 = vpop.f32.mrb[34].mxu0  ;;  %v712_v49 = vpop.f32.mrb[34].mxu1 }
 0x13d   : > { %v568_v50 = vadd.f32 %v1630_v9, %v567_v48  ;;  %v1084_v51 = vpop.f32.mrb[35].mxu0  ;;  %v713_v52 = vadd.f32 %v1630_v9, %v712_v49  ;;  %v1171_v53 = vpop.f32.mrb[35].mxu1 }
 0x13f   : > { %784 = vst.msk [vmem:[%s1635_s10 + $0x88] sm:$0xff] %vm766_vm2, %v568_v50  ;;  %813 = vst.msk [vmem:[%s1635_s10 + $0x170] sm:$0xff] %vm766_vm2, %v713_v52 }
 0x140   : > { %v572_v54 = vpop.f32.mrb[36].mxu0  ;;  %v717_v55 = vpop.f32.mrb[36].mxu1 }
 0x141   : > { %v573_v56 = vadd.f32 %v1630_v9, %v572_v54  ;;  %v1087_v57 = vpop.f32.mrb[37].mxu0  ;;  %v718_v58 = vadd.f32 %v1630_v9, %v717_v55  ;;  %v1174_v59 = vpop.f32.mrb[37].mxu1 }
 0x143   : > { %785 = vst.msk [vmem:[%s1635_s10 + $0x90] sm:$0xff] %vm766_vm2, %v573_v56  ;;  %814 = vst.msk [vmem:[%s1635_s10 + $0x178] sm:$0xff] %vm766_vm2, %v718_v58 }
 0x144   : > { %v577_v60 = vpop.f32.mrb[38].mxu0  ;;  %v722_v61 = vpop.f32.mrb[38].mxu1 }
 0x145   : > { %v578_v62 = vadd.f32 %v1630_v9, %v577_v60  ;;  %v1090_v63 = vpop.f32.mrb[39].mxu0  ;;  %v723_v0 = vadd.f32 %v1630_v9, %v722_v61  ;;  %v1177_v2 = vpop.f32.mrb[39].mxu1 }
 0x147   : > { %786 = vst.msk [vmem:[%s1635_s10 + $0x98] sm:$0xff] %vm766_vm2, %v578_v62  ;;  %815 = vst.msk [vmem:[%s1635_s10 + $0x180] sm:$0xff] %vm766_vm2, %v723_v0 }
 0x148   : > { %v582_v3 = vpop.f32.mrb[40].mxu0  ;;  %v727_v4 = vpop.f32.mrb[40].mxu1 }
 0x149   : > { %v583_v5 = vadd.f32 %v1630_v9, %v582_v3  ;;  %v1093_v6 = vpop.f32.mrb[41].mxu0  ;;  %v728_v7 = vadd.f32 %v1630_v9, %v727_v4  ;;  %v1180_v8 = vpop.f32.mrb[41].mxu1 }
 0x14b   : > { %787 = vst.msk [vmem:[%s1635_s10 + $0xa0] sm:$0xff] %vm766_vm2, %v583_v5  ;;  %816 = vst.msk [vmem:[%s1635_s10 + $0x188] sm:$0xff] %vm766_vm2, %v728_v7 }
 0x14c   : > { %v587_v1 = vpop.f32.mrb[42].mxu0  ;;  %v732_v10 = vpop.f32.mrb[42].mxu1 }
 0x14d   : > { %v588_v11 = vadd.f32 %v1630_v9, %v587_v1  ;;  %v1096_v12 = vpop.f32.mrb[43].mxu0  ;;  %v733_v13 = vadd.f32 %v1630_v9, %v732_v10  ;;  %v1183_v14 = vpop.f32.mrb[43].mxu1 }
 0x14f   : > { %788 = vst.msk [vmem:[%s1635_s10 + $0xa8] sm:$0xff] %vm766_vm2, %v588_v11  ;;  %817 = vst.msk [vmem:[%s1635_s10 + $0x190] sm:$0xff] %vm766_vm2, %v733_v13 }
 0x150   : > { %v592_v15 = vpop.f32.mrb[44].mxu0  ;;  %v737_v16 = vpop.f32.mrb[44].mxu1 }
 0x151   : > { %v593_v17 = vadd.f32 %v1630_v9, %v592_v15  ;;  %v1099_v18 = vpop.f32.mrb[45].mxu0  ;;  %v738_v19 = vadd.f32 %v1630_v9, %v737_v16  ;;  %v1186_v20 = vpop.f32.mrb[45].mxu1 }
 0x153   : > { %789 = vst.msk [vmem:[%s1635_s10 + $0xb0] sm:$0xff] %vm766_vm2, %v593_v17  ;;  %818 = vst.msk [vmem:[%s1635_s10 + $0x198] sm:$0xff] %vm766_vm2, %v738_v19 }
 0x154   : > { %v597_v21 = vpop.f32.mrb[46].mxu0  ;;  %v742_v22 = vpop.f32.mrb[46].mxu1 }
 0x155   : > { %v598_v23 = vadd.f32 %v1630_v9, %v597_v21  ;;  %v1102_v24 = vpop.f32.mrb[47].mxu0  ;;  %v743_v25 = vadd.f32 %v1630_v9, %v742_v22  ;;  %v1189_v26 = vpop.f32.mrb[47].mxu1 }
 0x157   : > { %790 = vst.msk [vmem:[%s1635_s10 + $0xb8] sm:$0xff] %vm766_vm2, %v598_v23  ;;  %819 = vst.msk [vmem:[%s1635_s10 + $0x1a0] sm:$0xff] %vm766_vm2, %v743_v25 }
 0x158   : > { %v602_v27 = vpop.f32.mrb[48].mxu0  ;;  %v747_v28 = vpop.f32.mrb[48].mxu1 }
 0x159   : > { %v603_v29 = vadd.f32 %v1630_v9, %v602_v27  ;;  %v1105_v30 = vpop.f32.mrb[49].mxu0  ;;  %v748_v31 = vadd.f32 %v1630_v9, %v747_v28  ;;  %v1192_v32 = vpop.f32.mrb[49].mxu1 }
 0x15b   : > { %791 = vst.msk [vmem:[%s1635_s10 + $0xc0] sm:$0xff] %vm766_vm2, %v603_v29  ;;  %820 = vst.msk [vmem:[%s1635_s10 + $0x1a8] sm:$0xff] %vm766_vm2, %v748_v31 }
 0x15c   : > { %v607_v33 = vpop.f32.mrb[50].mxu0  ;;  %v752_v34 = vpop.f32.mrb[50].mxu1 }
 0x15d   : > { %v608_v35 = vadd.f32 %v1630_v9, %v607_v33  ;;  %v1108_v36 = vpop.f32.mrb[51].mxu0  ;;  %v753_v37 = vadd.f32 %v1630_v9, %v752_v34  ;;  %v1195_v38 = vpop.f32.mrb[51].mxu1 }
 0x15f   : > { %792 = vst.msk [vmem:[%s1635_s10 + $0xc8] sm:$0xff] %vm766_vm2, %v608_v35  ;;  %821 = vst.msk [vmem:[%s1635_s10 + $0x1b0] sm:$0xff] %vm766_vm2, %v753_v37 }
 0x160   : > { %v612_v39 = vpop.f32.mrb[52].mxu0  ;;  %v757_v40 = vpop.f32.mrb[52].mxu1 }
 0x161   : > { %v613_v41 = vadd.f32 %v1630_v9, %v612_v39  ;;  %v1111_v42 = vpop.f32.mrb[53].mxu0  ;;  %v758_v43 = vadd.f32 %v1630_v9, %v757_v40  ;;  %v1198_v44 = vpop.f32.mrb[53].mxu1 }
 0x163   : > { %793 = vst.msk [vmem:[%s1635_s10 + $0xd0] sm:$0xff] %vm766_vm2, %v613_v41  ;;  %822 = vst.msk [vmem:[%s1635_s10 + $0x1b8] sm:$0xff] %vm766_vm2, %v758_v43 }
 0x164   : > { %v617_v45 = vpop.f32.mrb[54].mxu0  ;;  %v762_v46 = vpop.f32.mrb[54].mxu1 }
 0x165   : > { %v618_v47 = vadd.f32 %v1630_v9, %v617_v45  ;;  %v1114_v48 = vpop.f32.mrb[55].mxu0  ;;  %v763_v49 = vadd.f32 %v1630_v9, %v762_v46  ;;  %v1201_v50 = vpop.f32.mrb[55].mxu1 }
 0x167   : > { %794 = vst.msk [vmem:[%s1635_s10 + $0xd8] sm:$0xff] %vm766_vm2, %v618_v47 }
 0x168   : > { %824 = vst.msk [vmem:[%s1635_s10 + $0x1c0] sm:$0x3] %vm823_vm3, %v763_v49  ;;  %v622_v51 = vpop.f32.mrb[56].mxu0 }
 0x169   : > { %v623_v52 = vadd.f32 %v1630_v9, %v622_v51  ;;  %v1117_v53 = vpop.f32.mrb[57].mxu0 }
 0x16b   : > { %795 = vst.msk [vmem:[%s1635_s10 + $0xe0] sm:$0xff] %vm766_vm2, %v623_v52 }
 0x16c PF: > { %s13_s12 = sadd.s32 1, %s1243_s12  }
 0x16d   : > { %p10_p4 = scmp.ge.s32.totalorder %s13_s12, 6  }
 0x16f   :  { %12 = sbr.rel (!%p10_p4) target bundleno = 1 (0x1), region = 62 }

// kernel: model_forward.7
= control target key start
LH: loop header
LB: loop body
LE: loop exit
PB: predicated region body
PF: predicated region fallthrough
CT: control target
= control target key end

     0   :  { %s3385_s12 = smov 0   ;;  %s5021_s0 = inlined_call_operand.vmem [shape: f32[1800,128], index: 0, kind: input, shape index: {}]   ;;  %s5022_s1 = inlined_call_operand.vmem [shape: f32[16,128,128], index: 1, kind: input, shape index: {}]   ;;  %s5023_s2 = inlined_call_operand.vmem [shape: f32[1,128], index: 2, kind: input, shape index: {}]   ;;  %s5024_s3 = inlined_call_operand.vmem [shape: f32[16,1800,128], index: 3, kind: output, shape index: {}]  }
   0x1 LB: > { %s2339_s13 = sadd.s32 4294967295, %s3360_s12   ;;  %p2343_p0 = scmp.ge.s32.totalorder %s3360_s12, 1  ;;  %s3360_s12 = sphi %s3385_s12, %s13_s12  }
   0x2   : > { %p137_p1 = scmp.lt.s32.totalorder %s3360_s12, 17 }
   0x4   : > { %p138_p2 = pnand %p2343_p0, %p137_p1 }
   0x5   : > { %p161_p3 = scmp.lt.s32.totalorder (!%p138_p2), %s2339_s13, 15  ;;  %v3362_v0 = vmov (!%p138_p2), 0.0|0.0   ;;  %vm3363_vm0 = vmmov (!%p138_p2), 0   ;;  %v3364_v1 = vmov (!%p138_p2), 0.0   ;;  %v171_v26 = vld [vmem:[%s5021_s0] sm:$0xff] (!%p138_p2)  ;;  %v284_v27 = vld [vmem:[%s5021_s0 + $0x388] sm:$0xff] (!%p138_p2) }
   0x6   : > { %141 = sbr.rel (%p138_p2) target bundleno = 717 (0x2cd), region = 32  ;;  %3299 = vmatprep.subr.bf16.mxu0 (!%p138_p2), %v3362_v0  ;;  %3323 = vmatprep.subr.bf16.mxu1 (!%p138_p2), %v3362_v0  ;;  %v172_v28 = vld [vmem:[%s5021_s0 + $0x8] sm:$0xff] (!%p138_p2)  ;;  %v285_v29 = vld [vmem:[%s5021_s0 + $0x390] sm:$0xff] (!%p138_p2)  ;;  %v286_v31 = vld [vmem:[%s5021_s0 + $0x398] sm:$0xff] (!%p138_p2) }
   0x7   : > { %2624 = vmatprep.mubr.msk.f32.mxu0 (!%p138_p2), %vm3363_vm0, %v3364_v1  ;;  %2963 = vmatprep.mubr.msk.f32.mxu1 (!%p138_p2), %vm3363_vm0, %v3364_v1  ;;  %v173_v30 = vld [vmem:[%s5021_s0 + $0x10] sm:$0xff] (!%p138_p2)  ;;  %v174_v32 = vld [vmem:[%s5021_s0 + $0x18] sm:$0xff] (!%p138_p2)  ;;  %v287_v33 = vld [vmem:[%s5021_s0 + $0x3a0] sm:$0xff] (!%p138_p2) }
   0x8   : > { %v175_v34 = vld [vmem:[%s5021_s0 + $0x20] sm:$0xff] (!%p138_p2)  ;;  %v288_v35 = vld [vmem:[%s5021_s0 + $0x3a8] sm:$0xff] (!%p138_p2)  ;;  %v289_v37 = vld [vmem:[%s5021_s0 + $0x3b0] sm:$0xff] (!%p138_p2) }
   0x9   : > { %v176_v36 = vld [vmem:[%s5021_s0 + $0x28] sm:$0xff] (!%p138_p2)  ;;  %v177_v38 = vld [vmem:[%s5021_s0 + $0x30] sm:$0xff] (!%p138_p2)  ;;  %v290_v39 = vld [vmem:[%s5021_s0 + $0x3b8] sm:$0xff] (!%p138_p2) }
   0xa   : > { %v178_v40 = vld [vmem:[%s5021_s0 + $0x38] sm:$0xff] (!%p138_p2)  ;;  %v291_v41 = vld [vmem:[%s5021_s0 + $0x3c0] sm:$0xff] (!%p138_p2)  ;;  %v292_v43 = vld [vmem:[%s5021_s0 + $0x3c8] sm:$0xff] (!%p138_p2) }
   0xb   : > { %v179_v42 = vld [vmem:[%s5021_s0 + $0x40] sm:$0xff] (!%p138_p2)  ;;  %v180_v44 = vld [vmem:[%s5021_s0 + $0x48] sm:$0xff] (!%p138_p2)  ;;  %v293_v45 = vld [vmem:[%s5021_s0 + $0x3d0] sm:$0xff] (!%p138_p2) }
   0xc   : > { %v181_v46 = vld [vmem:[%s5021_s0 + $0x50] sm:$0xff] (!%p138_p2)  ;;  %v294_v47 = vld [vmem:[%s5021_s0 + $0x3d8] sm:$0xff] (!%p138_p2)  ;;  %v295_v49 = vld [vmem:[%s5021_s0 + $0x3e0] sm:$0xff] (!%p138_p2) }
   0xd   : > { %s5026_s13 = smov (!%p161_p3, %s2339_s13), 15  ;;  %v182_v48 = vld [vmem:[%s5021_s0 + $0x58] sm:$0xff]  ;;  %v183_v50 = vld [vmem:[%s5021_s0 + $0x60] sm:$0xff]  ;;  %v296_v51 = vld [vmem:[%s5021_s0 + $0x3e8] sm:$0xff] }
   0xe   : > { %s2350_s14 = sshll.u32 %s5026_s13, 7  ;;  %v184_v52 = vld [vmem:[%s5021_s0 + $0x68] sm:$0xff]  ;;  %v297_v53 = vld [vmem:[%s5021_s0 + $0x3f0] sm:$0xff]  ;;  %v298_v55 = vld [vmem:[%s5021_s0 + $0x3f8] sm:$0xff]  ;;  %s3339_s9 = smul.u32 1800, %s5026_s13 }
   0xf   : > { %s3403_s17 = scalar_lea.vmem %s5022_s1, %s2350_s14  ;;  %v185_v54 = vld [vmem:[%s5021_s0 + $0x70] sm:$0xff]  ;;  %v186_v56 = vld [vmem:[%s5021_s0 + $0x78] sm:$0xff]  ;;  %v299_v57 = vld [vmem:[%s5021_s0 + $0x400] sm:$0xff] }
  0x10   : > { %v396_v2 = vld [vmem:[%s3403_s17] sm:$0xff]  ;;  %v397_v3 = vld [vmem:[%s3403_s17 + $0x8] sm:$0xff]  ;;  %v398_v4 = vld [vmem:[%s3403_s17 + $0x10] sm:$0xff] }
  0x11   : > { %v3300_v5 = vpack.c.bf16 %v397_v3, %v396_v2  ;;  %v399_v6 = vld [vmem:[%s3403_s17 + $0x18] sm:$0xff]  ;;  %v400_v8 = vld [vmem:[%s3403_s17 + $0x20] sm:$0xff]  ;;  %v401_v9 = vld [vmem:[%s3403_s17 + $0x28] sm:$0xff] }
  0x12   : > { %v3303_v7 = vpack.c.bf16 %v399_v6, %v398_v4  ;;  %v3306_v10 = vpack.c.bf16 %v401_v9, %v400_v8  ;;  %v402_v11 = vld [vmem:[%s3403_s17 + $0x30] sm:$0xff]  ;;  %v403_v12 = vld [vmem:[%s3403_s17 + $0x38] sm:$0xff]  ;;  %v404_v14 = vld [vmem:[%s3403_s17 + $0x40] sm:$0xff] }
  0x13   : > { %3301 = vmatpush3.bf16.msra.mxu0 %v3300_v5  ;;  %3331 = vmatpush3.bf16.msra.mxu1 %v3300_v5  ;;  %v3309_v13 = vpack.c.bf16 %v403_v12, %v402_v11  ;;  %v405_v15 = vld [vmem:[%s3403_s17 + $0x48] sm:$0xff]  ;;  %v406_v17 = vld [vmem:[%s3403_s17 + $0x50] sm:$0xff]  ;;  %v407_v18 = vld [vmem:[%s3403_s17 + $0x58] sm:$0xff] }
  0x14   : > { %3302 = vmatprep.subr.bf16.mxu0 %v3362_v0  ;;  %3324 = vmatprep.subr.bf16.mxu1 %v3362_v0  ;;  %v3312_v16 = vpack.c.bf16 %v405_v15, %v404_v14  ;;  %v3315_v19 = vpack.c.bf16 %v407_v18, %v406_v17  ;;  %v408_v20 = vld [vmem:[%s3403_s17 + $0x60] sm:$0xff]  ;;  %v409_v21 = vld [vmem:[%s3403_s17 + $0x68] sm:$0xff]  ;;  %v410_v23 = vld [vmem:[%s3403_s17 + $0x70] sm:$0xff] }
  0x15   : > { %v3318_v22 = vpack.c.bf16 %v409_v21, %v408_v20  ;;  %v411_v24 = vld [vmem:[%s3403_s17 + $0x78] sm:$0xff]  ;;  %v187_v58 = vld [vmem:[%s5021_s0 + $0x80] sm:$0xff]  ;;  %v300_v59 = vld [vmem:[%s5021_s0 + $0x408] sm:$0xff]  ;;  %s3978_s17 = scalar_lea.vmem %s5024_s3, %s3339_s9 }
  0x16   : > { %v3321_v25 = vpack.c.bf16 %v411_v24, %v410_v23  ;;  %v188_v60 = vld [vmem:[%s5021_s0 + $0x88] sm:$0xff]  ;;  %v301_v61 = vld [vmem:[%s5021_s0 + $0x410] sm:$0xff]  ;;  %v302_v63 = vld [vmem:[%s5021_s0 + $0x418] sm:$0xff] }
  0x17   : > { %3304 = vmatpush3.bf16.msra.mxu0 %v3303_v7  ;;  %3332 = vmatpush3.bf16.msra.mxu1 %v3303_v7  ;;  %v189_v62 = vld [vmem:[%s5021_s0 + $0x90] sm:$0xff]  ;;  %v303_v2 = vld [vmem:[%s5021_s0 + $0x420] sm:$0xff]  ;;  %v304_v4 = vld [vmem:[%s5021_s0 + $0x428] sm:$0xff] }
  0x18   : > { %3305 = vmatprep.subr.bf16.mxu0 %v3362_v0  ;;  %3325 = vmatprep.subr.bf16.mxu1 %v3362_v0  ;;  %v191_v3 = vld [vmem:[%s5021_s0 + $0xa0] sm:$0xff]  ;;  %v192_v5 = vld [vmem:[%s5021_s0 + $0xa8] sm:$0xff]  ;;  %v305_v6 = vld [vmem:[%s5021_s0 + $0x430] sm:$0xff] }
  0x19   : > { %v193_v7 = vld [vmem:[%s5021_s0 + $0xb0] sm:$0xff]  ;;  %v306_v8 = vld [vmem:[%s5021_s0 + $0x438] sm:$0xff]  ;;  %v195_v11 = vld [vmem:[%s5021_s0 + $0xc0] sm:$0xff] }
  0x1a   : > { %v194_v9 = vld [vmem:[%s5021_s0 + $0xb8] sm:$0xff]  ;;  %v308_v12 = vld [vmem:[%s5021_s0 + $0x448] sm:$0xff]  ;;  %v309_v14 = vld [vmem:[%s5021_s0 + $0x450] sm:$0xff] }
  0x1b   : > { %3307 = vmatpush3.bf16.msra.mxu0 %v3306_v10  ;;  %3333 = vmatpush3.bf16.msra.mxu1 %v3306_v10  ;;  %v307_v10 = vld [vmem:[%s5021_s0 + $0x440] sm:$0xff]  ;;  %v197_v15 = vld [vmem:[%s5021_s0 + $0xd0] sm:$0xff]  ;;  %v198_v17 = vld [vmem:[%s5021_s0 + $0xd8] sm:$0xff] }
  0x1c   : > { %3308 = vmatprep.subr.bf16.mxu0 %v3362_v0  ;;  %3326 = vmatprep.subr.bf16.mxu1 %v3362_v0  ;;  %v311_v18 = vld [vmem:[%s5021_s0 + $0x460] sm:$0xff]  ;;  %v312_v20 = vld [vmem:[%s5021_s0 + $0x468] sm:$0xff]  ;;  %v201_v23 = vld [vmem:[%s5021_s0 + $0xf0] sm:$0xff] }
  0x1d   : > { %v200_v21 = vld [vmem:[%s5021_s0 + $0xe8] sm:$0xff]  ;;  %v314_v24 = vld [vmem:[%s5021_s0 + $0x478] sm:$0xff] }
  0x1f   : > { %3310 = vmatpush3.bf16.msra.mxu0 %v3309_v13  ;;  %3334 = vmatpush3.bf16.msra.mxu1 %v3309_v13  ;;  %v196_v13 = vld [vmem:[%s5021_s0 + $0xc8] sm:$0xff] }
  0x20   : > { %3311 = vmatprep.subr.bf16.mxu0 %v3362_v0  ;;  %3327 = vmatprep.subr.bf16.mxu1 %v3362_v0 }
  0x23   : > { %3313 = vmatpush3.bf16.msra.mxu0 %v3312_v16  ;;  %3335 = vmatpush3.bf16.msra.mxu1 %v3312_v16  ;;  %v310_v16 = vld [vmem:[%s5021_s0 + $0x458] sm:$0xff] }
  0x24   : > { %3314 = vmatprep.subr.bf16.mxu0 %v3362_v0  ;;  %3328 = vmatprep.subr.bf16.mxu1 %v3362_v0 }
  0x27   : > { %3316 = vmatpush3.bf16.msra.mxu0 %v3315_v19  ;;  %3336 = vmatpush3.bf16.msra.mxu1 %v3315_v19  ;;  %v199_v19 = vld [vmem:[%s5021_s0 + $0xe0] sm:$0xff] }
  0x28   : > { %3317 = vmatprep.subr.bf16.mxu0 %v3362_v0  ;;  %3329 = vmatprep.subr.bf16.mxu1 %v3362_v0 }
  0x2b   : > { %3319 = vmatpush3.bf16.msra.mxu0 %v3318_v22  ;;  %3337 = vmatpush3.bf16.msra.mxu1 %v3318_v22  ;;  %v313_v22 = vld [vmem:[%s5021_s0 + $0x470] sm:$0xff] }
  0x2c   : > { %3320 = vmatprep.subr.bf16.mxu0 %v3362_v0  ;;  %3330 = vmatprep.subr.bf16.mxu1 %v3362_v0  ;;  %v190_v0 = vld [vmem:[%s5021_s0 + $0x98] sm:$0xff] }
  0x2f   : > { %3322 = vmatpush3.bf16.msra.mxu0 %v3321_v25  ;;  %3338 = vmatpush3.bf16.msra.mxu1 %v3321_v25  ;;  %v202_v25 = vld [vmem:[%s5021_s0 + $0xf8] sm:$0xff] }
  0x32   : > { %2625 = vmatmul.mubr.f32.vlgmr.msra.gmra.mrb[0].mxu0 %v171_v26  ;;  %2964 = vmatmul.mubr.f32.vlgmr.msra.gmra.mrb[0].mxu1 %v284_v27  ;;  %v315_v26 = vld [vmem:[%s5021_s0 + $0x480] sm:$0xff] }
  0x33   : > { %2627 = vmatprep.mubr.msk.f32.mxu0 %vm3363_vm0, %v3364_v1  ;;  %2966 = vmatprep.mubr.msk.f32.mxu1 %vm3363_vm0, %v3364_v1  ;;  %v203_v27 = vld [vmem:[%s5021_s0 + $0x100] sm:$0xff] }
  0x36   : > { %2628 = vmatmul.mubr.f32.gmra.mrb[2].mxu0 %v172_v28  ;;  %2967 = vmatmul.mubr.f32.gmra.mrb[2].mxu1 %v285_v29  ;;  %v316_v28 = vld [vmem:[%s5021_s0 + $0x488] sm:$0xff] }
  0x37   : > { %2630 = vmatprep.mubr.msk.f32.mxu0 %vm3363_vm0, %v3364_v1  ;;  %2969 = vmatprep.mubr.msk.f32.mxu1 %vm3363_vm0, %v3364_v1  ;;  %v204_v29 = vld [vmem:[%s5021_s0 + $0x108] sm:$0xff] }
  0x3a   : > { %2631 = vmatmul.mubr.f32.gmra.mrb[4].mxu0 %v173_v30  ;;  %2970 = vmatmul.mubr.f32.gmra.mrb[4].mxu1 %v286_v31  ;;  %v317_v30 = vld [vmem:[%s5021_s0 + $0x490] sm:$0xff] }
  0x3b   : > { %2633 = vmatprep.mubr.msk.f32.mxu0 %vm3363_vm0, %v3364_v1  ;;  %2972 = vmatprep.mubr.msk.f32.mxu1 %vm3363_vm0, %v3364_v1  ;;  %v205_v31 = vld [vmem:[%s5021_s0 + $0x110] sm:$0xff] }
  0x3e   : > { %2634 = vmatmul.mubr.f32.gmra.mrb[6].mxu0 %v174_v32  ;;  %2973 = vmatmul.mubr.f32.gmra.mrb[6].mxu1 %v287_v33  ;;  %v318_v32 = vld [vmem:[%s5021_s0 + $0x498] sm:$0xff] }
  0x3f   : > { %2636 = vmatprep.mubr.msk.f32.mxu0 %vm3363_vm0, %v3364_v1  ;;  %2975 = vmatprep.mubr.msk.f32.mxu1 %vm3363_vm0, %v3364_v1  ;;  %v206_v33 = vld [vmem:[%s5021_s0 + $0x118] sm:$0xff] }
  0x42   : > { %2637 = vmatmul.mubr.f32.gmra.mrb[8].mxu0 %v175_v34  ;;  %2976 = vmatmul.mubr.f32.gmra.mrb[8].mxu1 %v288_v35  ;;  %v319_v34 = vld [vmem:[%s5021_s0 + $0x4a0] sm:$0xff] }
  0x43   : > { %2639 = vmatprep.mubr.msk.f32.mxu0 %vm3363_vm0, %v3364_v1  ;;  %2978 = vmatprep.mubr.msk.f32.mxu1 %vm3363_vm0, %v3364_v1  ;;  %v207_v35 = vld [vmem:[%s5021_s0 + $0x120] sm:$0xff] }
  0x46   : > { %2640 = vmatmul.mubr.f32.gmra.mrb[10].mxu0 %v176_v36  ;;  %2979 = vmatmul.mubr.f32.gmra.mrb[10].mxu1 %v289_v37  ;;  %v320_v36 = vld [vmem:[%s5021_s0 + $0x4a8] sm:$0xff] }
  0x47   : > { %2642 = vmatprep.mubr.msk.f32.mxu0 %vm3363_vm0, %v3364_v1  ;;  %2981 = vmatprep.mubr.msk.f32.mxu1 %vm3363_vm0, %v3364_v1  ;;  %v208_v37 = vld [vmem:[%s5021_s0 + $0x128] sm:$0xff] }
  0x4a   : > { %2643 = vmatmul.mubr.f32.gmra.mrb[12].mxu0 %v177_v38  ;;  %2982 = vmatmul.mubr.f32.gmra.mrb[12].mxu1 %v290_v39  ;;  %v321_v38 = vld [vmem:[%s5021_s0 + $0x4b0] sm:$0xff] }
  0x4b   : > { %2645 = vmatprep.mubr.msk.f32.mxu0 %vm3363_vm0, %v3364_v1  ;;  %2984 = vmatprep.mubr.msk.f32.mxu1 %vm3363_vm0, %v3364_v1  ;;  %v209_v39 = vld [vmem:[%s5021_s0 + $0x130] sm:$0xff] }
  0x4e   : > { %2646 = vmatmul.mubr.f32.gmra.mrb[14].mxu0 %v178_v40  ;;  %2985 = vmatmul.mubr.f32.gmra.mrb[14].mxu1 %v291_v41  ;;  %v322_v40 = vld [vmem:[%s5021_s0 + $0x4b8] sm:$0xff] }
  0x4f   : > { %2648 = vmatprep.mubr.msk.f32.mxu0 %vm3363_vm0, %v3364_v1  ;;  %2987 = vmatprep.mubr.msk.f32.mxu1 %vm3363_vm0, %v3364_v1  ;;  %v210_v41 = vld [vmem:[%s5021_s0 + $0x138] sm:$0xff] }
  0x52   : > { %2649 = vmatmul.mubr.f32.gmra.mrb[16].mxu0 %v179_v42  ;;  %2988 = vmatmul.mubr.f32.gmra.mrb[16].mxu1 %v292_v43  ;;  %v323_v42 = vld [vmem:[%s5021_s0 + $0x4c0] sm:$0xff] }
  0x53   : > { %2651 = vmatprep.mubr.msk.f32.mxu0 %vm3363_vm0, %v3364_v1  ;;  %2990 = vmatprep.mubr.msk.f32.mxu1 %vm3363_vm0, %v3364_v1  ;;  %v211_v43 = vld [vmem:[%s5021_s0 + $0x140] sm:$0xff] }
  0x56   : > { %2652 = vmatmul.mubr.f32.gmra.mrb[18].mxu0 %v180_v44  ;;  %2991 = vmatmul.mubr.f32.gmra.mrb[18].mxu1 %v293_v45  ;;  %v324_v44 = vld [vmem:[%s5021_s0 + $0x4c8] sm:$0xff] }
  0x57   : > { %2654 = vmatprep.mubr.msk.f32.mxu0 %vm3363_vm0, %v3364_v1  ;;  %2993 = vmatprep.mubr.msk.f32.mxu1 %vm3363_vm0, %v3364_v1  ;;  %v212_v45 = vld [vmem:[%s5021_s0 + $0x148] sm:$0xff] }
  0x5a   : > { %2655 = vmatmul.mubr.f32.gmra.mrb[20].mxu0 %v181_v46  ;;  %2994 = vmatmul.mubr.f32.gmra.mrb[20].mxu1 %v294_v47  ;;  %v325_v46 = vld [vmem:[%s5021_s0 + $0x4d0] sm:$0xff] }
  0x5b   : > { %2657 = vmatprep.mubr.msk.f32.mxu0 %vm3363_vm0, %v3364_v1  ;;  %2996 = vmatprep.mubr.msk.f32.mxu1 %vm3363_vm0, %v3364_v1  ;;  %v213_v47 = vld [vmem:[%s5021_s0 + $0x150] sm:$0xff] }
  0x5e   : > { %2658 = vmatmul.mubr.f32.gmra.mrb[22].mxu0 %v182_v48  ;;  %2997 = vmatmul.mubr.f32.gmra.mrb[22].mxu1 %v295_v49  ;;  %v326_v48 = vld [vmem:[%s5021_s0 + $0x4d8] sm:$0xff] }
  0x5f   : > { %2660 = vmatprep.mubr.msk.f32.mxu0 %vm3363_vm0, %v3364_v1  ;;  %2999 = vmatprep.mubr.msk.f32.mxu1 %vm3363_vm0, %v3364_v1  ;;  %v214_v49 = vld [vmem:[%s5021_s0 + $0x158] sm:$0xff] }
  0x62   : > { %2661 = vmatmul.mubr.f32.gmra.mrb[24].mxu0 %v183_v50  ;;  %3000 = vmatmul.mubr.f32.gmra.mrb[24].mxu1 %v296_v51  ;;  %v327_v50 = vld [vmem:[%s5021_s0 + $0x4e0] sm:$0xff] }
  0x63   : > { %2663 = vmatprep.mubr.msk.f32.mxu0 %vm3363_vm0, %v3364_v1  ;;  %3002 = vmatprep.mubr.msk.f32.mxu1 %vm3363_vm0, %v3364_v1  ;;  %v215_v51 = vld [vmem:[%s5021_s0 + $0x160] sm:$0xff] }
  0x66   : > { %2664 = vmatmul.mubr.f32.gmra.mrb[26].mxu0 %v184_v52  ;;  %3003 = vmatmul.mubr.f32.gmra.mrb[26].mxu1 %v297_v53  ;;  %v328_v52 = vld [vmem:[%s5021_s0 + $0x4e8] sm:$0xff] }
  0x67   : > { %2666 = vmatprep.mubr.msk.f32.mxu0 %vm3363_vm0, %v3364_v1  ;;  %3005 = vmatprep.mubr.msk.f32.mxu1 %vm3363_vm0, %v3364_v1  ;;  %v216_v53 = vld [vmem:[%s5021_s0 + $0x168] sm:$0xff] }
  0x6a   : > { %2667 = vmatmul.mubr.f32.gmra.mrb[28].mxu0 %v185_v54  ;;  %3006 = vmatmul.mubr.f32.gmra.mrb[28].mxu1 %v298_v55  ;;  %v329_v54 = vld [vmem:[%s5021_s0 + $0x4f0] sm:$0xff] }
  0x6b   : > { %2669 = vmatprep.mubr.msk.f32.mxu0 %vm3363_vm0, %v3364_v1  ;;  %3008 = vmatprep.mubr.msk.f32.mxu1 %vm3363_vm0, %v3364_v1  ;;  %v217_v55 = vld [vmem:[%s5021_s0 + $0x170] sm:$0xff] }
  0x6e   : > { %2670 = vmatmul.mubr.f32.gmra.mrb[30].mxu0 %v186_v56  ;;  %3009 = vmatmul.mubr.f32.gmra.mrb[30].mxu1 %v299_v57  ;;  %v330_v56 = vld [vmem:[%s5021_s0 + $0x4f8] sm:$0xff] }
  0x6f   : > { %2672 = vmatprep.mubr.msk.f32.mxu0 %vm3363_vm0, %v3364_v1  ;;  %3011 = vmatprep.mubr.msk.f32.mxu1 %vm3363_vm0, %v3364_v1  ;;  %v218_v57 = vld [vmem:[%s5021_s0 + $0x178] sm:$0xff] }
  0x72   : > { %2673 = vmatmul.mubr.f32.gmra.mrb[32].mxu0 %v187_v58  ;;  %3012 = vmatmul.mubr.f32.gmra.mrb[32].mxu1 %v300_v59  ;;  %v331_v58 = vld [vmem:[%s5021_s0 + $0x500] sm:$0xff] }
  0x73   : > { %2675 = vmatprep.mubr.msk.f32.mxu0 %vm3363_vm0, %v3364_v1  ;;  %3014 = vmatprep.mubr.msk.f32.mxu1 %vm3363_vm0, %v3364_v1  ;;  %v219_v59 = vld [vmem:[%s5021_s0 + $0x180] sm:$0xff] }
  0x76   : > { %2676 = vmatmul.mubr.f32.gmra.mrb[34].mxu0 %v188_v60  ;;  %3015 = vmatmul.mubr.f32.gmra.mrb[34].mxu1 %v301_v61  ;;  %v332_v60 = vld [vmem:[%s5021_s0 + $0x508] sm:$0xff] }
  0x77   : > { %2678 = vmatprep.mubr.msk.f32.mxu0 %vm3363_vm0, %v3364_v1  ;;  %3017 = vmatprep.mubr.msk.f32.mxu1 %vm3363_vm0, %v3364_v1  ;;  %v220_v61 = vld [vmem:[%s5021_s0 + $0x188] sm:$0xff] }
  0x7a   : > { %2679 = vmatmul.mubr.f32.gmra.mrb[36].mxu0 %v189_v62  ;;  %3018 = vmatmul.mubr.f32.gmra.mrb[36].mxu1 %v302_v63  ;;  %v333_v62 = vld [vmem:[%s5021_s0 + $0x510] sm:$0xff] }
  0x7b   : > { %2681 = vmatprep.mubr.msk.f32.mxu0 %vm3363_vm0, %v3364_v1  ;;  %3020 = vmatprep.mubr.msk.f32.mxu1 %vm3363_vm0, %v3364_v1  ;;  %v221_v63 = vld [vmem:[%s5021_s0 + $0x190] sm:$0xff] }
  0x7e   : > { %2682 = vmatmul.mubr.f32.gmra.mrb[38].mxu0 %v190_v0  ;;  %3021 = vmatmul.mubr.f32.gmra.mrb[38].mxu1 %v303_v2  ;;  %v334_v0 = vld [vmem:[%s5021_s0 + $0x518] sm:$0xff] }
  0x7f   : > { %2684 = vmatprep.mubr.msk.f32.mxu0 %vm3363_vm0, %v3364_v1  ;;  %3023 = vmatprep.mubr.msk.f32.mxu1 %vm3363_vm0, %v3364_v1  ;;  %v222_v2 = vld [vmem:[%s5021_s0 + $0x198] sm:$0xff] }
  0x82   : > { %2685 = vmatmul.mubr.f32.gmra.mrb[40].mxu0 %v191_v3  ;;  %3024 = vmatmul.mubr.f32.gmra.mrb[40].mxu1 %v304_v4  ;;  %v335_v3 = vld [vmem:[%s5021_s0 + $0x520] sm:$0xff] }
  0x83   : > { %2687 = vmatprep.mubr.msk.f32.mxu0 %vm3363_vm0, %v3364_v1  ;;  %3026 = vmatprep.mubr.msk.f32.mxu1 %vm3363_vm0, %v3364_v1  ;;  %v223_v4 = vld [vmem:[%s5021_s0 + $0x1a0] sm:$0xff] }
  0x86   : > { %2688 = vmatmul.mubr.f32.gmra.mrb[42].mxu0 %v192_v5  ;;  %3027 = vmatmul.mubr.f32.gmra.mrb[42].mxu1 %v305_v6  ;;  %v336_v5 = vld [vmem:[%s5021_s0 + $0x528] sm:$0xff]  ;;  %v3950_v6 = vld [vmem:[%s5023_s2] ss:$0 sm:$0xff] }
  0x87   : > { %2690 = vmatprep.mubr.msk.f32.mxu0 %vm3363_vm0, %v3364_v1  ;;  %3029 = vmatprep.mubr.msk.f32.mxu1 %vm3363_vm0, %v3364_v1 }
  0x8a   : > { %2691 = vmatmul.mubr.f32.gmra.mrb[44].mxu0 %v193_v7  ;;  %3030 = vmatmul.mubr.f32.gmra.mrb[44].mxu1 %v306_v8  ;;  %v224_v7 = vld [vmem:[%s5021_s0 + $0x1a8] sm:$0xff]  ;;  %v337_v8 = vld [vmem:[%s5021_s0 + $0x530] sm:$0xff] }
  0x8b   : > { %2693 = vmatprep.mubr.msk.f32.mxu0 %vm3363_vm0, %v3364_v1  ;;  %3032 = vmatprep.mubr.msk.f32.mxu1 %vm3363_vm0, %v3364_v1 }
  0x8e   : > { %2694 = vmatmul.mubr.f32.gmra.mrb[46].mxu0 %v194_v9  ;;  %3033 = vmatmul.mubr.f32.gmra.mrb[46].mxu1 %v307_v10 }
  0x8f   : > { %2696 = vmatprep.mubr.msk.f32.mxu0 %vm3363_vm0, %v3364_v1  ;;  %3035 = vmatprep.mubr.msk.f32.mxu1 %vm3363_vm0, %v3364_v1 }
  0x92   : > { %2697 = vmatmul.mubr.f32.gmra.mrb[48].mxu0 %v195_v11  ;;  %3036 = vmatmul.mubr.f32.gmra.mrb[48].mxu1 %v308_v12 }
  0x93   : > { %2699 = vmatprep.mubr.msk.f32.mxu0 %vm3363_vm0, %v3364_v1  ;;  %3038 = vmatprep.mubr.msk.f32.mxu1 %vm3363_vm0, %v3364_v1 }
  0x96   : > { %2700 = vmatmul.mubr.f32.gmra.mrb[50].mxu0 %v196_v13  ;;  %3039 = vmatmul.mubr.f32.gmra.mrb[50].mxu1 %v309_v14 }
  0x97   : > { %2702 = vmatprep.mubr.msk.f32.mxu0 %vm3363_vm0, %v3364_v1  ;;  %3041 = vmatprep.mubr.msk.f32.mxu1 %vm3363_vm0, %v3364_v1 }
  0x9a   : > { %2703 = vmatmul.mubr.f32.gmra.mrb[52].mxu0 %v197_v15  ;;  %3042 = vmatmul.mubr.f32.gmra.mrb[52].mxu1 %v310_v16  ;;  %v225_v15 = vld [vmem:[%s5021_s0 + $0x1b0] sm:$0xff]  ;;  %v338_v16 = vld [vmem:[%s5021_s0 + $0x538] sm:$0xff] }
  0x9b   : > { %2705 = vmatprep.mubr.msk.f32.mxu0 %vm3363_vm0, %v3364_v1  ;;  %3044 = vmatprep.mubr.msk.f32.mxu1 %vm3363_vm0, %v3364_v1 }
  0x9e   : > { %2706 = vmatmul.mubr.f32.gmra.mrb[54].mxu0 %v198_v17  ;;  %3045 = vmatmul.mubr.f32.gmra.mrb[54].mxu1 %v311_v18 }
  0x9f   : > { %2708 = vmatprep.mubr.msk.f32.mxu0 %vm3363_vm0, %v3364_v1  ;;  %3047 = vmatprep.mubr.msk.f32.mxu1 %vm3363_vm0, %v3364_v1 }
  0xa2   : > { %2709 = vmatmul.mubr.f32.gmra.mrb[56].mxu0 %v199_v19  ;;  %3048 = vmatmul.mubr.f32.gmra.mrb[56].mxu1 %v312_v20 }
  0xa3   : > { %2711 = vmatprep.mubr.msk.f32.mxu0 %vm3363_vm0, %v3364_v1  ;;  %3050 = vmatprep.mubr.msk.f32.mxu1 %vm3363_vm0, %v3364_v1 }
  0xa6   : > { %2712 = vmatmul.mubr.f32.gmra.mrb[58].mxu0 %v200_v21  ;;  %3051 = vmatmul.mubr.f32.gmra.mrb[58].mxu1 %v313_v22 }
  0xa7   : > { %2714 = vmatprep.mubr.msk.f32.mxu0 %vm3363_vm0, %v3364_v1  ;;  %3053 = vmatprep.mubr.msk.f32.mxu1 %vm3363_vm0, %v3364_v1 }
  0xaa   : > { %2715 = vmatmul.mubr.f32.gmra.mrb[60].mxu0 %v201_v23  ;;  %3054 = vmatmul.mubr.f32.gmra.mrb[60].mxu1 %v314_v24 }
  0xab   : > { %2717 = vmatprep.mubr.msk.f32.mxu0 %vm3363_vm0, %v3364_v1  ;;  %3056 = vmatprep.mubr.msk.f32.mxu1 %vm3363_vm0, %v3364_v1 }
  0xae   : > { %2718 = vmatmul.mubr.f32.gmra.mrb[62].mxu0 %v202_v25  ;;  %3057 = vmatmul.mubr.f32.gmra.mrb[62].mxu1 %v315_v26 }
  0xaf   : > { %2720 = vmatprep.mubr.msk.f32.mxu0 %vm3363_vm0, %v3364_v1  ;;  %3059 = vmatprep.mubr.msk.f32.mxu1 %vm3363_vm0, %v3364_v1 }
  0xb2   : > { %2721 = vmatmul.mubr.f32.gmra.mrb[64].mxu0 %v203_v27  ;;  %3060 = vmatmul.mubr.f32.gmra.mrb[64].mxu1 %v316_v28  ;;  %v226_v27 = vld [vmem:[%s5021_s0 + $0x1b8] sm:$0xff]  ;;  %v339_v28 = vld [vmem:[%s5021_s0 + $0x540] sm:$0xff] }
  0xb3   : > { %2723 = vmatprep.mubr.msk.f32.mxu0 %vm3363_vm0, %v3364_v1  ;;  %3062 = vmatprep.mubr.msk.f32.mxu1 %vm3363_vm0, %v3364_v1 }
  0xb6   : > { %2724 = vmatmul.mubr.f32.gmra.mrb[66].mxu0 %v204_v29  ;;  %3063 = vmatmul.mubr.f32.gmra.mrb[66].mxu1 %v317_v30 }
  0xb7   : > { %2726 = vmatprep.mubr.msk.f32.mxu0 %vm3363_vm0, %v3364_v1  ;;  %3065 = vmatprep.mubr.msk.f32.mxu1 %vm3363_vm0, %v3364_v1 }
  0xba   : > { %2727 = vmatmul.mubr.f32.gmra.mrb[68].mxu0 %v205_v31  ;;  %3066 = vmatmul.mubr.f32.gmra.mrb[68].mxu1 %v318_v32 }
  0xbb   : > { %2729 = vmatprep.mubr.msk.f32.mxu0 %vm3363_vm0, %v3364_v1  ;;  %3068 = vmatprep.mubr.msk.f32.mxu1 %vm3363_vm0, %v3364_v1 }
  0xbe   : > { %2730 = vmatmul.mubr.f32.gmra.mrb[70].mxu0 %v206_v33  ;;  %3069 = vmatmul.mubr.f32.gmra.mrb[70].mxu1 %v319_v34 }
  0xbf   : > { %2732 = vmatprep.mubr.msk.f32.mxu0 %vm3363_vm0, %v3364_v1  ;;  %3071 = vmatprep.mubr.msk.f32.mxu1 %vm3363_vm0, %v3364_v1 }
  0xc2   : > { %2733 = vmatmul.mubr.f32.gmra.mrb[72].mxu0 %v207_v35  ;;  %3072 = vmatmul.mubr.f32.gmra.mrb[72].mxu1 %v320_v36 }
  0xc3   : > { %2735 = vmatprep.mubr.msk.f32.mxu0 %vm3363_vm0, %v3364_v1  ;;  %3074 = vmatprep.mubr.msk.f32.mxu1 %vm3363_vm0, %v3364_v1 }
  0xc6   : > { %2736 = vmatmul.mubr.f32.gmra.mrb[74].mxu0 %v208_v37  ;;  %3075 = vmatmul.mubr.f32.gmra.mrb[74].mxu1 %v321_v38 }
  0xc7   : > { %2738 = vmatprep.mubr.msk.f32.mxu0 %vm3363_vm0, %v3364_v1  ;;  %3077 = vmatprep.mubr.msk.f32.mxu1 %vm3363_vm0, %v3364_v1 }
  0xca   : > { %2739 = vmatmul.mubr.f32.gmra.mrb[76].mxu0 %v209_v39  ;;  %3078 = vmatmul.mubr.f32.gmra.mrb[76].mxu1 %v322_v40  ;;  %v227_v39 = vld [vmem:[%s5021_s0 + $0x1c0] sm:$0xff]  ;;  %v340_v40 = vld [vmem:[%s5021_s0 + $0x548] sm:$0xff] }
  0xcb   : > { %2741 = vmatprep.mubr.msk.f32.mxu0 %vm3363_vm0, %v3364_v1  ;;  %3080 = vmatprep.mubr.msk.f32.mxu1 %vm3363_vm0, %v3364_v1 }
  0xce   : > { %2742 = vmatmul.mubr.f32.gmra.mrb[78].mxu0 %v210_v41  ;;  %3081 = vmatmul.mubr.f32.gmra.mrb[78].mxu1 %v323_v42 }
  0xcf   : > { %2744 = vmatprep.mubr.msk.f32.mxu0 %vm3363_vm0, %v3364_v1  ;;  %3083 = vmatprep.mubr.msk.f32.mxu1 %vm3363_vm0, %v3364_v1 }
  0xd2   : > { %2745 = vmatmul.mubr.f32.gmra.mrb[80].mxu0 %v211_v43  ;;  %3084 = vmatmul.mubr.f32.gmra.mrb[80].mxu1 %v324_v44 }
  0xd3   : > { %2747 = vmatprep.mubr.msk.f32.mxu0 %vm3363_vm0, %v3364_v1  ;;  %3086 = vmatprep.mubr.msk.f32.mxu1 %vm3363_vm0, %v3364_v1 }
  0xd6   : > { %2748 = vmatmul.mubr.f32.gmra.mrb[82].mxu0 %v212_v45  ;;  %3087 = vmatmul.mubr.f32.gmra.mrb[82].mxu1 %v325_v46 }
  0xd7   : > { %2750 = vmatprep.mubr.msk.f32.mxu0 %vm3363_vm0, %v3364_v1  ;;  %3089 = vmatprep.mubr.msk.f32.mxu1 %vm3363_vm0, %v3364_v1 }
  0xda   : > { %2751 = vmatmul.mubr.f32.gmra.mrb[84].mxu0 %v213_v47  ;;  %3090 = vmatmul.mubr.f32.gmra.mrb[84].mxu1 %v326_v48 }
  0xdb   : > { %2753 = vmatprep.mubr.msk.f32.mxu0 %vm3363_vm0, %v3364_v1  ;;  %3092 = vmatprep.mubr.msk.f32.mxu1 %vm3363_vm0, %v3364_v1 }
  0xde   : > { %2754 = vmatmul.mubr.f32.gmra.mrb[86].mxu0 %v214_v49  ;;  %3093 = vmatmul.mubr.f32.gmra.mrb[86].mxu1 %v327_v50 }
  0xdf   : > { %2756 = vmatprep.mubr.msk.f32.mxu0 %vm3363_vm0, %v3364_v1  ;;  %3095 = vmatprep.mubr.msk.f32.mxu1 %vm3363_vm0, %v3364_v1 }
  0xe2   : > { %2757 = vmatmul.mubr.f32.gmra.mrb[88].mxu0 %v215_v51  ;;  %3096 = vmatmul.mubr.f32.gmra.mrb[88].mxu1 %v328_v52  ;;  %v228_v51 = vld [vmem:[%s5021_s0 + $0x1c8] sm:$0xff]  ;;  %v341_v52 = vld [vmem:[%s5021_s0 + $0x550] sm:$0xff] }
  0xe3   : > { %2759 = vmatprep.mubr.msk.f32.mxu0 %vm3363_vm0, %v3364_v1  ;;  %3098 = vmatprep.mubr.msk.f32.mxu1 %vm3363_vm0, %v3364_v1 }
  0xe6   : > { %2760 = vmatmul.mubr.f32.gmra.mrb[90].mxu0 %v216_v53  ;;  %3099 = vmatmul.mubr.f32.gmra.mrb[90].mxu1 %v329_v54 }
  0xe7   : > { %2762 = vmatprep.mubr.msk.f32.mxu0 %vm3363_vm0, %v3364_v1  ;;  %3101 = vmatprep.mubr.msk.f32.mxu1 %vm3363_vm0, %v3364_v1 }
  0xea   : > { %2763 = vmatmul.mubr.f32.gmra.mrb[92].mxu0 %v217_v55  ;;  %3102 = vmatmul.mubr.f32.gmra.mrb[92].mxu1 %v330_v56 }
  0xeb   : > { %2765 = vmatprep.mubr.msk.f32.mxu0 %vm3363_vm0, %v3364_v1  ;;  %3104 = vmatprep.mubr.msk.f32.mxu1 %vm3363_vm0, %v3364_v1 }
  0xee   : > { %2766 = vmatmul.mubr.f32.gmra.mrb[94].mxu0 %v218_v57  ;;  %3105 = vmatmul.mubr.f32.gmra.mrb[94].mxu1 %v331_v58 }
  0xef   : > { %2768 = vmatprep.mubr.msk.f32.mxu0 %vm3363_vm0, %v3364_v1  ;;  %3107 = vmatprep.mubr.msk.f32.mxu1 %vm3363_vm0, %v3364_v1 }
  0xf2   : > { %2769 = vmatmul.mubr.f32.gmra.mrb[96].mxu0 %v219_v59  ;;  %3108 = vmatmul.mubr.f32.gmra.mrb[96].mxu1 %v332_v60 }
  0xf3   : > { %2771 = vmatprep.mubr.msk.f32.mxu0 %vm3363_vm0, %v3364_v1  ;;  %3110 = vmatprep.mubr.msk.f32.mxu1 %vm3363_vm0, %v3364_v1 }
  0xf6   : > { %2772 = vmatmul.mubr.f32.gmra.mrb[98].mxu0 %v220_v61  ;;  %3111 = vmatmul.mubr.f32.gmra.mrb[98].mxu1 %v333_v62 }
  0xf7   : > { %2774 = vmatprep.mubr.msk.f32.mxu0 %vm3363_vm0, %v3364_v1  ;;  %3113 = vmatprep.mubr.msk.f32.mxu1 %vm3363_vm0, %v3364_v1 }
  0xfa   : > { %2775 = vmatmul.mubr.f32.gmra.mrb[100].mxu0 %v221_v63  ;;  %3114 = vmatmul.mubr.f32.gmra.mrb[100].mxu1 %v334_v0  ;;  %v229_v63 = vld [vmem:[%s5021_s0 + $0x1d0] sm:$0xff]  ;;  %v342_v0 = vld [vmem:[%s5021_s0 + $0x558] sm:$0xff] }
  0xfb   : > { %2777 = vmatprep.mubr.msk.f32.mxu0 %vm3363_vm0, %v3364_v1  ;;  %3116 = vmatprep.mubr.msk.f32.mxu1 %vm3363_vm0, %v3364_v1 }
  0xfe   : > { %2778 = vmatmul.mubr.f32.gmra.mrb[102].mxu0 %v222_v2  ;;  %3117 = vmatmul.mubr.f32.gmra.mrb[102].mxu1 %v335_v3 }
  0xff   : > { %2780 = vmatprep.mubr.msk.f32.mxu0 %vm3363_vm0, %v3364_v1  ;;  %3119 = vmatprep.mubr.msk.f32.mxu1 %vm3363_vm0, %v3364_v1 }
 0x102   : > { %2781 = vmatmul.mubr.f32.gmra.mrb[104].mxu0 %v223_v4  ;;  %3120 = vmatmul.mubr.f32.gmra.mrb[104].mxu1 %v336_v5 }
 0x103   : > { %2783 = vmatprep.mubr.msk.f32.mxu0 %vm3363_vm0, %v3364_v1  ;;  %3122 = vmatprep.mubr.msk.f32.mxu1 %vm3363_vm0, %v3364_v1 }
 0x105   : > { %v485_v9 = vpop.f32.mrb[0].mxu0  ;;  %v1050_v10 = vpop.f32.mrb[0].mxu1 }
 0x106   : > { %v486_v11 = vadd.f32 %v3950_v6, %v485_v9  ;;  %v2626_v12 = vpop.f32.mrb[1].mxu0  ;;  %2784 = vmatmul.mubr.f32.gmra.mrb[106].mxu0 %v224_v7  ;;  %v1051_v13 = vadd.f32 %v3950_v6, %v1050_v10  ;;  %v2965_v14 = vpop.f32.mrb[1].mxu1  ;;  %3123 = vmatmul.mubr.f32.gmra.mrb[106].mxu1 %v337_v8 }
 0x107   : > { %2786 = vmatprep.mubr.msk.f32.mxu0 %vm3363_vm0, %v3364_v1  ;;  %3125 = vmatprep.mubr.msk.f32.mxu1 %vm3363_vm0, %v3364_v1  ;;  %v343_v14 = vld [vmem:[%s5021_s0 + $0x560] sm:$0xff] }
 0x108   : > { %v1609_v17 = vmax.f32 %v486_v11, 2.701001  ;;  %v1722_v18 = vmax.f32 %v1051_v13, 2.701001  ;;  %v230_v13 = vld [vmem:[%s5021_s0 + $0x1d8] sm:$0xff] }
 0x109   : > { %v490_v19 = vpop.f32.mrb[2].mxu0  ;;  %v1055_v20 = vpop.f32.mrb[2].mxu1 }
 0x10a   : > { %v1834_v21 = vmin.f32 %v1609_v17, 2.998999  ;;  %v1947_v22 = vmin.f32 %v1722_v18, 2.998999  ;;  %v491_v23 = vadd.f32 %v3950_v6, %v490_v19  ;;  %v2629_v24 = vpop.f32.mrb[3].mxu0  ;;  %2787 = vmatmul.mubr.f32.gmra.mrb[108].mxu0 %v225_v15  ;;  %v1056_v25 = vadd.f32 %v3950_v6, %v1055_v20  ;;  %v2968_v26 = vpop.f32.mrb[3].mxu1  ;;  %3126 = vmatmul.mubr.f32.gmra.mrb[108].mxu1 %v338_v16 }
 0x10b   : > { %2789 = vmatprep.mubr.msk.f32.mxu0 %vm3363_vm0, %v3364_v1  ;;  %3128 = vmatprep.mubr.msk.f32.mxu1 %vm3363_vm0, %v3364_v1  ;;  %v344_v26 = vld [vmem:[%s5021_s0 + $0x568] sm:$0xff] }
 0x10c   : > { %2059 = vst [vmem:[%s3978_s17] sm:$0xff] %v1834_v21  ;;  %2172 = vst [vmem:[%s3978_s17 + $0x388] sm:$0xff] %v1947_v22  ;;  %v1610_v29 = vmax.f32 %v491_v23, 2.701001  ;;  %v1723_v30 = vmax.f32 %v1056_v25, 2.701001  ;;  %v231_v25 = vld [vmem:[%s5021_s0 + $0x1e0] sm:$0xff] }
 0x10d   : > { %v495_v31 = vpop.f32.mrb[4].mxu0  ;;  %v1060_v32 = vpop.f32.mrb[4].mxu1 }
 0x10e   : > { %v1835_v33 = vmin.f32 %v1610_v29, 2.998999  ;;  %v1948_v34 = vmin.f32 %v1723_v30, 2.998999  ;;  %v496_v35 = vadd.f32 %v3950_v6, %v495_v31  ;;  %v2632_v36 = vpop.f32.mrb[5].mxu0  ;;  %2790 = vmatmul.mubr.f32.gmra.mrb[110].mxu0 %v226_v27  ;;  %v1061_v37 = vadd.f32 %v3950_v6, %v1060_v32  ;;  %v2971_v38 = vpop.f32.mrb[5].mxu1  ;;  %3129 = vmatmul.mubr.f32.gmra.mrb[110].mxu1 %v339_v28 }
 0x10f   : > { %2792 = vmatprep.mubr.msk.f32.mxu0 %vm3363_vm0, %v3364_v1  ;;  %3131 = vmatprep.mubr.msk.f32.mxu1 %vm3363_vm0, %v3364_v1  ;;  %v345_v38 = vld [vmem:[%s5021_s0 + $0x570] sm:$0xff] }
 0x110   : > { %2060 = vst [vmem:[%s3978_s17 + $0x8] sm:$0xff] %v1835_v33  ;;  %2173 = vst [vmem:[%s3978_s17 + $0x390] sm:$0xff] %v1948_v34  ;;  %v1611_v41 = vmax.f32 %v496_v35, 2.701001  ;;  %v1724_v42 = vmax.f32 %v1061_v37, 2.701001 }
 0x111   : > { %v500_v43 = vpop.f32.mrb[6].mxu0  ;;  %v1065_v44 = vpop.f32.mrb[6].mxu1  ;;  %v232_v37 = vld [vmem:[%s5021_s0 + $0x1e8] sm:$0xff] }
 0x112   : > { %v1836_v45 = vmin.f32 %v1611_v41, 2.998999  ;;  %v1949_v46 = vmin.f32 %v1724_v42, 2.998999  ;;  %v501_v47 = vadd.f32 %v3950_v6, %v500_v43  ;;  %v2635_v48 = vpop.f32.mrb[7].mxu0  ;;  %2793 = vmatmul.mubr.f32.gmra.mrb[112].mxu0 %v227_v39  ;;  %v1066_v49 = vadd.f32 %v3950_v6, %v1065_v44  ;;  %v2974_v50 = vpop.f32.mrb[7].mxu1  ;;  %3132 = vmatmul.mubr.f32.gmra.mrb[112].mxu1 %v340_v40 }
 0x113   : > { %2795 = vmatprep.mubr.msk.f32.mxu0 %vm3363_vm0, %v3364_v1  ;;  %3134 = vmatprep.mubr.msk.f32.mxu1 %vm3363_vm0, %v3364_v1  ;;  %v346_v50 = vld [vmem:[%s5021_s0 + $0x578] sm:$0xff] }
 0x114   : > { %2061 = vst [vmem:[%s3978_s17 + $0x10] sm:$0xff] %v1836_v45  ;;  %2174 = vst [vmem:[%s3978_s17 + $0x398] sm:$0xff] %v1949_v46  ;;  %v1612_v53 = vmax.f32 %v501_v47, 2.701001  ;;  %v1725_v54 = vmax.f32 %v1066_v49, 2.701001 }
 0x115   : > { %v505_v55 = vpop.f32.mrb[8].mxu0  ;;  %v1070_v56 = vpop.f32.mrb[8].mxu1  ;;  %v233_v49 = vld [vmem:[%s5021_s0 + $0x1f0] sm:$0xff] }
 0x116   : > { %v1837_v57 = vmin.f32 %v1612_v53, 2.998999  ;;  %v1950_v58 = vmin.f32 %v1725_v54, 2.998999  ;;  %v506_v59 = vadd.f32 %v3950_v6, %v505_v55  ;;  %v2638_v60 = vpop.f32.mrb[9].mxu0  ;;  %2796 = vmatmul.mubr.f32.gmra.mrb[114].mxu0 %v228_v51  ;;  %v1071_v61 = vadd.f32 %v3950_v6, %v1070_v56  ;;  %v2977_v62 = vpop.f32.mrb[9].mxu1  ;;  %3135 = vmatmul.mubr.f32.gmra.mrb[114].mxu1 %v341_v52 }
 0x117   : > { %2798 = vmatprep.mubr.msk.f32.mxu0 %vm3363_vm0, %v3364_v1  ;;  %3137 = vmatprep.mubr.msk.f32.mxu1 %vm3363_vm0, %v3364_v1  ;;  %v347_v62 = vld [vmem:[%s5021_s0 + $0x580] sm:$0xff] }
 0x118   : > { %2062 = vst [vmem:[%s3978_s17 + $0x18] sm:$0xff] %v1837_v57  ;;  %2175 = vst [vmem:[%s3978_s17 + $0x3a0] sm:$0xff] %v1950_v58  ;;  %v1613_v2 = vmax.f32 %v506_v59, 2.701001  ;;  %v1726_v3 = vmax.f32 %v1071_v61, 2.701001 }
 0x119   : > { %v510_v4 = vpop.f32.mrb[10].mxu0  ;;  %v1075_v5 = vpop.f32.mrb[10].mxu1  ;;  %v234_v61 = vld [vmem:[%s5021_s0 + $0x1f8] sm:$0xff] }
 0x11a   : > { %v1838_v7 = vmin.f32 %v1613_v2, 2.998999  ;;  %v1951_v8 = vmin.f32 %v1726_v3, 2.998999  ;;  %v511_v9 = vadd.f32 %v3950_v6, %v510_v4  ;;  %v2641_v10 = vpop.f32.mrb[11].mxu0  ;;  %2799 = vmatmul.mubr.f32.gmra.mrb[116].mxu0 %v229_v63  ;;  %v1076_v11 = vadd.f32 %v3950_v6, %v1075_v5  ;;  %v2980_v12 = vpop.f32.mrb[11].mxu1  ;;  %3138 = vmatmul.mubr.f32.gmra.mrb[116].mxu1 %v342_v0 }
 0x11b   : > { %2801 = vmatprep.mubr.msk.f32.mxu0 %vm3363_vm0, %v3364_v1  ;;  %3140 = vmatprep.mubr.msk.f32.mxu1 %vm3363_vm0, %v3364_v1  ;;  %v348_v12 = vld [vmem:[%s5021_s0 + $0x588] sm:$0xff] }
 0x11c   : > { %2063 = vst [vmem:[%s3978_s17 + $0x20] sm:$0xff] %v1838_v7  ;;  %2176 = vst [vmem:[%s3978_s17 + $0x3a8] sm:$0xff] %v1951_v8  ;;  %v1614_v15 = vmax.f32 %v511_v9, 2.701001  ;;  %v1727_v16 = vmax.f32 %v1076_v11, 2.701001 }
 0x11d   : > { %v515_v17 = vpop.f32.mrb[12].mxu0  ;;  %v1080_v18 = vpop.f32.mrb[12].mxu1  ;;  %v235_v11 = vld [vmem:[%s5021_s0 + $0x200] sm:$0xff] }
 0x11e   : > { %v1839_v19 = vmin.f32 %v1614_v15, 2.998999  ;;  %v1952_v20 = vmin.f32 %v1727_v16, 2.998999  ;;  %v516_v21 = vadd.f32 %v3950_v6, %v515_v17  ;;  %v2644_v22 = vpop.f32.mrb[13].mxu0  ;;  %2802 = vmatmul.mubr.f32.gmra.mrb[118].mxu0 %v230_v13  ;;  %v1081_v23 = vadd.f32 %v3950_v6, %v1080_v18  ;;  %v2983_v24 = vpop.f32.mrb[13].mxu1  ;;  %3141 = vmatmul.mubr.f32.gmra.mrb[118].mxu1 %v343_v14 }
 0x11f   : > { %2804 = vmatprep.mubr.msk.f32.mxu0 %vm3363_vm0, %v3364_v1  ;;  %3143 = vmatprep.mubr.msk.f32.mxu1 %vm3363_vm0, %v3364_v1  ;;  %v349_v24 = vld [vmem:[%s5021_s0 + $0x590] sm:$0xff] }
 0x120   : > { %2064 = vst [vmem:[%s3978_s17 + $0x28] sm:$0xff] %v1839_v19  ;;  %2177 = vst [vmem:[%s3978_s17 + $0x3b0] sm:$0xff] %v1952_v20  ;;  %v1615_v27 = vmax.f32 %v516_v21, 2.701001  ;;  %v1728_v28 = vmax.f32 %v1081_v23, 2.701001 }
 0x121   : > { %v520_v29 = vpop.f32.mrb[14].mxu0  ;;  %v1085_v30 = vpop.f32.mrb[14].mxu1  ;;  %v236_v23 = vld [vmem:[%s5021_s0 + $0x208] sm:$0xff] }
 0x122   : > { %v1840_v31 = vmin.f32 %v1615_v27, 2.998999  ;;  %v1953_v32 = vmin.f32 %v1728_v28, 2.998999  ;;  %v521_v33 = vadd.f32 %v3950_v6, %v520_v29  ;;  %v2647_v34 = vpop.f32.mrb[15].mxu0  ;;  %2805 = vmatmul.mubr.f32.gmra.mrb[120].mxu0 %v231_v25  ;;  %v1086_v35 = vadd.f32 %v3950_v6, %v1085_v30  ;;  %v2986_v36 = vpop.f32.mrb[15].mxu1  ;;  %3144 = vmatmul.mubr.f32.gmra.mrb[120].mxu1 %v344_v26 }
 0x123   : > { %2807 = vmatprep.mubr.msk.f32.mxu0 %vm3363_vm0, %v3364_v1  ;;  %3146 = vmatprep.mubr.msk.f32.mxu1 %vm3363_vm0, %v3364_v1  ;;  %v350_v36 = vld [vmem:[%s5021_s0 + $0x598] sm:$0xff] }
 0x124   : > { %2065 = vst [vmem:[%s3978_s17 + $0x30] sm:$0xff] %v1840_v31  ;;  %2178 = vst [vmem:[%s3978_s17 + $0x3b8] sm:$0xff] %v1953_v32  ;;  %v1616_v39 = vmax.f32 %v521_v33, 2.701001  ;;  %v1729_v40 = vmax.f32 %v1086_v35, 2.701001 }
 0x125   : > { %v525_v41 = vpop.f32.mrb[16].mxu0  ;;  %v1090_v42 = vpop.f32.mrb[16].mxu1  ;;  %v237_v35 = vld [vmem:[%s5021_s0 + $0x210] sm:$0xff] }
 0x126   : > { %v1841_v43 = vmin.f32 %v1616_v39, 2.998999  ;;  %v1954_v44 = vmin.f32 %v1729_v40, 2.998999  ;;  %v526_v45 = vadd.f32 %v3950_v6, %v525_v41  ;;  %v2650_v46 = vpop.f32.mrb[17].mxu0  ;;  %2808 = vmatmul.mubr.f32.gmra.mrb[122].mxu0 %v232_v37  ;;  %v1091_v47 = vadd.f32 %v3950_v6, %v1090_v42  ;;  %v2989_v48 = vpop.f32.mrb[17].mxu1  ;;  %3147 = vmatmul.mubr.f32.gmra.mrb[122].mxu1 %v345_v38 }
 0x127   : > { %2810 = vmatprep.mubr.msk.f32.mxu0 %vm3363_vm0, %v3364_v1  ;;  %3149 = vmatprep.mubr.msk.f32.mxu1 %vm3363_vm0, %v3364_v1  ;;  %v351_v48 = vld [vmem:[%s5021_s0 + $0x5a0] sm:$0xff] }
 0x128   : > { %2066 = vst [vmem:[%s3978_s17 + $0x38] sm:$0xff] %v1841_v43  ;;  %2179 = vst [vmem:[%s3978_s17 + $0x3c0] sm:$0xff] %v1954_v44  ;;  %v1617_v51 = vmax.f32 %v526_v45, 2.701001  ;;  %v1730_v52 = vmax.f32 %v1091_v47, 2.701001 }
 0x129   : > { %v530_v53 = vpop.f32.mrb[18].mxu0  ;;  %v1095_v54 = vpop.f32.mrb[18].mxu1  ;;  %v238_v47 = vld [vmem:[%s5021_s0 + $0x218] sm:$0xff] }
 0x12a   : > { %v1842_v55 = vmin.f32 %v1617_v51, 2.998999  ;;  %v1955_v56 = vmin.f32 %v1730_v52, 2.998999  ;;  %v531_v57 = vadd.f32 %v3950_v6, %v530_v53  ;;  %v2653_v58 = vpop.f32.mrb[19].mxu0  ;;  %2811 = vmatmul.mubr.f32.gmra.mrb[124].mxu0 %v233_v49  ;;  %v1096_v59 = vadd.f32 %v3950_v6, %v1095_v54  ;;  %v2992_v60 = vpop.f32.mrb[19].mxu1  ;;  %3150 = vmatmul.mubr.f32.gmra.mrb[124].mxu1 %v346_v50 }
 0x12b   : > { %2813 = vmatprep.mubr.msk.f32.mxu0 %vm3363_vm0, %v3364_v1  ;;  %3152 = vmatprep.mubr.msk.f32.mxu1 %vm3363_vm0, %v3364_v1  ;;  %v352_v60 = vld [vmem:[%s5021_s0 + $0x5a8] sm:$0xff] }
 0x12c   : > { %2067 = vst [vmem:[%s3978_s17 + $0x40] sm:$0xff] %v1842_v55  ;;  %2180 = vst [vmem:[%s3978_s17 + $0x3c8] sm:$0xff] %v1955_v56  ;;  %v1618_v63 = vmax.f32 %v531_v57, 2.701001  ;;  %v1731_v0 = vmax.f32 %v1096_v59, 2.701001 }
 0x12d   : > { %v535_v2 = vpop.f32.mrb[20].mxu0  ;;  %v1100_v3 = vpop.f32.mrb[20].mxu1  ;;  %v239_v59 = vld [vmem:[%s5021_s0 + $0x220] sm:$0xff] }
 0x12e   : > { %v1843_v4 = vmin.f32 %v1618_v63, 2.998999  ;;  %v1956_v5 = vmin.f32 %v1731_v0, 2.998999  ;;  %v536_v7 = vadd.f32 %v3950_v6, %v535_v2  ;;  %v2656_v8 = vpop.f32.mrb[21].mxu0  ;;  %2814 = vmatmul.mubr.f32.gmra.mrb[126].mxu0 %v234_v61  ;;  %v1101_v9 = vadd.f32 %v3950_v6, %v1100_v3  ;;  %v2995_v10 = vpop.f32.mrb[21].mxu1  ;;  %3153 = vmatmul.mubr.f32.gmra.mrb[126].mxu1 %v347_v62 }
 0x12f   : > { %2816 = vmatprep.mubr.msk.f32.mxu0 %vm3363_vm0, %v3364_v1  ;;  %3155 = vmatprep.mubr.msk.f32.mxu1 %vm3363_vm0, %v3364_v1  ;;  %v353_v10 = vld [vmem:[%s5021_s0 + $0x5b0] sm:$0xff] }
 0x130   : > { %2068 = vst [vmem:[%s3978_s17 + $0x48] sm:$0xff] %v1843_v4  ;;  %2181 = vst [vmem:[%s3978_s17 + $0x3d0] sm:$0xff] %v1956_v5  ;;  %v1619_v13 = vmax.f32 %v536_v7, 2.701001  ;;  %v1732_v14 = vmax.f32 %v1101_v9, 2.701001 }
 0x131   : > { %v540_v15 = vpop.f32.mrb[22].mxu0  ;;  %v1105_v16 = vpop.f32.mrb[22].mxu1  ;;  %v240_v9 = vld [vmem:[%s5021_s0 + $0x228] sm:$0xff] }
 0x132   : > { %v1844_v17 = vmin.f32 %v1619_v13, 2.998999  ;;  %v1957_v18 = vmin.f32 %v1732_v14, 2.998999  ;;  %v541_v19 = vadd.f32 %v3950_v6, %v540_v15  ;;  %v2659_v20 = vpop.f32.mrb[23].mxu0  ;;  %2817 = vmatmul.mubr.f32.gmra.mrb[128].mxu0 %v235_v11  ;;  %v1106_v21 = vadd.f32 %v3950_v6, %v1105_v16  ;;  %v2998_v22 = vpop.f32.mrb[23].mxu1  ;;  %3156 = vmatmul.mubr.f32.gmra.mrb[128].mxu1 %v348_v12 }
 0x133   : > { %2819 = vmatprep.mubr.msk.f32.mxu0 %vm3363_vm0, %v3364_v1  ;;  %3158 = vmatprep.mubr.msk.f32.mxu1 %vm3363_vm0, %v3364_v1  ;;  %v354_v22 = vld [vmem:[%s5021_s0 + $0x5b8] sm:$0xff] }
 0x134   : > { %2069 = vst [vmem:[%s3978_s17 + $0x50] sm:$0xff] %v1844_v17  ;;  %2182 = vst [vmem:[%s3978_s17 + $0x3d8] sm:$0xff] %v1957_v18  ;;  %v1620_v25 = vmax.f32 %v541_v19, 2.701001  ;;  %v1733_v26 = vmax.f32 %v1106_v21, 2.701001 }
 0x135   : > { %v545_v27 = vpop.f32.mrb[24].mxu0  ;;  %v1110_v28 = vpop.f32.mrb[24].mxu1  ;;  %v241_v21 = vld [vmem:[%s5021_s0 + $0x230] sm:$0xff] }
 0x136   : > { %v1845_v29 = vmin.f32 %v1620_v25, 2.998999  ;;  %v1958_v30 = vmin.f32 %v1733_v26, 2.998999  ;;  %v546_v31 = vadd.f32 %v3950_v6, %v545_v27  ;;  %v2662_v32 = vpop.f32.mrb[25].mxu0  ;;  %2820 = vmatmul.mubr.f32.gmra.mrb[130].mxu0 %v236_v23  ;;  %v1111_v33 = vadd.f32 %v3950_v6, %v1110_v28  ;;  %v3001_v34 = vpop.f32.mrb[25].mxu1  ;;  %3159 = vmatmul.mubr.f32.gmra.mrb[130].mxu1 %v349_v24 }
 0x137   : > { %2822 = vmatprep.mubr.msk.f32.mxu0 %vm3363_vm0, %v3364_v1  ;;  %3161 = vmatprep.mubr.msk.f32.mxu1 %vm3363_vm0, %v3364_v1  ;;  %v355_v34 = vld [vmem:[%s5021_s0 + $0x5c0] sm:$0xff] }
 0x138   : > { %2070 = vst [vmem:[%s3978_s17 + $0x58] sm:$0xff] %v1845_v29  ;;  %2183 = vst [vmem:[%s3978_s17 + $0x3e0] sm:$0xff] %v1958_v30  ;;  %v1621_v37 = vmax.f32 %v546_v31, 2.701001  ;;  %v1734_v38 = vmax.f32 %v1111_v33, 2.701001 }
 0x139   : > { %v550_v39 = vpop.f32.mrb[26].mxu0  ;;  %v1115_v40 = vpop.f32.mrb[26].mxu1  ;;  %v242_v33 = vld [vmem:[%s5021_s0 + $0x238] sm:$0xff] }
 0x13a   : > { %v1846_v41 = vmin.f32 %v1621_v37, 2.998999  ;;  %v1959_v42 = vmin.f32 %v1734_v38, 2.998999  ;;  %v551_v43 = vadd.f32 %v3950_v6, %v550_v39  ;;  %v2665_v44 = vpop.f32.mrb[27].mxu0  ;;  %2823 = vmatmul.mubr.f32.gmra.mrb[132].mxu0 %v237_v35  ;;  %v1116_v45 = vadd.f32 %v3950_v6, %v1115_v40  ;;  %v3004_v46 = vpop.f32.mrb[27].mxu1  ;;  %3162 = vmatmul.mubr.f32.gmra.mrb[132].mxu1 %v350_v36 }
 0x13b   : > { %2825 = vmatprep.mubr.msk.f32.mxu0 %vm3363_vm0, %v3364_v1  ;;  %3164 = vmatprep.mubr.msk.f32.mxu1 %vm3363_vm0, %v3364_v1  ;;  %v356_v46 = vld [vmem:[%s5021_s0 + $0x5c8] sm:$0xff] }
 0x13c   : > { %2071 = vst [vmem:[%s3978_s17 + $0x60] sm:$0xff] %v1846_v41  ;;  %2184 = vst [vmem:[%s3978_s17 + $0x3e8] sm:$0xff] %v1959_v42  ;;  %v1622_v49 = vmax.f32 %v551_v43, 2.701001  ;;  %v1735_v50 = vmax.f32 %v1116_v45, 2.701001 }
 0x13d   : > { %v555_v51 = vpop.f32.mrb[28].mxu0  ;;  %v1120_v52 = vpop.f32.mrb[28].mxu1  ;;  %v243_v45 = vld [vmem:[%s5021_s0 + $0x240] sm:$0xff] }
 0x13e   : > { %v1847_v53 = vmin.f32 %v1622_v49, 2.998999  ;;  %v1960_v54 = vmin.f32 %v1735_v50, 2.998999  ;;  %v556_v55 = vadd.f32 %v3950_v6, %v555_v51  ;;  %v2668_v56 = vpop.f32.mrb[29].mxu0  ;;  %2826 = vmatmul.mubr.f32.gmra.mrb[134].mxu0 %v238_v47  ;;  %v1121_v57 = vadd.f32 %v3950_v6, %v1120_v52  ;;  %v3007_v58 = vpop.f32.mrb[29].mxu1  ;;  %3165 = vmatmul.mubr.f32.gmra.mrb[134].mxu1 %v351_v48 }
 0x13f   : > { %2828 = vmatprep.mubr.msk.f32.mxu0 %vm3363_vm0, %v3364_v1  ;;  %3167 = vmatprep.mubr.msk.f32.mxu1 %vm3363_vm0, %v3364_v1  ;;  %v357_v58 = vld [vmem:[%s5021_s0 + $0x5d0] sm:$0xff] }
 0x140   : > { %2072 = vst [vmem:[%s3978_s17 + $0x68] sm:$0xff] %v1847_v53  ;;  %2185 = vst [vmem:[%s3978_s17 + $0x3f0] sm:$0xff] %v1960_v54  ;;  %v1623_v61 = vmax.f32 %v556_v55, 2.701001  ;;  %v1736_v62 = vmax.f32 %v1121_v57, 2.701001 }
 0x141   : > { %v560_v63 = vpop.f32.mrb[30].mxu0  ;;  %v1125_v0 = vpop.f32.mrb[30].mxu1  ;;  %v244_v57 = vld [vmem:[%s5021_s0 + $0x248] sm:$0xff] }
 0x142   : > { %v1848_v2 = vmin.f32 %v1623_v61, 2.998999  ;;  %v1961_v3 = vmin.f32 %v1736_v62, 2.998999  ;;  %v561_v4 = vadd.f32 %v3950_v6, %v560_v63  ;;  %v2671_v5 = vpop.f32.mrb[31].mxu0  ;;  %2829 = vmatmul.mubr.f32.gmra.mrb[136].mxu0 %v239_v59  ;;  %v1126_v7 = vadd.f32 %v3950_v6, %v1125_v0  ;;  %v3010_v8 = vpop.f32.mrb[31].mxu1  ;;  %3168 = vmatmul.mubr.f32.gmra.mrb[136].mxu1 %v352_v60 }
 0x143   : > { %2831 = vmatprep.mubr.msk.f32.mxu0 %vm3363_vm0, %v3364_v1  ;;  %3170 = vmatprep.mubr.msk.f32.mxu1 %vm3363_vm0, %v3364_v1  ;;  %v358_v8 = vld [vmem:[%s5021_s0 + $0x5d8] sm:$0xff] }
 0x144   : > { %2073 = vst [vmem:[%s3978_s17 + $0x70] sm:$0xff] %v1848_v2  ;;  %2186 = vst [vmem:[%s3978_s17 + $0x3f8] sm:$0xff] %v1961_v3  ;;  %v1624_v11 = vmax.f32 %v561_v4, 2.701001  ;;  %v1737_v12 = vmax.f32 %v1126_v7, 2.701001 }
 0x145   : > { %v565_v13 = vpop.f32.mrb[32].mxu0  ;;  %v1130_v14 = vpop.f32.mrb[32].mxu1  ;;  %v245_v7 = vld [vmem:[%s5021_s0 + $0x250] sm:$0xff] }
 0x146   : > { %v1849_v15 = vmin.f32 %v1624_v11, 2.998999  ;;  %v1962_v16 = vmin.f32 %v1737_v12, 2.998999  ;;  %v566_v17 = vadd.f32 %v3950_v6, %v565_v13  ;;  %v2674_v18 = vpop.f32.mrb[33].mxu0  ;;  %2832 = vmatmul.mubr.f32.gmra.mrb[138].mxu0 %v240_v9  ;;  %v1131_v19 = vadd.f32 %v3950_v6, %v1130_v14  ;;  %v3013_v20 = vpop.f32.mrb[33].mxu1  ;;  %3171 = vmatmul.mubr.f32.gmra.mrb[138].mxu1 %v353_v10 }
 0x147   : > { %2834 = vmatprep.mubr.msk.f32.mxu0 %vm3363_vm0, %v3364_v1  ;;  %3173 = vmatprep.mubr.msk.f32.mxu1 %vm3363_vm0, %v3364_v1  ;;  %v359_v20 = vld [vmem:[%s5021_s0 + $0x5e0] sm:$0xff] }
 0x148   : > { %2074 = vst [vmem:[%s3978_s17 + $0x78] sm:$0xff] %v1849_v15  ;;  %2187 = vst [vmem:[%s3978_s17 + $0x400] sm:$0xff] %v1962_v16  ;;  %v1625_v23 = vmax.f32 %v566_v17, 2.701001  ;;  %v1738_v24 = vmax.f32 %v1131_v19, 2.701001 }
 0x149   : > { %v570_v25 = vpop.f32.mrb[34].mxu0  ;;  %v1135_v26 = vpop.f32.mrb[34].mxu1  ;;  %v246_v19 = vld [vmem:[%s5021_s0 + $0x258] sm:$0xff] }
 0x14a   : > { %v1850_v27 = vmin.f32 %v1625_v23, 2.998999  ;;  %v1963_v28 = vmin.f32 %v1738_v24, 2.998999  ;;  %v571_v29 = vadd.f32 %v3950_v6, %v570_v25  ;;  %v2677_v30 = vpop.f32.mrb[35].mxu0  ;;  %2835 = vmatmul.mubr.f32.gmra.mrb[140].mxu0 %v241_v21  ;;  %v1136_v31 = vadd.f32 %v3950_v6, %v1135_v26  ;;  %v3016_v32 = vpop.f32.mrb[35].mxu1  ;;  %3174 = vmatmul.mubr.f32.gmra.mrb[140].mxu1 %v354_v22 }
 0x14b   : > { %2837 = vmatprep.mubr.msk.f32.mxu0 %vm3363_vm0, %v3364_v1  ;;  %3176 = vmatprep.mubr.msk.f32.mxu1 %vm3363_vm0, %v3364_v1  ;;  %v360_v32 = vld [vmem:[%s5021_s0 + $0x5e8] sm:$0xff] }
 0x14c   : > { %2075 = vst [vmem:[%s3978_s17 + $0x80] sm:$0xff] %v1850_v27  ;;  %2188 = vst [vmem:[%s3978_s17 + $0x408] sm:$0xff] %v1963_v28  ;;  %v1626_v35 = vmax.f32 %v571_v29, 2.701001  ;;  %v1739_v36 = vmax.f32 %v1136_v31, 2.701001 }
 0x14d   : > { %v575_v37 = vpop.f32.mrb[36].mxu0  ;;  %v1140_v38 = vpop.f32.mrb[36].mxu1  ;;  %v247_v31 = vld [vmem:[%s5021_s0 + $0x260] sm:$0xff] }
 0x14e   : > { %v1851_v39 = vmin.f32 %v1626_v35, 2.998999  ;;  %v1964_v40 = vmin.f32 %v1739_v36, 2.998999  ;;  %v576_v41 = vadd.f32 %v3950_v6, %v575_v37  ;;  %v2680_v42 = vpop.f32.mrb[37].mxu0  ;;  %2838 = vmatmul.mubr.f32.gmra.mrb[142].mxu0 %v242_v33  ;;  %v1141_v43 = vadd.f32 %v3950_v6, %v1140_v38  ;;  %v3019_v44 = vpop.f32.mrb[37].mxu1  ;;  %3177 = vmatmul.mubr.f32.gmra.mrb[142].mxu1 %v355_v34 }
 0x14f   : > { %2840 = vmatprep.mubr.msk.f32.mxu0 %vm3363_vm0, %v3364_v1  ;;  %3179 = vmatprep.mubr.msk.f32.mxu1 %vm3363_vm0, %v3364_v1  ;;  %v361_v44 = vld [vmem:[%s5021_s0 + $0x5f0] sm:$0xff] }
 0x150   : > { %2076 = vst [vmem:[%s3978_s17 + $0x88] sm:$0xff] %v1851_v39  ;;  %2189 = vst [vmem:[%s3978_s17 + $0x410] sm:$0xff] %v1964_v40  ;;  %v1627_v47 = vmax.f32 %v576_v41, 2.701001  ;;  %v1740_v48 = vmax.f32 %v1141_v43, 2.701001 }
 0x151   : > { %v580_v49 = vpop.f32.mrb[38].mxu0  ;;  %v1145_v50 = vpop.f32.mrb[38].mxu1  ;;  %v248_v43 = vld [vmem:[%s5021_s0 + $0x268] sm:$0xff] }
 0x152   : > { %v1852_v51 = vmin.f32 %v1627_v47, 2.998999  ;;  %v1965_v52 = vmin.f32 %v1740_v48, 2.998999  ;;  %v581_v53 = vadd.f32 %v3950_v6, %v580_v49  ;;  %v2683_v54 = vpop.f32.mrb[39].mxu0  ;;  %2841 = vmatmul.mubr.f32.gmra.mrb[144].mxu0 %v243_v45  ;;  %v1146_v55 = vadd.f32 %v3950_v6, %v1145_v50  ;;  %v3022_v56 = vpop.f32.mrb[39].mxu1  ;;  %3180 = vmatmul.mubr.f32.gmra.mrb[144].mxu1 %v356_v46 }
 0x153   : > { %2843 = vmatprep.mubr.msk.f32.mxu0 %vm3363_vm0, %v3364_v1  ;;  %3182 = vmatprep.mubr.msk.f32.mxu1 %vm3363_vm0, %v3364_v1  ;;  %v362_v56 = vld [vmem:[%s5021_s0 + $0x5f8] sm:$0xff] }
 0x154   : > { %2077 = vst [vmem:[%s3978_s17 + $0x90] sm:$0xff] %v1852_v51  ;;  %2190 = vst [vmem:[%s3978_s17 + $0x418] sm:$0xff] %v1965_v52  ;;  %v1628_v59 = vmax.f32 %v581_v53, 2.701001  ;;  %v1741_v60 = vmax.f32 %v1146_v55, 2.701001 }
 0x155   : > { %v585_v61 = vpop.f32.mrb[40].mxu0  ;;  %v1150_v62 = vpop.f32.mrb[40].mxu1  ;;  %v249_v55 = vld [vmem:[%s5021_s0 + $0x270] sm:$0xff] }
 0x156   : > { %v1853_v63 = vmin.f32 %v1628_v59, 2.998999  ;;  %v1966_v0 = vmin.f32 %v1741_v60, 2.998999  ;;  %v586_v2 = vadd.f32 %v3950_v6, %v585_v61  ;;  %v2686_v3 = vpop.f32.mrb[41].mxu0  ;;  %2844 = vmatmul.mubr.f32.gmra.mrb[146].mxu0 %v244_v57  ;;  %v1151_v4 = vadd.f32 %v3950_v6, %v1150_v62  ;;  %v3025_v5 = vpop.f32.mrb[41].mxu1  ;;  %3183 = vmatmul.mubr.f32.gmra.mrb[146].mxu1 %v357_v58 }
 0x157   : > { %2846 = vmatprep.mubr.msk.f32.mxu0 %vm3363_vm0, %v3364_v1  ;;  %3185 = vmatprep.mubr.msk.f32.mxu1 %vm3363_vm0, %v3364_v1  ;;  %v363_v5 = vld [vmem:[%s5021_s0 + $0x600] sm:$0xff] }
 0x158   : > { %2078 = vst [vmem:[%s3978_s17 + $0x98] sm:$0xff] %v1853_v63  ;;  %2191 = vst [vmem:[%s3978_s17 + $0x420] sm:$0xff] %v1966_v0  ;;  %v1629_v9 = vmax.f32 %v586_v2, 2.701001  ;;  %v1742_v10 = vmax.f32 %v1151_v4, 2.701001 }
 0x159   : > { %v590_v11 = vpop.f32.mrb[42].mxu0  ;;  %v1155_v12 = vpop.f32.mrb[42].mxu1  ;;  %v250_v4 = vld [vmem:[%s5021_s0 + $0x278] sm:$0xff] }
 0x15a   : > { %v1854_v13 = vmin.f32 %v1629_v9, 2.998999  ;;  %v1967_v14 = vmin.f32 %v1742_v10, 2.998999  ;;  %v591_v15 = vadd.f32 %v3950_v6, %v590_v11  ;;  %v2689_v16 = vpop.f32.mrb[43].mxu0  ;;  %2847 = vmatmul.mubr.f32.gmra.mrb[148].mxu0 %v245_v7  ;;  %v1156_v17 = vadd.f32 %v3950_v6, %v1155_v12  ;;  %v3028_v18 = vpop.f32.mrb[43].mxu1  ;;  %3186 = vmatmul.mubr.f32.gmra.mrb[148].mxu1 %v358_v8 }
 0x15b   : > { %2849 = vmatprep.mubr.msk.f32.mxu0 %vm3363_vm0, %v3364_v1  ;;  %3188 = vmatprep.mubr.msk.f32.mxu1 %vm3363_vm0, %v3364_v1  ;;  %v364_v18 = vld [vmem:[%s5021_s0 + $0x608] sm:$0xff] }
 0x15c   : > { %2079 = vst [vmem:[%s3978_s17 + $0xa0] sm:$0xff] %v1854_v13  ;;  %2192 = vst [vmem:[%s3978_s17 + $0x428] sm:$0xff] %v1967_v14  ;;  %v1630_v21 = vmax.f32 %v591_v15, 2.701001  ;;  %v1743_v22 = vmax.f32 %v1156_v17, 2.701001 }
 0x15d   : > { %v595_v23 = vpop.f32.mrb[44].mxu0  ;;  %v1160_v24 = vpop.f32.mrb[44].mxu1  ;;  %v251_v17 = vld [vmem:[%s5021_s0 + $0x280] sm:$0xff] }
 0x15e   : > { %v1855_v25 = vmin.f32 %v1630_v21, 2.998999  ;;  %v1968_v26 = vmin.f32 %v1743_v22, 2.998999  ;;  %v596_v27 = vadd.f32 %v3950_v6, %v595_v23  ;;  %v2692_v28 = vpop.f32.mrb[45].mxu0  ;;  %2850 = vmatmul.mubr.f32.gmra.mrb[150].mxu0 %v246_v19  ;;  %v1161_v29 = vadd.f32 %v3950_v6, %v1160_v24  ;;  %v3031_v30 = vpop.f32.mrb[45].mxu1  ;;  %3189 = vmatmul.mubr.f32.gmra.mrb[150].mxu1 %v359_v20 }
 0x15f   : > { %2852 = vmatprep.mubr.msk.f32.mxu0 %vm3363_vm0, %v3364_v1  ;;  %3191 = vmatprep.mubr.msk.f32.mxu1 %vm3363_vm0, %v3364_v1  ;;  %v365_v30 = vld [vmem:[%s5021_s0 + $0x610] sm:$0xff] }
 0x160   : > { %2080 = vst [vmem:[%s3978_s17 + $0xa8] sm:$0xff] %v1855_v25  ;;  %2193 = vst [vmem:[%s3978_s17 + $0x430] sm:$0xff] %v1968_v26  ;;  %v1631_v33 = vmax.f32 %v596_v27, 2.701001  ;;  %v1744_v34 = vmax.f32 %v1161_v29, 2.701001 }
 0x161   : > { %v600_v35 = vpop.f32.mrb[46].mxu0  ;;  %v1165_v36 = vpop.f32.mrb[46].mxu1  ;;  %v252_v29 = vld [vmem:[%s5021_s0 + $0x288] sm:$0xff] }
 0x162   : > { %v1856_v37 = vmin.f32 %v1631_v33, 2.998999  ;;  %v1969_v38 = vmin.f32 %v1744_v34, 2.998999  ;;  %v601_v39 = vadd.f32 %v3950_v6, %v600_v35  ;;  %v2695_v40 = vpop.f32.mrb[47].mxu0  ;;  %2853 = vmatmul.mubr.f32.gmra.mrb[152].mxu0 %v247_v31  ;;  %v1166_v41 = vadd.f32 %v3950_v6, %v1165_v36  ;;  %v3034_v42 = vpop.f32.mrb[47].mxu1  ;;  %3192 = vmatmul.mubr.f32.gmra.mrb[152].mxu1 %v360_v32 }
 0x163   : > { %2855 = vmatprep.mubr.msk.f32.mxu0 %vm3363_vm0, %v3364_v1  ;;  %3194 = vmatprep.mubr.msk.f32.mxu1 %vm3363_vm0, %v3364_v1  ;;  %v253_v42 = vld [vmem:[%s5021_s0 + $0x290] sm:$0xff] }
 0x164   : > { %2081 = vst [vmem:[%s3978_s17 + $0xb0] sm:$0xff] %v1856_v37  ;;  %2194 = vst [vmem:[%s3978_s17 + $0x438] sm:$0xff] %v1969_v38  ;;  %v1632_v45 = vmax.f32 %v601_v39, 2.701001  ;;  %v1745_v46 = vmax.f32 %v1166_v41, 2.701001 }
 0x165   : > { %v605_v47 = vpop.f32.mrb[48].mxu0  ;;  %v1170_v48 = vpop.f32.mrb[48].mxu1  ;;  %v4362_v39 = vld [vmem:[%s5023_s2] ss:$0 sm:$0xff] }
 0x166   : > { %v1857_v49 = vmin.f32 %v1632_v45, 2.998999  ;;  %v1970_v50 = vmin.f32 %v1745_v46, 2.998999  ;;  %v606_v51 = vadd.f32 %v3950_v6, %v605_v47  ;;  %v2698_v52 = vpop.f32.mrb[49].mxu0  ;;  %2856 = vmatmul.mubr.f32.gmra.mrb[154].mxu0 %v248_v43  ;;  %v1171_v53 = vadd.f32 %v3950_v6, %v1170_v48  ;;  %v3037_v54 = vpop.f32.mrb[49].mxu1  ;;  %3195 = vmatmul.mubr.f32.gmra.mrb[154].mxu1 %v361_v44 }
 0x167   : > { %2858 = vmatprep.mubr.msk.f32.mxu0 %vm3363_vm0, %v3364_v1  ;;  %3197 = vmatprep.mubr.msk.f32.mxu1 %vm3363_vm0, %v3364_v1  ;;  %v367_v54 = vld [vmem:[%s5021_s0 + $0x620] sm:$0xff] }
 0x168   : > { %2082 = vst [vmem:[%s3978_s17 + $0xb8] sm:$0xff] %v1857_v49  ;;  %2195 = vst [vmem:[%s3978_s17 + $0x440] sm:$0xff] %v1970_v50  ;;  %v1633_v57 = vmax.f32 %v606_v51, 2.701001  ;;  %v1746_v58 = vmax.f32 %v1171_v53, 2.701001 }
 0x169   : > { %v610_v59 = vpop.f32.mrb[50].mxu0  ;;  %v1175_v60 = vpop.f32.mrb[50].mxu1  ;;  %v254_v53 = vld [vmem:[%s5021_s0 + $0x298] sm:$0xff] }
 0x16a   : > { %v1858_v61 = vmin.f32 %v1633_v57, 2.998999  ;;  %v1971_v62 = vmin.f32 %v1746_v58, 2.998999  ;;  %v611_v63 = vadd.f32 %v3950_v6, %v610_v59  ;;  %v2701_v0 = vpop.f32.mrb[51].mxu0  ;;  %2859 = vmatmul.mubr.f32.gmra.mrb[156].mxu0 %v249_v55  ;;  %v1176_v2 = vadd.f32 %v3950_v6, %v1175_v60  ;;  %v3040_v3 = vpop.f32.mrb[51].mxu1  ;;  %3198 = vmatmul.mubr.f32.gmra.mrb[156].mxu1 %v362_v56 }
 0x16b   : > { %2861 = vmatprep.mubr.msk.f32.mxu0 %vm3363_vm0, %v3364_v1  ;;  %3200 = vmatprep.mubr.msk.f32.mxu1 %vm3363_vm0, %v3364_v1  ;;  %v368_v3 = vld [vmem:[%s5021_s0 + $0x628] sm:$0xff] }
 0x16c   : > { %2083 = vst [vmem:[%s3978_s17 + $0xc0] sm:$0xff] %v1858_v61  ;;  %2196 = vst [vmem:[%s3978_s17 + $0x448] sm:$0xff] %v1971_v62  ;;  %v1634_v7 = vmax.f32 %v611_v63, 2.701001  ;;  %v1747_v8 = vmax.f32 %v1176_v2, 2.701001 }
 0x16d   : > { %v615_v9 = vpop.f32.mrb[52].mxu0  ;;  %v1180_v10 = vpop.f32.mrb[52].mxu1  ;;  %v255_v2 = vld [vmem:[%s5021_s0 + $0x2a0] sm:$0xff] }
 0x16e   : > { %v1859_v11 = vmin.f32 %v1634_v7, 2.998999  ;;  %v1972_v12 = vmin.f32 %v1747_v8, 2.998999  ;;  %v616_v13 = vadd.f32 %v3950_v6, %v615_v9  ;;  %v2704_v14 = vpop.f32.mrb[53].mxu0  ;;  %2862 = vmatmul.mubr.f32.gmra.mrb[158].mxu0 %v250_v4  ;;  %v1181_v15 = vadd.f32 %v3950_v6, %v1180_v10  ;;  %v3043_v16 = vpop.f32.mrb[53].mxu1  ;;  %3201 = vmatmul.mubr.f32.gmra.mrb[158].mxu1 %v363_v5 }
 0x16f   : > { %2864 = vmatprep.mubr.msk.f32.mxu0 %vm3363_vm0, %v3364_v1  ;;  %3203 = vmatprep.mubr.msk.f32.mxu1 %vm3363_vm0, %v3364_v1  ;;  %v369_v16 = vld [vmem:[%s5021_s0 + $0x630] sm:$0xff] }
 0x170   : > { %2084 = vst [vmem:[%s3978_s17 + $0xc8] sm:$0xff] %v1859_v11  ;;  %2197 = vst [vmem:[%s3978_s17 + $0x450] sm:$0xff] %v1972_v12  ;;  %v1635_v19 = vmax.f32 %v616_v13, 2.701001  ;;  %v1748_v20 = vmax.f32 %v1181_v15, 2.701001 }
 0x171   : > { %v620_v21 = vpop.f32.mrb[54].mxu0  ;;  %v1185_v22 = vpop.f32.mrb[54].mxu1  ;;  %v256_v15 = vld [vmem:[%s5021_s0 + $0x2a8] sm:$0xff] }
 0x172   : > { %v1860_v23 = vmin.f32 %v1635_v19, 2.998999  ;;  %v1973_v24 = vmin.f32 %v1748_v20, 2.998999  ;;  %v621_v25 = vadd.f32 %v3950_v6, %v620_v21  ;;  %v2707_v26 = vpop.f32.mrb[55].mxu0  ;;  %2865 = vmatmul.mubr.f32.gmra.mrb[160].mxu0 %v251_v17  ;;  %v1186_v27 = vadd.f32 %v3950_v6, %v1185_v22  ;;  %v3046_v28 = vpop.f32.mrb[55].mxu1  ;;  %3204 = vmatmul.mubr.f32.gmra.mrb[160].mxu1 %v364_v18 }
 0x173   : > { %2867 = vmatprep.mubr.msk.f32.mxu0 %vm3363_vm0, %v3364_v1  ;;  %3206 = vmatprep.mubr.msk.f32.mxu1 %vm3363_vm0, %v3364_v1  ;;  %v370_v28 = vld [vmem:[%s5021_s0 + $0x638] sm:$0xff] }
 0x174   : > { %2085 = vst [vmem:[%s3978_s17 + $0xd0] sm:$0xff] %v1860_v23  ;;  %2198 = vst [vmem:[%s3978_s17 + $0x458] sm:$0xff] %v1973_v24  ;;  %v1636_v31 = vmax.f32 %v621_v25, 2.701001  ;;  %v1749_v32 = vmax.f32 %v1186_v27, 2.701001 }
 0x175   : > { %v625_v33 = vpop.f32.mrb[56].mxu0  ;;  %v1190_v34 = vpop.f32.mrb[56].mxu1  ;;  %v257_v27 = vld [vmem:[%s5021_s0 + $0x2b0] sm:$0xff] }
 0x176   : > { %v1861_v35 = vmin.f32 %v1636_v31, 2.998999  ;;  %v1974_v36 = vmin.f32 %v1749_v32, 2.998999  ;;  %v626_v37 = vadd.f32 %v3950_v6, %v625_v33  ;;  %v2710_v38 = vpop.f32.mrb[57].mxu0  ;;  %2868 = vmatmul.mubr.f32.gmra.mrb[162].mxu0 %v252_v29  ;;  %v1191_v40 = vadd.f32 %v4362_v39, %v1190_v34  ;;  %v3049_v41 = vpop.f32.mrb[57].mxu1  ;;  %3207 = vmatmul.mubr.f32.gmra.mrb[162].mxu1 %v365_v30 }
 0x177   : > { %2870 = vmatprep.mubr.msk.f32.mxu0 %vm3363_vm0, %v3364_v1  ;;  %3209 = vmatprep.mubr.msk.f32.mxu1 %vm3363_vm0, %v3364_v1  ;;  %v366_v6 = vld [vmem:[%s5021_s0 + $0x618] sm:$0xff]  ;;  %v371_v41 = vld [vmem:[%s5021_s0 + $0x640] sm:$0xff] }
 0x178   : > { %2086 = vst [vmem:[%s3978_s17 + $0xd8] sm:$0xff] %v1861_v35  ;;  %2199 = vst [vmem:[%s3978_s17 + $0x460] sm:$0xff] %v1974_v36  ;;  %v1637_v43 = vmax.f32 %v626_v37, 2.701001  ;;  %v1750_v44 = vmax.f32 %v1191_v40, 2.701001 }
 0x179   : > { %v630_v45 = vpop.f32.mrb[58].mxu0  ;;  %v1195_v46 = vpop.f32.mrb[58].mxu1  ;;  %v258_v40 = vld [vmem:[%s5021_s0 + $0x2b8] sm:$0xff] }
 0x17a   : > { %v1862_v47 = vmin.f32 %v1637_v43, 2.998999  ;;  %v1975_v48 = vmin.f32 %v1750_v44, 2.998999  ;;  %v631_v49 = vadd.f32 %v4362_v39, %v630_v45  ;;  %v2713_v50 = vpop.f32.mrb[59].mxu0  ;;  %2871 = vmatmul.mubr.f32.gmra.mrb[164].mxu0 %v253_v42  ;;  %v1196_v51 = vadd.f32 %v4362_v39, %v1195_v46  ;;  %v3052_v52 = vpop.f32.mrb[59].mxu1  ;;  %3210 = vmatmul.mubr.f32.gmra.mrb[164].mxu1 %v366_v6 }
 0x17b   : > { %2873 = vmatprep.mubr.msk.f32.mxu0 %vm3363_vm0, %v3364_v1  ;;  %3212 = vmatprep.mubr.msk.f32.mxu1 %vm3363_vm0, %v3364_v1  ;;  %v372_v52 = vld [vmem:[%s5021_s0 + $0x648] sm:$0xff] }
 0x17c   : > { %2087 = vst [vmem:[%s3978_s17 + $0xe0] sm:$0xff] %v1862_v47  ;;  %2200 = vst [vmem:[%s3978_s17 + $0x468] sm:$0xff] %v1975_v48  ;;  %v1638_v55 = vmax.f32 %v631_v49, 2.701001  ;;  %v1751_v56 = vmax.f32 %v1196_v51, 2.701001 }
 0x17d   : > { %v635_v57 = vpop.f32.mrb[60].mxu0  ;;  %v1200_v58 = vpop.f32.mrb[60].mxu1  ;;  %v259_v51 = vld [vmem:[%s5021_s0 + $0x2c0] sm:$0xff] }
 0x17e   : > { %v1863_v59 = vmin.f32 %v1638_v55, 2.998999  ;;  %v1976_v60 = vmin.f32 %v1751_v56, 2.998999  ;;  %v636_v61 = vadd.f32 %v4362_v39, %v635_v57  ;;  %v2716_v62 = vpop.f32.mrb[61].mxu0  ;;  %2874 = vmatmul.mubr.f32.gmra.mrb[166].mxu0 %v254_v53  ;;  %v1201_v63 = vadd.f32 %v4362_v39, %v1200_v58  ;;  %v3055_v0 = vpop.f32.mrb[61].mxu1  ;;  %3213 = vmatmul.mubr.f32.gmra.mrb[166].mxu1 %v367_v54 }
 0x17f   : > { %2876 = vmatprep.mubr.msk.f32.mxu0 %vm3363_vm0, %v3364_v1  ;;  %3215 = vmatprep.mubr.msk.f32.mxu1 %vm3363_vm0, %v3364_v1  ;;  %v373_v0 = vld [vmem:[%s5021_s0 + $0x650] sm:$0xff] }
 0x180   : > { %2088 = vst [vmem:[%s3978_s17 + $0xe8] sm:$0xff] %v1863_v59  ;;  %2201 = vst [vmem:[%s3978_s17 + $0x470] sm:$0xff] %v1976_v60  ;;  %v1639_v4 = vmax.f32 %v636_v61, 2.701001  ;;  %v1752_v5 = vmax.f32 %v1201_v63, 2.701001 }
 0x181   : > { %v640_v7 = vpop.f32.mrb[62].mxu0  ;;  %v1205_v8 = vpop.f32.mrb[62].mxu1  ;;  %v260_v63 = vld [vmem:[%s5021_s0 + $0x2c8] sm:$0xff] }
 0x182   : > { %v1864_v9 = vmin.f32 %v1639_v4, 2.998999  ;;  %v1977_v10 = vmin.f32 %v1752_v5, 2.998999  ;;  %v641_v11 = vadd.f32 %v4362_v39, %v640_v7  ;;  %v2719_v12 = vpop.f32.mrb[63].mxu0  ;;  %2877 = vmatmul.mubr.f32.gmra.mrb[168].mxu0 %v255_v2  ;;  %v1206_v13 = vadd.f32 %v4362_v39, %v1205_v8  ;;  %v3058_v14 = vpop.f32.mrb[63].mxu1  ;;  %3216 = vmatmul.mubr.f32.gmra.mrb[168].mxu1 %v368_v3 }
 0x183   : > { %2879 = vmatprep.mubr.msk.f32.mxu0 %vm3363_vm0, %v3364_v1  ;;  %3218 = vmatprep.mubr.msk.f32.mxu1 %vm3363_vm0, %v3364_v1  ;;  %v374_v14 = vld [vmem:[%s5021_s0 + $0x658] sm:$0xff] }
 0x184   : > { %2089 = vst [vmem:[%s3978_s17 + $0xf0] sm:$0xff] %v1864_v9  ;;  %2202 = vst [vmem:[%s3978_s17 + $0x478] sm:$0xff] %v1977_v10  ;;  %v1640_v17 = vmax.f32 %v641_v11, 2.701001  ;;  %v1753_v18 = vmax.f32 %v1206_v13, 2.701001 }
 0x185   : > { %v645_v19 = vpop.f32.mrb[64].mxu0  ;;  %v1210_v20 = vpop.f32.mrb[64].mxu1  ;;  %v261_v13 = vld [vmem:[%s5021_s0 + $0x2d0] sm:$0xff] }
 0x186   : > { %v1865_v21 = vmin.f32 %v1640_v17, 2.998999  ;;  %v1978_v22 = vmin.f32 %v1753_v18, 2.998999  ;;  %v646_v23 = vadd.f32 %v4362_v39, %v645_v19  ;;  %v2722_v24 = vpop.f32.mrb[65].mxu0  ;;  %2880 = vmatmul.mubr.f32.gmra.mrb[170].mxu0 %v256_v15  ;;  %v1211_v25 = vadd.f32 %v4362_v39, %v1210_v20  ;;  %v3061_v26 = vpop.f32.mrb[65].mxu1  ;;  %3219 = vmatmul.mubr.f32.gmra.mrb[170].mxu1 %v369_v16 }
 0x187   : > { %2882 = vmatprep.mubr.msk.f32.mxu0 %vm3363_vm0, %v3364_v1  ;;  %3221 = vmatprep.mubr.msk.f32.mxu1 %vm3363_vm0, %v3364_v1  ;;  %v375_v26 = vld [vmem:[%s5021_s0 + $0x660] sm:$0xff] }
 0x188   : > { %2090 = vst [vmem:[%s3978_s17 + $0xf8] sm:$0xff] %v1865_v21  ;;  %2203 = vst [vmem:[%s3978_s17 + $0x480] sm:$0xff] %v1978_v22  ;;  %v1641_v29 = vmax.f32 %v646_v23, 2.701001  ;;  %v1754_v30 = vmax.f32 %v1211_v25, 2.701001 }
 0x189   : > { %v650_v31 = vpop.f32.mrb[66].mxu0  ;;  %v1215_v32 = vpop.f32.mrb[66].mxu1  ;;  %v262_v25 = vld [vmem:[%s5021_s0 + $0x2d8] sm:$0xff] }
 0x18a   : > { %v1866_v33 = vmin.f32 %v1641_v29, 2.998999  ;;  %v1979_v34 = vmin.f32 %v1754_v30, 2.998999  ;;  %v651_v35 = vadd.f32 %v4362_v39, %v650_v31  ;;  %v2725_v36 = vpop.f32.mrb[67].mxu0  ;;  %2883 = vmatmul.mubr.f32.gmra.mrb[172].mxu0 %v257_v27  ;;  %v1216_v37 = vadd.f32 %v4362_v39, %v1215_v32  ;;  %v3064_v38 = vpop.f32.mrb[67].mxu1  ;;  %3222 = vmatmul.mubr.f32.gmra.mrb[172].mxu1 %v370_v28 }
 0x18b   : > { %2885 = vmatprep.mubr.msk.f32.mxu0 %vm3363_vm0, %v3364_v1  ;;  %3224 = vmatprep.mubr.msk.f32.mxu1 %vm3363_vm0, %v3364_v1  ;;  %v376_v38 = vld [vmem:[%s5021_s0 + $0x668] sm:$0xff] }
 0x18c   : > { %2091 = vst [vmem:[%s3978_s17 + $0x100] sm:$0xff] %v1866_v33  ;;  %2204 = vst [vmem:[%s3978_s17 + $0x488] sm:$0xff] %v1979_v34  ;;  %v1642_v42 = vmax.f32 %v651_v35, 2.701001  ;;  %v1755_v6 = vmax.f32 %v1216_v37, 2.701001 }
 0x18d   : > { %v655_v43 = vpop.f32.mrb[68].mxu0  ;;  %v1220_v44 = vpop.f32.mrb[68].mxu1  ;;  %v263_v37 = vld [vmem:[%s5021_s0 + $0x2e0] sm:$0xff] }
 0x18e   : > { %v1867_v45 = vmin.f32 %v1642_v42, 2.998999  ;;  %v1980_v46 = vmin.f32 %v1755_v6, 2.998999  ;;  %v656_v47 = vadd.f32 %v4362_v39, %v655_v43  ;;  %v2728_v48 = vpop.f32.mrb[69].mxu0  ;;  %2886 = vmatmul.mubr.f32.gmra.mrb[174].mxu0 %v258_v40  ;;  %v1221_v49 = vadd.f32 %v4362_v39, %v1220_v44  ;;  %v3067_v50 = vpop.f32.mrb[69].mxu1  ;;  %3225 = vmatmul.mubr.f32.gmra.mrb[174].mxu1 %v371_v41 }
 0x18f   : > { %2888 = vmatprep.mubr.msk.f32.mxu0 %vm3363_vm0, %v3364_v1  ;;  %3227 = vmatprep.mubr.msk.f32.mxu1 %vm3363_vm0, %v3364_v1  ;;  %v377_v50 = vld [vmem:[%s5021_s0 + $0x670] sm:$0xff] }
 0x190   : > { %2092 = vst [vmem:[%s3978_s17 + $0x108] sm:$0xff] %v1867_v45  ;;  %2205 = vst [vmem:[%s3978_s17 + $0x490] sm:$0xff] %v1980_v46  ;;  %v1643_v53 = vmax.f32 %v656_v47, 2.701001  ;;  %v1756_v54 = vmax.f32 %v1221_v49, 2.701001 }
 0x191   : > { %v660_v55 = vpop.f32.mrb[70].mxu0  ;;  %v1225_v56 = vpop.f32.mrb[70].mxu1  ;;  %v264_v49 = vld [vmem:[%s5021_s0 + $0x2e8] sm:$0xff] }
 0x192   : > { %v1868_v57 = vmin.f32 %v1643_v53, 2.998999  ;;  %v1981_v58 = vmin.f32 %v1756_v54, 2.998999  ;;  %v661_v59 = vadd.f32 %v4362_v39, %v660_v55  ;;  %v2731_v60 = vpop.f32.mrb[71].mxu0  ;;  %2889 = vmatmul.mubr.f32.gmra.mrb[176].mxu0 %v259_v51  ;;  %v1226_v61 = vadd.f32 %v4362_v39, %v1225_v56  ;;  %v3070_v62 = vpop.f32.mrb[71].mxu1  ;;  %3228 = vmatmul.mubr.f32.gmra.mrb[176].mxu1 %v372_v52 }
 0x193   : > { %2891 = vmatprep.mubr.msk.f32.mxu0 %vm3363_vm0, %v3364_v1  ;;  %3230 = vmatprep.mubr.msk.f32.mxu1 %vm3363_vm0, %v3364_v1  ;;  %v378_v62 = vld [vmem:[%s5021_s0 + $0x678] sm:$0xff] }
 0x194   : > { %2093 = vst [vmem:[%s3978_s17 + $0x110] sm:$0xff] %v1868_v57  ;;  %2206 = vst [vmem:[%s3978_s17 + $0x498] sm:$0xff] %v1981_v58  ;;  %v1644_v2 = vmax.f32 %v661_v59, 2.701001  ;;  %v1757_v3 = vmax.f32 %v1226_v61, 2.701001 }
 0x195   : > { %v665_v4 = vpop.f32.mrb[72].mxu0  ;;  %v1230_v5 = vpop.f32.mrb[72].mxu1  ;;  %v265_v61 = vld [vmem:[%s5021_s0 + $0x2f0] sm:$0xff] }
 0x196   : > { %v1869_v7 = vmin.f32 %v1644_v2, 2.998999  ;;  %v1982_v8 = vmin.f32 %v1757_v3, 2.998999  ;;  %v666_v9 = vadd.f32 %v4362_v39, %v665_v4  ;;  %v2734_v10 = vpop.f32.mrb[73].mxu0  ;;  %2892 = vmatmul.mubr.f32.gmra.mrb[178].mxu0 %v260_v63  ;;  %v1231_v11 = vadd.f32 %v4362_v39, %v1230_v5  ;;  %v3073_v12 = vpop.f32.mrb[73].mxu1  ;;  %3231 = vmatmul.mubr.f32.gmra.mrb[178].mxu1 %v373_v0 }
 0x197   : > { %2894 = vmatprep.mubr.msk.f32.mxu0 %vm3363_vm0, %v3364_v1  ;;  %3233 = vmatprep.mubr.msk.f32.mxu1 %vm3363_vm0, %v3364_v1  ;;  %v379_v12 = vld [vmem:[%s5021_s0 + $0x680] sm:$0xff] }
 0x198   : > { %2094 = vst [vmem:[%s3978_s17 + $0x118] sm:$0xff] %v1869_v7  ;;  %2207 = vst [vmem:[%s3978_s17 + $0x4a0] sm:$0xff] %v1982_v8  ;;  %v1645_v15 = vmax.f32 %v666_v9, 2.701001  ;;  %v1758_v16 = vmax.f32 %v1231_v11, 2.701001 }
 0x199   : > { %v670_v17 = vpop.f32.mrb[74].mxu0  ;;  %v1235_v18 = vpop.f32.mrb[74].mxu1  ;;  %v266_v11 = vld [vmem:[%s5021_s0 + $0x2f8] sm:$0xff] }
 0x19a   : > { %v1870_v19 = vmin.f32 %v1645_v15, 2.998999  ;;  %v1983_v20 = vmin.f32 %v1758_v16, 2.998999  ;;  %v671_v21 = vadd.f32 %v4362_v39, %v670_v17  ;;  %v2737_v22 = vpop.f32.mrb[75].mxu0  ;;  %2895 = vmatmul.mubr.f32.gmra.mrb[180].mxu0 %v261_v13  ;;  %v1236_v23 = vadd.f32 %v4362_v39, %v1235_v18  ;;  %v3076_v24 = vpop.f32.mrb[75].mxu1  ;;  %3234 = vmatmul.mubr.f32.gmra.mrb[180].mxu1 %v374_v14 }
 0x19b   : > { %2897 = vmatprep.mubr.msk.f32.mxu0 %vm3363_vm0, %v3364_v1  ;;  %3236 = vmatprep.mubr.msk.f32.mxu1 %vm3363_vm0, %v3364_v1  ;;  %v380_v24 = vld [vmem:[%s5021_s0 + $0x688] sm:$0xff] }
 0x19c   : > { %2095 = vst [vmem:[%s3978_s17 + $0x120] sm:$0xff] %v1870_v19  ;;  %2208 = vst [vmem:[%s3978_s17 + $0x4a8] sm:$0xff] %v1983_v20  ;;  %v1646_v27 = vmax.f32 %v671_v21, 2.701001  ;;  %v1759_v28 = vmax.f32 %v1236_v23, 2.701001 }
 0x19d   : > { %v675_v29 = vpop.f32.mrb[76].mxu0  ;;  %v1240_v30 = vpop.f32.mrb[76].mxu1  ;;  %v267_v23 = vld [vmem:[%s5021_s0 + $0x300] sm:$0xff] }
 0x19e   : > { %v1871_v31 = vmin.f32 %v1646_v27, 2.998999  ;;  %v1984_v32 = vmin.f32 %v1759_v28, 2.998999  ;;  %v676_v33 = vadd.f32 %v4362_v39, %v675_v29  ;;  %v2740_v34 = vpop.f32.mrb[77].mxu0  ;;  %2898 = vmatmul.mubr.f32.gmra.mrb[182].mxu0 %v262_v25  ;;  %v1241_v35 = vadd.f32 %v4362_v39, %v1240_v30  ;;  %v3079_v36 = vpop.f32.mrb[77].mxu1  ;;  %3237 = vmatmul.mubr.f32.gmra.mrb[182].mxu1 %v375_v26 }
 0x19f   : > { %2900 = vmatprep.mubr.msk.f32.mxu0 %vm3363_vm0, %v3364_v1  ;;  %3239 = vmatprep.mubr.msk.f32.mxu1 %vm3363_vm0, %v3364_v1  ;;  %v381_v36 = vld [vmem:[%s5021_s0 + $0x690] sm:$0xff] }
 0x1a0   : > { %2096 = vst [vmem:[%s3978_s17 + $0x128] sm:$0xff] %v1871_v31  ;;  %2209 = vst [vmem:[%s3978_s17 + $0x4b0] sm:$0xff] %v1984_v32  ;;  %v1647_v40 = vmax.f32 %v676_v33, 2.701001  ;;  %v1760_v41 = vmax.f32 %v1241_v35, 2.701001 }
 0x1a1   : > { %v680_v42 = vpop.f32.mrb[78].mxu0  ;;  %v1245_v6 = vpop.f32.mrb[78].mxu1  ;;  %v268_v35 = vld [vmem:[%s5021_s0 + $0x308] sm:$0xff] }
 0x1a2   : > { %v1872_v43 = vmin.f32 %v1647_v40, 2.998999  ;;  %v1985_v44 = vmin.f32 %v1760_v41, 2.998999  ;;  %v681_v45 = vadd.f32 %v4362_v39, %v680_v42  ;;  %v2743_v46 = vpop.f32.mrb[79].mxu0  ;;  %2901 = vmatmul.mubr.f32.gmra.mrb[184].mxu0 %v263_v37  ;;  %v1246_v47 = vadd.f32 %v4362_v39, %v1245_v6  ;;  %v3082_v48 = vpop.f32.mrb[79].mxu1  ;;  %3240 = vmatmul.mubr.f32.gmra.mrb[184].mxu1 %v376_v38 }
 0x1a3   : > { %2903 = vmatprep.mubr.msk.f32.mxu0 %vm3363_vm0, %v3364_v1  ;;  %3242 = vmatprep.mubr.msk.f32.mxu1 %vm3363_vm0, %v3364_v1  ;;  %v382_v48 = vld [vmem:[%s5021_s0 + $0x698] sm:$0xff] }
 0x1a4   : > { %2097 = vst [vmem:[%s3978_s17 + $0x130] sm:$0xff] %v1872_v43  ;;  %2210 = vst [vmem:[%s3978_s17 + $0x4b8] sm:$0xff] %v1985_v44  ;;  %v1648_v51 = vmax.f32 %v681_v45, 2.701001  ;;  %v1761_v52 = vmax.f32 %v1246_v47, 2.701001 }
 0x1a5   : > { %v685_v53 = vpop.f32.mrb[80].mxu0  ;;  %v1250_v54 = vpop.f32.mrb[80].mxu1  ;;  %v269_v47 = vld [vmem:[%s5021_s0 + $0x310] sm:$0xff] }
 0x1a6   : > { %v1873_v55 = vmin.f32 %v1648_v51, 2.998999  ;;  %v1986_v56 = vmin.f32 %v1761_v52, 2.998999  ;;  %v686_v57 = vadd.f32 %v4362_v39, %v685_v53  ;;  %v2746_v58 = vpop.f32.mrb[81].mxu0  ;;  %2904 = vmatmul.mubr.f32.gmra.mrb[186].mxu0 %v264_v49  ;;  %v1251_v59 = vadd.f32 %v4362_v39, %v1250_v54  ;;  %v3085_v60 = vpop.f32.mrb[81].mxu1  ;;  %3243 = vmatmul.mubr.f32.gmra.mrb[186].mxu1 %v377_v50 }
 0x1a7   : > { %2906 = vmatprep.mubr.msk.f32.mxu0 %vm3363_vm0, %v3364_v1  ;;  %3245 = vmatprep.mubr.msk.f32.mxu1 %vm3363_vm0, %v3364_v1  ;;  %v383_v60 = vld [vmem:[%s5021_s0 + $0x6a0] sm:$0xff] }
 0x1a8   : > { %2098 = vst [vmem:[%s3978_s17 + $0x138] sm:$0xff] %v1873_v55  ;;  %2211 = vst [vmem:[%s3978_s17 + $0x4c0] sm:$0xff] %v1986_v56  ;;  %v1649_v63 = vmax.f32 %v686_v57, 2.701001  ;;  %v1762_v0 = vmax.f32 %v1251_v59, 2.701001 }
 0x1a9   : > { %v690_v2 = vpop.f32.mrb[82].mxu0  ;;  %v1255_v3 = vpop.f32.mrb[82].mxu1  ;;  %v270_v59 = vld [vmem:[%s5021_s0 + $0x318] sm:$0xff] }
 0x1aa   : > { %v1874_v4 = vmin.f32 %v1649_v63, 2.998999  ;;  %v1987_v5 = vmin.f32 %v1762_v0, 2.998999  ;;  %v691_v7 = vadd.f32 %v4362_v39, %v690_v2  ;;  %v2749_v8 = vpop.f32.mrb[83].mxu0  ;;  %2907 = vmatmul.mubr.f32.gmra.mrb[188].mxu0 %v265_v61  ;;  %v1256_v9 = vadd.f32 %v4362_v39, %v1255_v3  ;;  %v3088_v10 = vpop.f32.mrb[83].mxu1  ;;  %3246 = vmatmul.mubr.f32.gmra.mrb[188].mxu1 %v378_v62 }
 0x1ab   : > { %2909 = vmatprep.mubr.msk.f32.mxu0 %vm3363_vm0, %v3364_v1  ;;  %3248 = vmatprep.mubr.msk.f32.mxu1 %vm3363_vm0, %v3364_v1  ;;  %v384_v10 = vld [vmem:[%s5021_s0 + $0x6a8] sm:$0xff] }
 0x1ac   : > { %2099 = vst [vmem:[%s3978_s17 + $0x140] sm:$0xff] %v1874_v4  ;;  %2212 = vst [vmem:[%s3978_s17 + $0x4c8] sm:$0xff] %v1987_v5  ;;  %v1650_v13 = vmax.f32 %v691_v7, 2.701001  ;;  %v1763_v14 = vmax.f32 %v1256_v9, 2.701001 }
 0x1ad   : > { %v695_v15 = vpop.f32.mrb[84].mxu0  ;;  %v1260_v16 = vpop.f32.mrb[84].mxu1  ;;  %v271_v9 = vld [vmem:[%s5021_s0 + $0x320] sm:$0xff] }
 0x1ae   : > { %v1875_v17 = vmin.f32 %v1650_v13, 2.998999  ;;  %v1988_v18 = vmin.f32 %v1763_v14, 2.998999  ;;  %v696_v19 = vadd.f32 %v4362_v39, %v695_v15  ;;  %v2752_v20 = vpop.f32.mrb[85].mxu0  ;;  %2910 = vmatmul.mubr.f32.gmra.mrb[190].mxu0 %v266_v11  ;;  %v1261_v21 = vadd.f32 %v4362_v39, %v1260_v16  ;;  %v3091_v22 = vpop.f32.mrb[85].mxu1  ;;  %3249 = vmatmul.mubr.f32.gmra.mrb[190].mxu1 %v379_v12 }
 0x1af   : > { %2912 = vmatprep.mubr.msk.f32.mxu0 %vm3363_vm0, %v3364_v1  ;;  %3251 = vmatprep.mubr.msk.f32.mxu1 %vm3363_vm0, %v3364_v1  ;;  %v385_v22 = vld [vmem:[%s5021_s0 + $0x6b0] sm:$0xff] }
 0x1b0   : > { %2100 = vst [vmem:[%s3978_s17 + $0x148] sm:$0xff] %v1875_v17  ;;  %2213 = vst [vmem:[%s3978_s17 + $0x4d0] sm:$0xff] %v1988_v18  ;;  %v1651_v25 = vmax.f32 %v696_v19, 2.701001  ;;  %v1764_v26 = vmax.f32 %v1261_v21, 2.701001 }
 0x1b1   : > { %v700_v27 = vpop.f32.mrb[86].mxu0  ;;  %v1265_v28 = vpop.f32.mrb[86].mxu1  ;;  %v272_v21 = vld [vmem:[%s5021_s0 + $0x328] sm:$0xff] }
 0x1b2   : > { %v1876_v29 = vmin.f32 %v1651_v25, 2.998999  ;;  %v1989_v30 = vmin.f32 %v1764_v26, 2.998999  ;;  %v701_v31 = vadd.f32 %v4362_v39, %v700_v27  ;;  %v2755_v32 = vpop.f32.mrb[87].mxu0  ;;  %2913 = vmatmul.mubr.f32.gmra.mrb[192].mxu0 %v267_v23  ;;  %v1266_v33 = vadd.f32 %v4362_v39, %v1265_v28  ;;  %v3094_v34 = vpop.f32.mrb[87].mxu1  ;;  %3252 = vmatmul.mubr.f32.gmra.mrb[192].mxu1 %v380_v24 }
 0x1b3   : > { %2915 = vmatprep.mubr.msk.f32.mxu0 %vm3363_vm0, %v3364_v1  ;;  %3254 = vmatprep.mubr.msk.f32.mxu1 %vm3363_vm0, %v3364_v1  ;;  %v386_v34 = vld [vmem:[%s5021_s0 + $0x6b8] sm:$0xff] }
 0x1b4   : > { %2101 = vst [vmem:[%s3978_s17 + $0x150] sm:$0xff] %v1876_v29  ;;  %2214 = vst [vmem:[%s3978_s17 + $0x4d8] sm:$0xff] %v1989_v30  ;;  %v1652_v37 = vmax.f32 %v701_v31, 2.701001  ;;  %v1765_v38 = vmax.f32 %v1266_v33, 2.701001 }
 0x1b5   : > { %v705_v40 = vpop.f32.mrb[88].mxu0  ;;  %v1270_v41 = vpop.f32.mrb[88].mxu1  ;;  %v273_v33 = vld [vmem:[%s5021_s0 + $0x330] sm:$0xff] }
 0x1b6   : > { %v1877_v42 = vmin.f32 %v1652_v37, 2.998999  ;;  %v1990_v6 = vmin.f32 %v1765_v38, 2.998999  ;;  %v706_v43 = vadd.f32 %v4362_v39, %v705_v40  ;;  %v2758_v44 = vpop.f32.mrb[89].mxu0  ;;  %2916 = vmatmul.mubr.f32.gmra.mrb[194].mxu0 %v268_v35  ;;  %v1271_v45 = vadd.f32 %v4362_v39, %v1270_v41  ;;  %v3097_v46 = vpop.f32.mrb[89].mxu1  ;;  %3255 = vmatmul.mubr.f32.gmra.mrb[194].mxu1 %v381_v36 }
 0x1b7   : > { %2918 = vmatprep.mubr.msk.f32.mxu0 %vm3363_vm0, %v3364_v1  ;;  %3257 = vmatprep.mubr.msk.f32.mxu1 %vm3363_vm0, %v3364_v1  ;;  %v387_v46 = vld [vmem:[%s5021_s0 + $0x6c0] sm:$0xff] }
 0x1b8   : > { %2102 = vst [vmem:[%s3978_s17 + $0x158] sm:$0xff] %v1877_v42  ;;  %2215 = vst [vmem:[%s3978_s17 + $0x4e0] sm:$0xff] %v1990_v6  ;;  %v1653_v49 = vmax.f32 %v706_v43, 2.701001  ;;  %v1766_v50 = vmax.f32 %v1271_v45, 2.701001 }
 0x1b9   : > { %v710_v51 = vpop.f32.mrb[90].mxu0  ;;  %v1275_v52 = vpop.f32.mrb[90].mxu1  ;;  %v274_v45 = vld [vmem:[%s5021_s0 + $0x338] sm:$0xff] }
 0x1ba   : > { %v1878_v53 = vmin.f32 %v1653_v49, 2.998999  ;;  %v1991_v54 = vmin.f32 %v1766_v50, 2.998999  ;;  %v711_v55 = vadd.f32 %v4362_v39, %v710_v51  ;;  %v2761_v56 = vpop.f32.mrb[91].mxu0  ;;  %2919 = vmatmul.mubr.f32.gmra.mrb[196].mxu0 %v269_v47  ;;  %v1276_v57 = vadd.f32 %v4362_v39, %v1275_v52  ;;  %v3100_v58 = vpop.f32.mrb[91].mxu1  ;;  %3258 = vmatmul.mubr.f32.gmra.mrb[196].mxu1 %v382_v48 }
 0x1bb   : > { %2921 = vmatprep.mubr.msk.f32.mxu0 %vm3363_vm0, %v3364_v1  ;;  %3260 = vmatprep.mubr.msk.f32.mxu1 %vm3363_vm0, %v3364_v1  ;;  %v388_v58 = vld [vmem:[%s5021_s0 + $0x6c8] sm:$0xff] }
 0x1bc   : > { %2103 = vst [vmem:[%s3978_s17 + $0x160] sm:$0xff] %v1878_v53  ;;  %2216 = vst [vmem:[%s3978_s17 + $0x4e8] sm:$0xff] %v1991_v54  ;;  %v1654_v61 = vmax.f32 %v711_v55, 2.701001  ;;  %v1767_v62 = vmax.f32 %v1276_v57, 2.701001 }
 0x1bd   : > { %v715_v63 = vpop.f32.mrb[92].mxu0  ;;  %v1280_v0 = vpop.f32.mrb[92].mxu1  ;;  %v275_v57 = vld [vmem:[%s5021_s0 + $0x340] sm:$0xff] }
 0x1be   : > { %v1879_v2 = vmin.f32 %v1654_v61, 2.998999  ;;  %v1992_v3 = vmin.f32 %v1767_v62, 2.998999  ;;  %v716_v4 = vadd.f32 %v4362_v39, %v715_v63  ;;  %v2764_v5 = vpop.f32.mrb[93].mxu0  ;;  %2922 = vmatmul.mubr.f32.gmra.mrb[198].mxu0 %v270_v59  ;;  %v1281_v7 = vadd.f32 %v4362_v39, %v1280_v0  ;;  %v3103_v8 = vpop.f32.mrb[93].mxu1  ;;  %3261 = vmatmul.mubr.f32.gmra.mrb[198].mxu1 %v383_v60 }
 0x1bf   : > { %2924 = vmatprep.mubr.msk.f32.mxu0 %vm3363_vm0, %v3364_v1  ;;  %3263 = vmatprep.mubr.msk.f32.mxu1 %vm3363_vm0, %v3364_v1  ;;  %v389_v8 = vld [vmem:[%s5021_s0 + $0x6d0] sm:$0xff] }
 0x1c0   : > { %2104 = vst [vmem:[%s3978_s17 + $0x168] sm:$0xff] %v1879_v2  ;;  %2217 = vst [vmem:[%s3978_s17 + $0x4f0] sm:$0xff] %v1992_v3  ;;  %v1655_v11 = vmax.f32 %v716_v4, 2.701001  ;;  %v1768_v12 = vmax.f32 %v1281_v7, 2.701001 }
 0x1c1   : > { %v720_v13 = vpop.f32.mrb[94].mxu0  ;;  %v1285_v14 = vpop.f32.mrb[94].mxu1  ;;  %v276_v7 = vld [vmem:[%s5021_s0 + $0x348] sm:$0xff] }
 0x1c2   : > { %v1880_v15 = vmin.f32 %v1655_v11, 2.998999  ;;  %v1993_v16 = vmin.f32 %v1768_v12, 2.998999  ;;  %v721_v17 = vadd.f32 %v4362_v39, %v720_v13  ;;  %v2767_v18 = vpop.f32.mrb[95].mxu0  ;;  %2925 = vmatmul.mubr.f32.gmra.mrb[200].mxu0 %v271_v9  ;;  %v1286_v19 = vadd.f32 %v4362_v39, %v1285_v14  ;;  %v3106_v20 = vpop.f32.mrb[95].mxu1  ;;  %3264 = vmatmul.mubr.f32.gmra.mrb[200].mxu1 %v384_v10 }
 0x1c3   : > { %2927 = vmatprep.mubr.msk.f32.mxu0 %vm3363_vm0, %v3364_v1  ;;  %3266 = vmatprep.mubr.msk.f32.mxu1 %vm3363_vm0, %v3364_v1  ;;  %v390_v20 = vld [vmem:[%s5021_s0 + $0x6d8] sm:$0xff] }
 0x1c4   : > { %2105 = vst [vmem:[%s3978_s17 + $0x170] sm:$0xff] %v1880_v15  ;;  %2218 = vst [vmem:[%s3978_s17 + $0x4f8] sm:$0xff] %v1993_v16  ;;  %v1656_v23 = vmax.f32 %v721_v17, 2.701001  ;;  %v1769_v24 = vmax.f32 %v1286_v19, 2.701001 }
 0x1c5   : > { %v725_v25 = vpop.f32.mrb[96].mxu0  ;;  %v1290_v26 = vpop.f32.mrb[96].mxu1  ;;  %v277_v19 = vld [vmem:[%s5021_s0 + $0x350] sm:$0xff] }
 0x1c6   : > { %v1881_v27 = vmin.f32 %v1656_v23, 2.998999  ;;  %v1994_v28 = vmin.f32 %v1769_v24, 2.998999  ;;  %v726_v29 = vadd.f32 %v4362_v39, %v725_v25  ;;  %v2770_v30 = vpop.f32.mrb[97].mxu0  ;;  %2928 = vmatmul.mubr.f32.gmra.mrb[202].mxu0 %v272_v21  ;;  %v1291_v31 = vadd.f32 %v4362_v39, %v1290_v26  ;;  %v3109_v32 = vpop.f32.mrb[97].mxu1  ;;  %3267 = vmatmul.mubr.f32.gmra.mrb[202].mxu1 %v385_v22 }
 0x1c7   : > { %2930 = vmatprep.mubr.msk.f32.mxu0 %vm3363_vm0, %v3364_v1  ;;  %3269 = vmatprep.mubr.msk.f32.mxu1 %vm3363_vm0, %v3364_v1  ;;  %v391_v32 = vld [vmem:[%s5021_s0 + $0x6e0] sm:$0xff] }
 0x1c8   : > { %2106 = vst [vmem:[%s3978_s17 + $0x178] sm:$0xff] %v1881_v27  ;;  %2219 = vst [vmem:[%s3978_s17 + $0x500] sm:$0xff] %v1994_v28  ;;  %v1657_v35 = vmax.f32 %v726_v29, 2.701001  ;;  %v1770_v36 = vmax.f32 %v1291_v31, 2.701001 }
 0x1c9   : > { %v730_v37 = vpop.f32.mrb[98].mxu0  ;;  %v1295_v38 = vpop.f32.mrb[98].mxu1  ;;  %v278_v31 = vld [vmem:[%s5021_s0 + $0x358] sm:$0xff] }
 0x1ca   : > { %v1882_v40 = vmin.f32 %v1657_v35, 2.998999  ;;  %v1995_v41 = vmin.f32 %v1770_v36, 2.998999  ;;  %v731_v42 = vadd.f32 %v4362_v39, %v730_v37  ;;  %v2773_v6 = vpop.f32.mrb[99].mxu0  ;;  %2931 = vmatmul.mubr.f32.gmra.mrb[204].mxu0 %v273_v33  ;;  %v1296_v43 = vadd.f32 %v4362_v39, %v1295_v38  ;;  %v3112_v44 = vpop.f32.mrb[99].mxu1  ;;  %3270 = vmatmul.mubr.f32.gmra.mrb[204].mxu1 %v386_v34 }
 0x1cb   : > { %2933 = vmatprep.mubr.msk.f32.mxu0 %vm3363_vm0, %v3364_v1  ;;  %3272 = vmatprep.mubr.msk.f32.mxu1 %vm3363_vm0, %v3364_v1  ;;  %v392_v44 = vld [vmem:[%s5021_s0 + $0x6e8] sm:$0xff] }
 0x1cc   : > { %2107 = vst [vmem:[%s3978_s17 + $0x180] sm:$0xff] %v1882_v40  ;;  %2220 = vst [vmem:[%s3978_s17 + $0x508] sm:$0xff] %v1995_v41  ;;  %v1658_v47 = vmax.f32 %v731_v42, 2.701001  ;;  %v1771_v48 = vmax.f32 %v1296_v43, 2.701001 }
 0x1cd   : > { %v735_v49 = vpop.f32.mrb[100].mxu0  ;;  %v1300_v50 = vpop.f32.mrb[100].mxu1  ;;  %v279_v43 = vld [vmem:[%s5021_s0 + $0x360] sm:$0xff] }
 0x1ce   : > { %v1883_v51 = vmin.f32 %v1658_v47, 2.998999  ;;  %v1996_v52 = vmin.f32 %v1771_v48, 2.998999  ;;  %v736_v53 = vadd.f32 %v4362_v39, %v735_v49  ;;  %v2776_v54 = vpop.f32.mrb[101].mxu0  ;;  %2934 = vmatmul.mubr.f32.gmra.mrb[206].mxu0 %v274_v45  ;;  %v1301_v55 = vadd.f32 %v4362_v39, %v1300_v50  ;;  %v3115_v56 = vpop.f32.mrb[101].mxu1  ;;  %3273 = vmatmul.mubr.f32.gmra.mrb[206].mxu1 %v387_v46 }
 0x1cf   : > { %2936 = vmatprep.mubr.msk.f32.mxu0 %vm3363_vm0, %v3364_v1  ;;  %3275 = vmatprep.mubr.msk.f32.mxu1 %vm3363_vm0, %v3364_v1  ;;  %v393_v56 = vld [vmem:[%s5021_s0 + $0x6f0] sm:$0xff] }
 0x1d0   : > { %2108 = vst [vmem:[%s3978_s17 + $0x188] sm:$0xff] %v1883_v51  ;;  %2221 = vst [vmem:[%s3978_s17 + $0x510] sm:$0xff] %v1996_v52  ;;  %v1659_v59 = vmax.f32 %v736_v53, 2.701001  ;;  %v1772_v60 = vmax.f32 %v1301_v55, 2.701001 }
 0x1d1   : > { %v740_v61 = vpop.f32.mrb[102].mxu0  ;;  %v1305_v62 = vpop.f32.mrb[102].mxu1  ;;  %v280_v55 = vld [vmem:[%s5021_s0 + $0x368] sm:$0xff] }
 0x1d2   : > { %v1884_v63 = vmin.f32 %v1659_v59, 2.998999  ;;  %v1997_v0 = vmin.f32 %v1772_v60, 2.998999  ;;  %v741_v2 = vadd.f32 %v4362_v39, %v740_v61  ;;  %v2779_v3 = vpop.f32.mrb[103].mxu0  ;;  %2937 = vmatmul.mubr.f32.gmra.mrb[208].mxu0 %v275_v57  ;;  %v1306_v4 = vadd.f32 %v4362_v39, %v1305_v62  ;;  %v3118_v5 = vpop.f32.mrb[103].mxu1  ;;  %3276 = vmatmul.mubr.f32.gmra.mrb[208].mxu1 %v388_v58 }
 0x1d3   : > { %2939 = vmatprep.mubr.msk.f32.mxu0 %vm3363_vm0, %v3364_v1  ;;  %3278 = vmatprep.mubr.msk.f32.mxu1 %vm3363_vm0, %v3364_v1  ;;  %v394_v5 = vld [vmem:[%s5021_s0 + $0x6f8] sm:$0xff] }
 0x1d4   : > { %2109 = vst [vmem:[%s3978_s17 + $0x190] sm:$0xff] %v1884_v63  ;;  %2222 = vst [vmem:[%s3978_s17 + $0x518] sm:$0xff] %v1997_v0  ;;  %v1660_v9 = vmax.f32 %v741_v2, 2.701001  ;;  %v1773_v10 = vmax.f32 %v1306_v4, 2.701001 }
 0x1d5   : > { %v745_v11 = vpop.f32.mrb[104].mxu0  ;;  %v1310_v12 = vpop.f32.mrb[104].mxu1  ;;  %v281_v4 = vld [vmem:[%s5021_s0 + $0x370] sm:$0xff] }
 0x1d6   : > { %v1885_v13 = vmin.f32 %v1660_v9, 2.998999  ;;  %v1998_v14 = vmin.f32 %v1773_v10, 2.998999  ;;  %v746_v15 = vadd.f32 %v4362_v39, %v745_v11  ;;  %v2782_v16 = vpop.f32.mrb[105].mxu0  ;;  %2940 = vmatmul.mubr.f32.gmra.mrb[210].mxu0 %v276_v7  ;;  %v1311_v17 = vadd.f32 %v4362_v39, %v1310_v12  ;;  %v3121_v18 = vpop.f32.mrb[105].mxu1  ;;  %3279 = vmatmul.mubr.f32.gmra.mrb[210].mxu1 %v389_v8 }
 0x1d7   : > { %2942 = vmatprep.mubr.msk.f32.mxu0 %vm3363_vm0, %v3364_v1  ;;  %3281 = vmatprep.mubr.msk.f32.mxu1 %vm3363_vm0, %v3364_v1  ;;  %v4772_v12 = vld [vmem:[%s5023_s2] ss:$0 sm:$0xff] }
 0x1d8   : > { %2110 = vst [vmem:[%s3978_s17 + $0x198] sm:$0xff] %v1885_v13  ;;  %2223 = vst [vmem:[%s3978_s17 + $0x520] sm:$0xff] %v1998_v14  ;;  %v1661_v21 = vmax.f32 %v746_v15, 2.701001  ;;  %v1774_v22 = vmax.f32 %v1311_v17, 2.701001 }
 0x1d9   : > { %v750_v23 = vpop.f32.mrb[106].mxu0  ;;  %v1315_v24 = vpop.f32.mrb[106].mxu1  ;;  %v282_v17 = vld [vmem:[%s5021_s0 + $0x378] sm:$0xff]  ;;  %v395_v18 = vld [vmem:[%s5021_s0 + $0x700] sm:$0xff] }
 0x1da   : > { %v1886_v25 = vmin.f32 %v1661_v21, 2.998999  ;;  %v1999_v26 = vmin.f32 %v1774_v22, 2.998999  ;;  %v751_v27 = vadd.f32 %v4362_v39, %v750_v23  ;;  %v2785_v28 = vpop.f32.mrb[107].mxu0  ;;  %2943 = vmatmul.mubr.f32.gmra.mrb[212].mxu0 %v277_v19  ;;  %v1316_v29 = vadd.f32 %v4362_v39, %v1315_v24  ;;  %v3124_v30 = vpop.f32.mrb[107].mxu1  ;;  %3282 = vmatmul.mubr.f32.gmra.mrb[212].mxu1 %v390_v20 }
 0x1db   : > { %2945 = vmatprep.mubr.msk.f32.mxu0 %vm3363_vm0, %v3364_v1  ;;  %3284 = vmatprep.mubr.msk.f32.mxu1 %vm3363_vm0, %v3364_v1 }
 0x1dc   : > { %2111 = vst [vmem:[%s3978_s17 + $0x1a0] sm:$0xff] %v1886_v25  ;;  %2224 = vst [vmem:[%s3978_s17 + $0x528] sm:$0xff] %v1999_v26  ;;  %v1662_v33 = vmax.f32 %v751_v27, 2.701001  ;;  %v1775_v34 = vmax.f32 %v1316_v29, 2.701001 }
 0x1dd   : > { %v755_v35 = vpop.f32.mrb[108].mxu0  ;;  %v1320_v36 = vpop.f32.mrb[108].mxu1  ;;  %v283_v29 = vld [vmem:[%s5021_s0 + $0x380] sm:$0xff] }
 0x1de   : > { %v1887_v37 = vmin.f32 %v1662_v33, 2.998999  ;;  %v2000_v38 = vmin.f32 %v1775_v34, 2.998999  ;;  %v756_v40 = vadd.f32 %v4362_v39, %v755_v35  ;;  %v2788_v41 = vpop.f32.mrb[109].mxu0  ;;  %2946 = vmatmul.mubr.f32.gmra.mrb[214].mxu0 %v278_v31  ;;  %v1321_v42 = vadd.f32 %v4362_v39, %v1320_v36  ;;  %v3127_v6 = vpop.f32.mrb[109].mxu1  ;;  %3285 = vmatmul.mubr.f32.gmra.mrb[214].mxu1 %v391_v32 }
 0x1df   : > { %2948 = vmatprep.mubr.msk.f32.mxu0 %vm3363_vm0, %v3364_v1  ;;  %3287 = vmatprep.mubr.msk.f32.mxu1 %vm3363_vm0, %v3364_v1 }
 0x1e0   : > { %2112 = vst [vmem:[%s3978_s17 + $0x1a8] sm:$0xff] %v1887_v37  ;;  %2225 = vst [vmem:[%s3978_s17 + $0x530] sm:$0xff] %v2000_v38  ;;  %v1663_v45 = vmax.f32 %v756_v40, 2.701001  ;;  %v1776_v46 = vmax.f32 %v1321_v42, 2.701001 }
 0x1e1   : > { %v760_v47 = vpop.f32.mrb[110].mxu0  ;;  %v1325_v48 = vpop.f32.mrb[110].mxu1 }
 0x1e2   : > { %v1888_v49 = vmin.f32 %v1663_v45, 2.998999  ;;  %v2001_v50 = vmin.f32 %v1776_v46, 2.998999  ;;  %v761_v51 = vadd.f32 %v4362_v39, %v760_v47  ;;  %v2791_v52 = vpop.f32.mrb[111].mxu0  ;;  %2949 = vmatmul.mubr.f32.gmra.mrb[216].mxu0 %v279_v43  ;;  %v1326_v53 = vadd.f32 %v4362_v39, %v1325_v48  ;;  %v3130_v54 = vpop.f32.mrb[111].mxu1  ;;  %3288 = vmatmul.mubr.f32.gmra.mrb[216].mxu1 %v392_v44 }
 0x1e3   : > { %2951 = vmatprep.mubr.msk.f32.mxu0 %vm3363_vm0, %v3364_v1  ;;  %3290 = vmatprep.mubr.msk.f32.mxu1 %vm3363_vm0, %v3364_v1 }
 0x1e4   : > { %2113 = vst [vmem:[%s3978_s17 + $0x1b0] sm:$0xff] %v1888_v49  ;;  %2226 = vst [vmem:[%s3978_s17 + $0x538] sm:$0xff] %v2001_v50  ;;  %v1664_v57 = vmax.f32 %v761_v51, 2.701001  ;;  %v1777_v58 = vmax.f32 %v1326_v53, 2.701001 }
 0x1e5   : > { %v765_v59 = vpop.f32.mrb[112].mxu0  ;;  %v1330_v60 = vpop.f32.mrb[112].mxu1 }
 0x1e6   : > { %v1889_v61 = vmin.f32 %v1664_v57, 2.998999  ;;  %v2002_v62 = vmin.f32 %v1777_v58, 2.998999  ;;  %v766_v63 = vadd.f32 %v4362_v39, %v765_v59  ;;  %v2794_v0 = vpop.f32.mrb[113].mxu0  ;;  %2952 = vmatmul.mubr.f32.gmra.mrb[218].mxu0 %v280_v55  ;;  %v1331_v2 = vadd.f32 %v4362_v39, %v1330_v60  ;;  %v3133_v3 = vpop.f32.mrb[113].mxu1  ;;  %3291 = vmatmul.mubr.f32.gmra.mrb[218].mxu1 %v393_v56 }
 0x1e7   : > { %2954 = vmatprep.mubr.msk.f32.mxu0 %vm3363_vm0, %v3364_v1  ;;  %3293 = vmatprep.mubr.msk.f32.mxu1 %vm3363_vm0, %v3364_v1 }
 0x1e8   : > { %2114 = vst [vmem:[%s3978_s17 + $0x1b8] sm:$0xff] %v1889_v61  ;;  %2227 = vst [vmem:[%s3978_s17 + $0x540] sm:$0xff] %v2002_v62  ;;  %v1665_v7 = vmax.f32 %v766_v63, 2.701001  ;;  %v1778_v39 = vmax.f32 %v1331_v2, 2.701001 }
 0x1e9   : > { %v770_v8 = vpop.f32.mrb[114].mxu0  ;;  %v1335_v9 = vpop.f32.mrb[114].mxu1 }
 0x1ea   : > { %v1890_v10 = vmin.f32 %v1665_v7, 2.998999  ;;  %v2003_v11 = vmin.f32 %v1778_v39, 2.998999  ;;  %v771_v13 = vadd.f32 %v4772_v12, %v770_v8  ;;  %v2797_v14 = vpop.f32.mrb[115].mxu0  ;;  %2955 = vmatmul.mubr.f32.gmra.mrb[220].mxu0 %v281_v4  ;;  %v1336_v15 = vadd.f32 %v4772_v12, %v1335_v9  ;;  %v3136_v16 = vpop.f32.mrb[115].mxu1  ;;  %3294 = vmatmul.mubr.f32.gmra.mrb[220].mxu1 %v394_v5 }
 0x1eb   : > { %2957 = vmatprep.mubr.msk.f32.mxu0 %vm3363_vm0, %v3364_v1  ;;  %3296 = vmatprep.mubr.msk.f32.mxu1 %vm3363_vm0, %v3364_v1 }
 0x1ec   : > { %2115 = vst [vmem:[%s3978_s17 + $0x1c0] sm:$0xff] %v1890_v10  ;;  %2228 = vst [vmem:[%s3978_s17 + $0x548] sm:$0xff] %v2003_v11  ;;  %v1666_v19 = vmax.f32 %v771_v13, 2.701001  ;;  %v1779_v20 = vmax.f32 %v1336_v15, 2.701001 }
 0x1ed   : > { %v775_v21 = vpop.f32.mrb[116].mxu0  ;;  %v1340_v22 = vpop.f32.mrb[116].mxu1 }
 0x1ee   : > { %v1891_v23 = vmin.f32 %v1666_v19, 2.998999  ;;  %v2004_v24 = vmin.f32 %v1779_v20, 2.998999  ;;  %v776_v25 = vadd.f32 %v4772_v12, %v775_v21  ;;  %v2800_v26 = vpop.f32.mrb[117].mxu0  ;;  %2958 = vmatmul.mubr.f32.gmra.mrb[222].mxu0 %v282_v17  ;;  %v1341_v27 = vadd.f32 %v4772_v12, %v1340_v22  ;;  %v3139_v28 = vpop.f32.mrb[117].mxu1  ;;  %3297 = vmatmul.mubr.f32.gmra.mrb[222].mxu1 %v395_v18 }
 0x1ef   : > { %2960 = vmatprep.mubr.msk.f32.mxu0 %vm3363_vm0, %v3364_v1 }
 0x1f0   : > { %2116 = vst [vmem:[%s3978_s17 + $0x1c8] sm:$0xff] %v1891_v23  ;;  %2229 = vst [vmem:[%s3978_s17 + $0x550] sm:$0xff] %v2004_v24  ;;  %v1667_v30 = vmax.f32 %v776_v25, 2.701001  ;;  %v1780_v31 = vmax.f32 %v1341_v27, 2.701001 }
 0x1f1   : > { %v780_v32 = vpop.f32.mrb[118].mxu0  ;;  %v1345_v33 = vpop.f32.mrb[118].mxu1 }
 0x1f2   : > { %v1892_v34 = vmin.f32 %v1667_v30, 2.998999  ;;  %v2005_v35 = vmin.f32 %v1780_v31, 2.998999  ;;  %v781_v36 = vadd.f32 %v4772_v12, %v780_v32  ;;  %v2803_v37 = vpop.f32.mrb[119].mxu0  ;;  %2961 = vmatmul.mubr.f32.gmra.mrb[224].mxu0 %v283_v29  ;;  %v1346_v1 = vadd.f32 %v4772_v12, %v1345_v33  ;;  %v3142_v38 = vpop.f32.mrb[119].mxu1 }
 0x1f4   : > { %2117 = vst [vmem:[%s3978_s17 + $0x1d0] sm:$0xff] %v1892_v34  ;;  %2230 = vst [vmem:[%s3978_s17 + $0x558] sm:$0xff] %v2005_v35  ;;  %v1668_v40 = vmax.f32 %v781_v36, 2.701001  ;;  %v1781_v41 = vmax.f32 %v1346_v1, 2.701001 }
 0x1f5   : > { %v785_v42 = vpop.f32.mrb[120].mxu0  ;;  %v1350_v6 = vpop.f32.mrb[120].mxu1 }
 0x1f6   : > { %v1893_v43 = vmin.f32 %v1668_v40, 2.998999  ;;  %v2006_v44 = vmin.f32 %v1781_v41, 2.998999  ;;  %v786_v45 = vadd.f32 %v4772_v12, %v785_v42  ;;  %v2806_v46 = vpop.f32.mrb[121].mxu0  ;;  %v1351_v47 = vadd.f32 %v4772_v12, %v1350_v6  ;;  %v3145_v48 = vpop.f32.mrb[121].mxu1 }
 0x1f8   : > { %2118 = vst [vmem:[%s3978_s17 + $0x1d8] sm:$0xff] %v1893_v43  ;;  %2231 = vst [vmem:[%s3978_s17 + $0x560] sm:$0xff] %v2006_v44  ;;  %v1669_v49 = vmax.f32 %v786_v45, 2.701001  ;;  %v1782_v50 = vmax.f32 %v1351_v47, 2.701001 }
 0x1f9   : > { %v790_v51 = vpop.f32.mrb[122].mxu0  ;;  %v1355_v52 = vpop.f32.mrb[122].mxu1 }
 0x1fa   : > { %v1894_v53 = vmin.f32 %v1669_v49, 2.998999  ;;  %v2007_v54 = vmin.f32 %v1782_v50, 2.998999  ;;  %v791_v55 = vadd.f32 %v4772_v12, %v790_v51  ;;  %v2809_v56 = vpop.f32.mrb[123].mxu0  ;;  %v1356_v57 = vadd.f32 %v4772_v12, %v1355_v52  ;;  %v3148_v58 = vpop.f32.mrb[123].mxu1 }
 0x1fc   : > { %2119 = vst [vmem:[%s3978_s17 + $0x1e0] sm:$0xff] %v1894_v53  ;;  %2232 = vst [vmem:[%s3978_s17 + $0x568] sm:$0xff] %v2007_v54  ;;  %v1670_v59 = vmax.f32 %v791_v55, 2.701001  ;;  %v1783_v60 = vmax.f32 %v1356_v57, 2.701001 }
 0x1fd   : > { %v795_v61 = vpop.f32.mrb[124].mxu0  ;;  %v1360_v62 = vpop.f32.mrb[124].mxu1 }
 0x1fe   : > { %v1895_v63 = vmin.f32 %v1670_v59, 2.998999  ;;  %v2008_v0 = vmin.f32 %v1783_v60, 2.998999  ;;  %v796_v2 = vadd.f32 %v4772_v12, %v795_v61  ;;  %v2812_v3 = vpop.f32.mrb[125].mxu0  ;;  %v1361_v4 = vadd.f32 %v4772_v12, %v1360_v62  ;;  %v3151_v5 = vpop.f32.mrb[125].mxu1 }
 0x200   : > { %2120 = vst [vmem:[%s3978_s17 + $0x1e8] sm:$0xff] %v1895_v63  ;;  %2233 = vst [vmem:[%s3978_s17 + $0x570] sm:$0xff] %v2008_v0  ;;  %v1671_v7 = vmax.f32 %v796_v2, 2.701001  ;;  %v1784_v39 = vmax.f32 %v1361_v4, 2.701001 }
 0x201   : > { %v800_v8 = vpop.f32.mrb[126].mxu0  ;;  %v1365_v9 = vpop.f32.mrb[126].mxu1 }
 0x202   : > { %v1896_v10 = vmin.f32 %v1671_v7, 2.998999  ;;  %v2009_v11 = vmin.f32 %v1784_v39, 2.998999  ;;  %v801_v13 = vadd.f32 %v4772_v12, %v800_v8  ;;  %v2815_v14 = vpop.f32.mrb[127].mxu0  ;;  %v1366_v15 = vadd.f32 %v4772_v12, %v1365_v9  ;;  %v3154_v16 = vpop.f32.mrb[127].mxu1 }
 0x204   : > { %2121 = vst [vmem:[%s3978_s17 + $0x1f0] sm:$0xff] %v1896_v10  ;;  %2234 = vst [vmem:[%s3978_s17 + $0x578] sm:$0xff] %v2009_v11  ;;  %v1672_v17 = vmax.f32 %v801_v13, 2.701001  ;;  %v1785_v18 = vmax.f32 %v1366_v15, 2.701001 }
 0x205   : > { %v805_v19 = vpop.f32.mrb[128].mxu0  ;;  %v1370_v20 = vpop.f32.mrb[128].mxu1 }
 0x206   : > { %v1897_v21 = vmin.f32 %v1672_v17, 2.998999  ;;  %v2010_v22 = vmin.f32 %v1785_v18, 2.998999  ;;  %v806_v23 = vadd.f32 %v4772_v12, %v805_v19  ;;  %v2818_v24 = vpop.f32.mrb[129].mxu0  ;;  %v1371_v25 = vadd.f32 %v4772_v12, %v1370_v20  ;;  %v3157_v26 = vpop.f32.mrb[129].mxu1 }
 0x208   : > { %2122 = vst [vmem:[%s3978_s17 + $0x1f8] sm:$0xff] %v1897_v21  ;;  %2235 = vst [vmem:[%s3978_s17 + $0x580] sm:$0xff] %v2010_v22  ;;  %v1673_v27 = vmax.f32 %v806_v23, 2.701001  ;;  %v1786_v28 = vmax.f32 %v1371_v25, 2.701001 }
 0x209   : > { %v810_v29 = vpop.f32.mrb[130].mxu0  ;;  %v1375_v30 = vpop.f32.mrb[130].mxu1 }
 0x20a   : > { %v1898_v31 = vmin.f32 %v1673_v27, 2.998999  ;;  %v2011_v32 = vmin.f32 %v1786_v28, 2.998999  ;;  %v811_v33 = vadd.f32 %v4772_v12, %v810_v29  ;;  %v2821_v34 = vpop.f32.mrb[131].mxu0  ;;  %v1376_v35 = vadd.f32 %v4772_v12, %v1375_v30  ;;  %v3160_v36 = vpop.f32.mrb[131].mxu1 }
 0x20c   : > { %2123 = vst [vmem:[%s3978_s17 + $0x200] sm:$0xff] %v1898_v31  ;;  %2236 = vst [vmem:[%s3978_s17 + $0x588] sm:$0xff] %v2011_v32  ;;  %v1674_v37 = vmax.f32 %v811_v33, 2.701001  ;;  %v1787_v1 = vmax.f32 %v1376_v35, 2.701001 }
 0x20d   : > { %v815_v38 = vpop.f32.mrb[132].mxu0  ;;  %v1380_v40 = vpop.f32.mrb[132].mxu1 }
 0x20e   : > { %v1899_v41 = vmin.f32 %v1674_v37, 2.998999  ;;  %v2012_v42 = vmin.f32 %v1787_v1, 2.998999  ;;  %v816_v6 = vadd.f32 %v4772_v12, %v815_v38  ;;  %v2824_v43 = vpop.f32.mrb[133].mxu0  ;;  %v1381_v44 = vadd.f32 %v4772_v12, %v1380_v40  ;;  %v3163_v45 = vpop.f32.mrb[133].mxu1 }
 0x210   : > { %2124 = vst [vmem:[%s3978_s17 + $0x208] sm:$0xff] %v1899_v41  ;;  %2237 = vst [vmem:[%s3978_s17 + $0x590] sm:$0xff] %v2012_v42  ;;  %v1675_v46 = vmax.f32 %v816_v6, 2.701001  ;;  %v1788_v47 = vmax.f32 %v1381_v44, 2.701001 }
 0x211   : > { %v820_v48 = vpop.f32.mrb[134].mxu0  ;;  %v1385_v49 = vpop.f32.mrb[134].mxu1 }
 0x212   : > { %v1900_v50 = vmin.f32 %v1675_v46, 2.998999  ;;  %v2013_v51 = vmin.f32 %v1788_v47, 2.998999  ;;  %v821_v52 = vadd.f32 %v4772_v12, %v820_v48  ;;  %v2827_v53 = vpop.f32.mrb[135].mxu0  ;;  %v1386_v54 = vadd.f32 %v4772_v12, %v1385_v49  ;;  %v3166_v55 = vpop.f32.mrb[135].mxu1 }
 0x214   : > { %2125 = vst [vmem:[%s3978_s17 + $0x210] sm:$0xff] %v1900_v50  ;;  %2238 = vst [vmem:[%s3978_s17 + $0x598] sm:$0xff] %v2013_v51  ;;  %v1676_v56 = vmax.f32 %v821_v52, 2.701001  ;;  %v1789_v57 = vmax.f32 %v1386_v54, 2.701001 }
 0x215   : > { %v825_v58 = vpop.f32.mrb[136].mxu0  ;;  %v1390_v59 = vpop.f32.mrb[136].mxu1 }
 0x216   : > { %v1901_v60 = vmin.f32 %v1676_v56, 2.998999  ;;  %v2014_v61 = vmin.f32 %v1789_v57, 2.998999  ;;  %v826_v62 = vadd.f32 %v4772_v12, %v825_v58  ;;  %v2830_v63 = vpop.f32.mrb[137].mxu0  ;;  %v1391_v0 = vadd.f32 %v4772_v12, %v1390_v59  ;;  %v3169_v2 = vpop.f32.mrb[137].mxu1 }
 0x218   : > { %2126 = vst [vmem:[%s3978_s17 + $0x218] sm:$0xff] %v1901_v60  ;;  %2239 = vst [vmem:[%s3978_s17 + $0x5a0] sm:$0xff] %v2014_v61  ;;  %v1677_v3 = vmax.f32 %v826_v62, 2.701001  ;;  %v1790_v4 = vmax.f32 %v1391_v0, 2.701001 }
 0x219   : > { %v830_v5 = vpop.f32.mrb[138].mxu0  ;;  %v1395_v7 = vpop.f32.mrb[138].mxu1 }
 0x21a   : > { %v1902_v39 = vmin.f32 %v1677_v3, 2.998999  ;;  %v2015_v8 = vmin.f32 %v1790_v4, 2.998999  ;;  %v831_v9 = vadd.f32 %v4772_v12, %v830_v5  ;;  %v2833_v10 = vpop.f32.mrb[139].mxu0  ;;  %v1396_v11 = vadd.f32 %v4772_v12, %v1395_v7  ;;  %v3172_v13 = vpop.f32.mrb[139].mxu1 }
 0x21c   : > { %2127 = vst [vmem:[%s3978_s17 + $0x220] sm:$0xff] %v1902_v39  ;;  %2240 = vst [vmem:[%s3978_s17 + $0x5a8] sm:$0xff] %v2015_v8  ;;  %v1678_v14 = vmax.f32 %v831_v9, 2.701001  ;;  %v1791_v15 = vmax.f32 %v1396_v11, 2.701001 }
 0x21d   : > { %v835_v16 = vpop.f32.mrb[140].mxu0  ;;  %v1400_v17 = vpop.f32.mrb[140].mxu1 }
 0x21e   : > { %v1903_v18 = vmin.f32 %v1678_v14, 2.998999  ;;  %v2016_v19 = vmin.f32 %v1791_v15, 2.998999  ;;  %v836_v20 = vadd.f32 %v4772_v12, %v835_v16  ;;  %v2836_v21 = vpop.f32.mrb[141].mxu0  ;;  %v1401_v22 = vadd.f32 %v4772_v12, %v1400_v17  ;;  %v3175_v23 = vpop.f32.mrb[141].mxu1 }
 0x220   : > { %2128 = vst [vmem:[%s3978_s17 + $0x228] sm:$0xff] %v1903_v18  ;;  %2241 = vst [vmem:[%s3978_s17 + $0x5b0] sm:$0xff] %v2016_v19  ;;  %v1679_v24 = vmax.f32 %v836_v20, 2.701001  ;;  %v1792_v25 = vmax.f32 %v1401_v22, 2.701001 }
 0x221   : > { %v840_v26 = vpop.f32.mrb[142].mxu0  ;;  %v1405_v27 = vpop.f32.mrb[142].mxu1 }
 0x222   : > { %v1904_v28 = vmin.f32 %v1679_v24, 2.998999  ;;  %v2017_v29 = vmin.f32 %v1792_v25, 2.998999  ;;  %v841_v30 = vadd.f32 %v4772_v12, %v840_v26  ;;  %v2839_v31 = vpop.f32.mrb[143].mxu0  ;;  %v1406_v32 = vadd.f32 %v4772_v12, %v1405_v27  ;;  %v3178_v33 = vpop.f32.mrb[143].mxu1 }
 0x224   : > { %2129 = vst [vmem:[%s3978_s17 + $0x230] sm:$0xff] %v1904_v28  ;;  %2242 = vst [vmem:[%s3978_s17 + $0x5b8] sm:$0xff] %v2017_v29  ;;  %v1680_v34 = vmax.f32 %v841_v30, 2.701001  ;;  %v1793_v35 = vmax.f32 %v1406_v32, 2.701001 }
 0x225   : > { %v845_v36 = vpop.f32.mrb[144].mxu0  ;;  %v1410_v37 = vpop.f32.mrb[144].mxu1 }
 0x226   : > { %v1905_v1 = vmin.f32 %v1680_v34, 2.998999  ;;  %v2018_v38 = vmin.f32 %v1793_v35, 2.998999  ;;  %v846_v40 = vadd.f32 %v4772_v12, %v845_v36  ;;  %v2842_v41 = vpop.f32.mrb[145].mxu0  ;;  %v1411_v42 = vadd.f32 %v4772_v12, %v1410_v37  ;;  %v3181_v6 = vpop.f32.mrb[145].mxu1 }
 0x228   : > { %2130 = vst [vmem:[%s3978_s17 + $0x238] sm:$0xff] %v1905_v1  ;;  %2243 = vst [vmem:[%s3978_s17 + $0x5c0] sm:$0xff] %v2018_v38  ;;  %v1681_v43 = vmax.f32 %v846_v40, 2.701001  ;;  %v1794_v44 = vmax.f32 %v1411_v42, 2.701001 }
 0x229   : > { %v850_v45 = vpop.f32.mrb[146].mxu0  ;;  %v1415_v46 = vpop.f32.mrb[146].mxu1 }
 0x22a   : > { %v1906_v47 = vmin.f32 %v1681_v43, 2.998999  ;;  %v2019_v48 = vmin.f32 %v1794_v44, 2.998999  ;;  %v851_v49 = vadd.f32 %v4772_v12, %v850_v45  ;;  %v2845_v50 = vpop.f32.mrb[147].mxu0  ;;  %v1416_v51 = vadd.f32 %v4772_v12, %v1415_v46  ;;  %v3184_v52 = vpop.f32.mrb[147].mxu1 }
 0x22c   : > { %2131 = vst [vmem:[%s3978_s17 + $0x240] sm:$0xff] %v1906_v47  ;;  %2244 = vst [vmem:[%s3978_s17 + $0x5c8] sm:$0xff] %v2019_v48  ;;  %v1682_v53 = vmax.f32 %v851_v49, 2.701001  ;;  %v1795_v54 = vmax.f32 %v1416_v51, 2.701001 }
 0x22d   : > { %v855_v55 = vpop.f32.mrb[148].mxu0  ;;  %v1420_v56 = vpop.f32.mrb[148].mxu1 }
 0x22e   : > { %v1907_v57 = vmin.f32 %v1682_v53, 2.998999  ;;  %v2020_v58 = vmin.f32 %v1795_v54, 2.998999  ;;  %v856_v59 = vadd.f32 %v4772_v12, %v855_v55  ;;  %v2848_v60 = vpop.f32.mrb[149].mxu0  ;;  %v1421_v61 = vadd.f32 %v4772_v12, %v1420_v56  ;;  %v3187_v62 = vpop.f32.mrb[149].mxu1 }
 0x230   : > { %2132 = vst [vmem:[%s3978_s17 + $0x248] sm:$0xff] %v1907_v57  ;;  %2245 = vst [vmem:[%s3978_s17 + $0x5d0] sm:$0xff] %v2020_v58  ;;  %v1683_v63 = vmax.f32 %v856_v59, 2.701001  ;;  %v1796_v0 = vmax.f32 %v1421_v61, 2.701001 }
 0x231   : > { %v860_v2 = vpop.f32.mrb[150].mxu0  ;;  %v1425_v3 = vpop.f32.mrb[150].mxu1 }
 0x232   : > { %v1908_v4 = vmin.f32 %v1683_v63, 2.998999  ;;  %v2021_v5 = vmin.f32 %v1796_v0, 2.998999  ;;  %v861_v7 = vadd.f32 %v4772_v12, %v860_v2  ;;  %v2851_v39 = vpop.f32.mrb[151].mxu0  ;;  %v1426_v8 = vadd.f32 %v4772_v12, %v1425_v3  ;;  %v3190_v9 = vpop.f32.mrb[151].mxu1 }
 0x234   : > { %2133 = vst [vmem:[%s3978_s17 + $0x250] sm:$0xff] %v1908_v4  ;;  %2246 = vst [vmem:[%s3978_s17 + $0x5d8] sm:$0xff] %v2021_v5  ;;  %v1684_v10 = vmax.f32 %v861_v7, 2.701001  ;;  %v1797_v11 = vmax.f32 %v1426_v8, 2.701001 }
 0x235   : > { %v865_v13 = vpop.f32.mrb[152].mxu0  ;;  %v1430_v14 = vpop.f32.mrb[152].mxu1 }
 0x236   : > { %v1909_v15 = vmin.f32 %v1684_v10, 2.998999  ;;  %v2022_v16 = vmin.f32 %v1797_v11, 2.998999  ;;  %v866_v17 = vadd.f32 %v4772_v12, %v865_v13  ;;  %v2854_v18 = vpop.f32.mrb[153].mxu0  ;;  %v1431_v19 = vadd.f32 %v4772_v12, %v1430_v14  ;;  %v3193_v20 = vpop.f32.mrb[153].mxu1 }
 0x238   : > { %2134 = vst [vmem:[%s3978_s17 + $0x258] sm:$0xff] %v1909_v15  ;;  %2247 = vst [vmem:[%s3978_s17 + $0x5e0] sm:$0xff] %v2022_v16  ;;  %v1685_v21 = vmax.f32 %v866_v17, 2.701001  ;;  %v1798_v22 = vmax.f32 %v1431_v19, 2.701001 }
 0x239   : > { %v870_v23 = vpop.f32.mrb[154].mxu0  ;;  %v1435_v24 = vpop.f32.mrb[154].mxu1 }
 0x23a   : > { %v1910_v25 = vmin.f32 %v1685_v21, 2.998999  ;;  %v2023_v26 = vmin.f32 %v1798_v22, 2.998999  ;;  %v871_v27 = vadd.f32 %v4772_v12, %v870_v23  ;;  %v2857_v28 = vpop.f32.mrb[155].mxu0  ;;  %v1436_v29 = vadd.f32 %v4772_v12, %v1435_v24  ;;  %v3196_v30 = vpop.f32.mrb[155].mxu1 }
 0x23c   : > { %2135 = vst [vmem:[%s3978_s17 + $0x260] sm:$0xff] %v1910_v25  ;;  %2248 = vst [vmem:[%s3978_s17 + $0x5e8] sm:$0xff] %v2023_v26  ;;  %v1686_v31 = vmax.f32 %v871_v27, 2.701001  ;;  %v1799_v32 = vmax.f32 %v1436_v29, 2.701001 }
 0x23d   : > { %v875_v33 = vpop.f32.mrb[156].mxu0  ;;  %v1440_v34 = vpop.f32.mrb[156].mxu1 }
 0x23e   : > { %v1911_v35 = vmin.f32 %v1686_v31, 2.998999  ;;  %v2024_v36 = vmin.f32 %v1799_v32, 2.998999  ;;  %v876_v37 = vadd.f32 %v4772_v12, %v875_v33  ;;  %v2860_v1 = vpop.f32.mrb[157].mxu0  ;;  %v1441_v38 = vadd.f32 %v4772_v12, %v1440_v34  ;;  %v3199_v40 = vpop.f32.mrb[157].mxu1 }
 0x240   : > { %2136 = vst [vmem:[%s3978_s17 + $0x268] sm:$0xff] %v1911_v35  ;;  %2249 = vst [vmem:[%s3978_s17 + $0x5f0] sm:$0xff] %v2024_v36  ;;  %v1687_v41 = vmax.f32 %v876_v37, 2.701001  ;;  %v1800_v42 = vmax.f32 %v1441_v38, 2.701001 }
 0x241   : > { %v880_v6 = vpop.f32.mrb[158].mxu0  ;;  %v1445_v43 = vpop.f32.mrb[158].mxu1 }
 0x242   : > { %v1912_v44 = vmin.f32 %v1687_v41, 2.998999  ;;  %v2025_v45 = vmin.f32 %v1800_v42, 2.998999  ;;  %v881_v46 = vadd.f32 %v4772_v12, %v880_v6  ;;  %v2863_v47 = vpop.f32.mrb[159].mxu0  ;;  %v1446_v48 = vadd.f32 %v4772_v12, %v1445_v43  ;;  %v3202_v49 = vpop.f32.mrb[159].mxu1 }
 0x244   : > { %2137 = vst [vmem:[%s3978_s17 + $0x270] sm:$0xff] %v1912_v44  ;;  %2250 = vst [vmem:[%s3978_s17 + $0x5f8] sm:$0xff] %v2025_v45  ;;  %v1688_v50 = vmax.f32 %v881_v46, 2.701001  ;;  %v1801_v51 = vmax.f32 %v1446_v48, 2.701001 }
 0x245   : > { %v885_v52 = vpop.f32.mrb[160].mxu0  ;;  %v1450_v53 = vpop.f32.mrb[160].mxu1 }
 0x246   : > { %v1913_v54 = vmin.f32 %v1688_v50, 2.998999  ;;  %v2026_v55 = vmin.f32 %v1801_v51, 2.998999  ;;  %v886_v56 = vadd.f32 %v4772_v12, %v885_v52  ;;  %v2866_v57 = vpop.f32.mrb[161].mxu0  ;;  %v1451_v58 = vadd.f32 %v4772_v12, %v1450_v53  ;;  %v3205_v59 = vpop.f32.mrb[161].mxu1 }
 0x248   : > { %2138 = vst [vmem:[%s3978_s17 + $0x278] sm:$0xff] %v1913_v54  ;;  %2251 = vst [vmem:[%s3978_s17 + $0x600] sm:$0xff] %v2026_v55  ;;  %v1689_v60 = vmax.f32 %v886_v56, 2.701001  ;;  %v1802_v61 = vmax.f32 %v1451_v58, 2.701001 }
 0x249   : > { %v890_v62 = vpop.f32.mrb[162].mxu0  ;;  %v1455_v63 = vpop.f32.mrb[162].mxu1 }
 0x24a   : > { %v1914_v0 = vmin.f32 %v1689_v60, 2.998999  ;;  %v2027_v2 = vmin.f32 %v1802_v61, 2.998999  ;;  %v891_v3 = vadd.f32 %v4772_v12, %v890_v62  ;;  %v2869_v4 = vpop.f32.mrb[163].mxu0  ;;  %v1456_v5 = vadd.f32 %v4772_v12, %v1455_v63  ;;  %v3208_v7 = vpop.f32.mrb[163].mxu1 }
 0x24c   : > { %2139 = vst [vmem:[%s3978_s17 + $0x280] sm:$0xff] %v1914_v0  ;;  %2252 = vst [vmem:[%s3978_s17 + $0x608] sm:$0xff] %v2027_v2  ;;  %v1690_v39 = vmax.f32 %v891_v3, 2.701001  ;;  %v1803_v8 = vmax.f32 %v1456_v5, 2.701001 }
 0x24d   : > { %v895_v9 = vpop.f32.mrb[164].mxu0  ;;  %v1460_v10 = vpop.f32.mrb[164].mxu1 }
 0x24e   : > { %v1915_v11 = vmin.f32 %v1690_v39, 2.998999  ;;  %v2028_v13 = vmin.f32 %v1803_v8, 2.998999  ;;  %v896_v14 = vadd.f32 %v4772_v12, %v895_v9  ;;  %v2872_v15 = vpop.f32.mrb[165].mxu0  ;;  %v1461_v16 = vadd.f32 %v4772_v12, %v1460_v10  ;;  %v3211_v17 = vpop.f32.mrb[165].mxu1 }
 0x250   : > { %2140 = vst [vmem:[%s3978_s17 + $0x288] sm:$0xff] %v1915_v11  ;;  %2253 = vst [vmem:[%s3978_s17 + $0x610] sm:$0xff] %v2028_v13  ;;  %v1691_v18 = vmax.f32 %v896_v14, 2.701001  ;;  %v1804_v19 = vmax.f32 %v1461_v16, 2.701001 }
 0x251   : > { %v900_v20 = vpop.f32.mrb[166].mxu0  ;;  %v1465_v21 = vpop.f32.mrb[166].mxu1 }
 0x252   : > { %v1916_v22 = vmin.f32 %v1691_v18, 2.998999  ;;  %v2029_v23 = vmin.f32 %v1804_v19, 2.998999  ;;  %v901_v24 = vadd.f32 %v4772_v12, %v900_v20  ;;  %v2875_v25 = vpop.f32.mrb[167].mxu0  ;;  %v1466_v26 = vadd.f32 %v4772_v12, %v1465_v21  ;;  %v3214_v27 = vpop.f32.mrb[167].mxu1 }
 0x254   : > { %2141 = vst [vmem:[%s3978_s17 + $0x290] sm:$0xff] %v1916_v22  ;;  %2254 = vst [vmem:[%s3978_s17 + $0x618] sm:$0xff] %v2029_v23  ;;  %v1692_v28 = vmax.f32 %v901_v24, 2.701001  ;;  %v1805_v29 = vmax.f32 %v1466_v26, 2.701001 }
 0x255   : > { %v905_v30 = vpop.f32.mrb[168].mxu0  ;;  %v1470_v31 = vpop.f32.mrb[168].mxu1 }
 0x256   : > { %v1917_v32 = vmin.f32 %v1692_v28, 2.998999  ;;  %v2030_v33 = vmin.f32 %v1805_v29, 2.998999  ;;  %v906_v34 = vadd.f32 %v4772_v12, %v905_v30  ;;  %v2878_v35 = vpop.f32.mrb[169].mxu0  ;;  %v1471_v36 = vadd.f32 %v4772_v12, %v1470_v31  ;;  %v3217_v37 = vpop.f32.mrb[169].mxu1 }
 0x258   : > { %2142 = vst [vmem:[%s3978_s17 + $0x298] sm:$0xff] %v1917_v32  ;;  %2255 = vst [vmem:[%s3978_s17 + $0x620] sm:$0xff] %v2030_v33  ;;  %v1693_v1 = vmax.f32 %v906_v34, 2.701001  ;;  %v1806_v38 = vmax.f32 %v1471_v36, 2.701001 }
 0x259   : > { %v910_v40 = vpop.f32.mrb[170].mxu0  ;;  %v1475_v41 = vpop.f32.mrb[170].mxu1 }
 0x25a   : > { %v1918_v42 = vmin.f32 %v1693_v1, 2.998999  ;;  %v2031_v6 = vmin.f32 %v1806_v38, 2.998999  ;;  %v911_v43 = vadd.f32 %v4772_v12, %v910_v40  ;;  %v2881_v44 = vpop.f32.mrb[171].mxu0  ;;  %v1476_v45 = vadd.f32 %v4772_v12, %v1475_v41  ;;  %v3220_v46 = vpop.f32.mrb[171].mxu1 }
 0x25c   : > { %2143 = vst [vmem:[%s3978_s17 + $0x2a0] sm:$0xff] %v1918_v42  ;;  %2256 = vst [vmem:[%s3978_s17 + $0x628] sm:$0xff] %v2031_v6  ;;  %v1694_v47 = vmax.f32 %v911_v43, 2.701001  ;;  %v1807_v48 = vmax.f32 %v1476_v45, 2.701001 }
 0x25d   : > { %v915_v49 = vpop.f32.mrb[172].mxu0  ;;  %v1480_v50 = vpop.f32.mrb[172].mxu1 }
 0x25e   : > { %v1919_v51 = vmin.f32 %v1694_v47, 2.998999  ;;  %v2032_v52 = vmin.f32 %v1807_v48, 2.998999  ;;  %v916_v53 = vadd.f32 %v4772_v12, %v915_v49  ;;  %v2884_v54 = vpop.f32.mrb[173].mxu0  ;;  %v1481_v55 = vadd.f32 %v4772_v12, %v1480_v50  ;;  %v3223_v56 = vpop.f32.mrb[173].mxu1 }
 0x260   : > { %2144 = vst [vmem:[%s3978_s17 + $0x2a8] sm:$0xff] %v1919_v51  ;;  %2257 = vst [vmem:[%s3978_s17 + $0x630] sm:$0xff] %v2032_v52  ;;  %v1695_v57 = vmax.f32 %v916_v53, 2.701001  ;;  %v1808_v58 = vmax.f32 %v1481_v55, 2.701001 }
 0x261   : > { %v920_v59 = vpop.f32.mrb[174].mxu0  ;;  %v1485_v60 = vpop.f32.mrb[174].mxu1 }
 0x262   : > { %v1920_v61 = vmin.f32 %v1695_v57, 2.998999  ;;  %v2033_v62 = vmin.f32 %v1808_v58, 2.998999  ;;  %v921_v63 = vadd.f32 %v4772_v12, %v920_v59  ;;  %v2887_v0 = vpop.f32.mrb[175].mxu0  ;;  %v1486_v2 = vadd.f32 %v4772_v12, %v1485_v60  ;;  %v3226_v3 = vpop.f32.mrb[175].mxu1 }
 0x264   : > { %2145 = vst [vmem:[%s3978_s17 + $0x2b0] sm:$0xff] %v1920_v61  ;;  %2258 = vst [vmem:[%s3978_s17 + $0x638] sm:$0xff] %v2033_v62  ;;  %v1696_v4 = vmax.f32 %v921_v63, 2.701001  ;;  %v1809_v5 = vmax.f32 %v1486_v2, 2.701001 }
 0x265   : > { %v925_v7 = vpop.f32.mrb[176].mxu0  ;;  %v1490_v39 = vpop.f32.mrb[176].mxu1 }
 0x266   : > { %v1921_v8 = vmin.f32 %v1696_v4, 2.998999  ;;  %v2034_v9 = vmin.f32 %v1809_v5, 2.998999  ;;  %v926_v10 = vadd.f32 %v4772_v12, %v925_v7  ;;  %v2890_v11 = vpop.f32.mrb[177].mxu0  ;;  %v1491_v13 = vadd.f32 %v4772_v12, %v1490_v39  ;;  %v3229_v14 = vpop.f32.mrb[177].mxu1 }
 0x268   : > { %2146 = vst [vmem:[%s3978_s17 + $0x2b8] sm:$0xff] %v1921_v8  ;;  %2259 = vst [vmem:[%s3978_s17 + $0x640] sm:$0xff] %v2034_v9  ;;  %v1697_v15 = vmax.f32 %v926_v10, 2.701001  ;;  %v1810_v16 = vmax.f32 %v1491_v13, 2.701001 }
 0x269   : > { %v930_v17 = vpop.f32.mrb[178].mxu0  ;;  %v1495_v18 = vpop.f32.mrb[178].mxu1 }
 0x26a   : > { %v1922_v19 = vmin.f32 %v1697_v15, 2.998999  ;;  %v2035_v20 = vmin.f32 %v1810_v16, 2.998999  ;;  %v931_v21 = vadd.f32 %v4772_v12, %v930_v17  ;;  %v2893_v22 = vpop.f32.mrb[179].mxu0  ;;  %v1496_v23 = vadd.f32 %v4772_v12, %v1495_v18  ;;  %v3232_v24 = vpop.f32.mrb[179].mxu1 }
 0x26c   : > { %2147 = vst [vmem:[%s3978_s17 + $0x2c0] sm:$0xff] %v1922_v19  ;;  %2260 = vst [vmem:[%s3978_s17 + $0x648] sm:$0xff] %v2035_v20  ;;  %v1698_v25 = vmax.f32 %v931_v21, 2.701001  ;;  %v1811_v26 = vmax.f32 %v1496_v23, 2.701001 }
 0x26d   : > { %v935_v27 = vpop.f32.mrb[180].mxu0  ;;  %v1500_v28 = vpop.f32.mrb[180].mxu1 }
 0x26e   : > { %v1923_v29 = vmin.f32 %v1698_v25, 2.998999  ;;  %v2036_v30 = vmin.f32 %v1811_v26, 2.998999  ;;  %v936_v31 = vadd.f32 %v4772_v12, %v935_v27  ;;  %v2896_v32 = vpop.f32.mrb[181].mxu0  ;;  %v1501_v33 = vadd.f32 %v4772_v12, %v1500_v28  ;;  %v3235_v34 = vpop.f32.mrb[181].mxu1 }
 0x270   : > { %2148 = vst [vmem:[%s3978_s17 + $0x2c8] sm:$0xff] %v1923_v29  ;;  %2261 = vst [vmem:[%s3978_s17 + $0x650] sm:$0xff] %v2036_v30  ;;  %v1699_v35 = vmax.f32 %v936_v31, 2.701001  ;;  %v1812_v36 = vmax.f32 %v1501_v33, 2.701001 }
 0x271   : > { %v940_v37 = vpop.f32.mrb[182].mxu0  ;;  %v1505_v1 = vpop.f32.mrb[182].mxu1 }
 0x272   : > { %v1924_v38 = vmin.f32 %v1699_v35, 2.998999  ;;  %v2037_v40 = vmin.f32 %v1812_v36, 2.998999  ;;  %v941_v41 = vadd.f32 %v4772_v12, %v940_v37  ;;  %v2899_v42 = vpop.f32.mrb[183].mxu0  ;;  %v1506_v6 = vadd.f32 %v4772_v12, %v1505_v1  ;;  %v3238_v43 = vpop.f32.mrb[183].mxu1 }
 0x274   : > { %2149 = vst [vmem:[%s3978_s17 + $0x2d0] sm:$0xff] %v1924_v38  ;;  %2262 = vst [vmem:[%s3978_s17 + $0x658] sm:$0xff] %v2037_v40  ;;  %v1700_v44 = vmax.f32 %v941_v41, 2.701001  ;;  %v1813_v45 = vmax.f32 %v1506_v6, 2.701001 }
 0x275   : > { %v945_v46 = vpop.f32.mrb[184].mxu0  ;;  %v1510_v47 = vpop.f32.mrb[184].mxu1 }
 0x276   : > { %v1925_v48 = vmin.f32 %v1700_v44, 2.998999  ;;  %v2038_v49 = vmin.f32 %v1813_v45, 2.998999  ;;  %v946_v50 = vadd.f32 %v4772_v12, %v945_v46  ;;  %v2902_v51 = vpop.f32.mrb[185].mxu0  ;;  %v1511_v52 = vadd.f32 %v4772_v12, %v1510_v47  ;;  %v3241_v53 = vpop.f32.mrb[185].mxu1 }
 0x278   : > { %2150 = vst [vmem:[%s3978_s17 + $0x2d8] sm:$0xff] %v1925_v48  ;;  %2263 = vst [vmem:[%s3978_s17 + $0x660] sm:$0xff] %v2038_v49  ;;  %v1701_v54 = vmax.f32 %v946_v50, 2.701001  ;;  %v1814_v55 = vmax.f32 %v1511_v52, 2.701001 }
 0x279   : > { %v950_v56 = vpop.f32.mrb[186].mxu0  ;;  %v1515_v57 = vpop.f32.mrb[186].mxu1 }
 0x27a   : > { %v1926_v58 = vmin.f32 %v1701_v54, 2.998999  ;;  %v2039_v59 = vmin.f32 %v1814_v55, 2.998999  ;;  %v951_v60 = vadd.f32 %v4772_v12, %v950_v56  ;;  %v2905_v61 = vpop.f32.mrb[187].mxu0  ;;  %v1516_v62 = vadd.f32 %v4772_v12, %v1515_v57  ;;  %v3244_v63 = vpop.f32.mrb[187].mxu1 }
 0x27b   : > { %v4960_v57 = vld [vmem:[%s5023_s2] ss:$0 sm:$0xff] }
 0x27c   : > { %2151 = vst [vmem:[%s3978_s17 + $0x2e0] sm:$0xff] %v1926_v58  ;;  %2264 = vst [vmem:[%s3978_s17 + $0x668] sm:$0xff] %v2039_v59  ;;  %v1702_v0 = vmax.f32 %v951_v60, 2.701001  ;;  %v1815_v2 = vmax.f32 %v1516_v62, 2.701001 }
 0x27d   : > { %v955_v3 = vpop.f32.mrb[188].mxu0  ;;  %v1520_v4 = vpop.f32.mrb[188].mxu1 }
 0x27e   : > { %v1927_v5 = vmin.f32 %v1702_v0, 2.998999  ;;  %v2040_v7 = vmin.f32 %v1815_v2, 2.998999  ;;  %v956_v39 = vadd.f32 %v4772_v12, %v955_v3  ;;  %v2908_v8 = vpop.f32.mrb[189].mxu0  ;;  %v1521_v9 = vadd.f32 %v4772_v12, %v1520_v4  ;;  %v3247_v10 = vpop.f32.mrb[189].mxu1 }
 0x280   : > { %2152 = vst [vmem:[%s3978_s17 + $0x2e8] sm:$0xff] %v1927_v5  ;;  %2265 = vst [vmem:[%s3978_s17 + $0x670] sm:$0xff] %v2040_v7  ;;  %v1703_v11 = vmax.f32 %v956_v39, 2.701001  ;;  %v1816_v13 = vmax.f32 %v1521_v9, 2.701001 }
 0x281   : > { %v960_v14 = vpop.f32.mrb[190].mxu0  ;;  %v1525_v15 = vpop.f32.mrb[190].mxu1 }
 0x282   : > { %v1928_v16 = vmin.f32 %v1703_v11, 2.998999  ;;  %v2041_v17 = vmin.f32 %v1816_v13, 2.998999  ;;  %v961_v18 = vadd.f32 %v4772_v12, %v960_v14  ;;  %v2911_v19 = vpop.f32.mrb[191].mxu0  ;;  %v1526_v20 = vadd.f32 %v4772_v12, %v1525_v15  ;;  %v3250_v21 = vpop.f32.mrb[191].mxu1 }
 0x284   : > { %2153 = vst [vmem:[%s3978_s17 + $0x2f0] sm:$0xff] %v1928_v16  ;;  %2266 = vst [vmem:[%s3978_s17 + $0x678] sm:$0xff] %v2041_v17  ;;  %v1704_v22 = vmax.f32 %v961_v18, 2.701001  ;;  %v1817_v23 = vmax.f32 %v1526_v20, 2.701001 }
 0x285   : > { %v965_v24 = vpop.f32.mrb[192].mxu0  ;;  %v1530_v25 = vpop.f32.mrb[192].mxu1 }
 0x286   : > { %v1929_v26 = vmin.f32 %v1704_v22, 2.998999  ;;  %v2042_v27 = vmin.f32 %v1817_v23, 2.998999  ;;  %v966_v28 = vadd.f32 %v4772_v12, %v965_v24  ;;  %v2914_v29 = vpop.f32.mrb[193].mxu0  ;;  %v1531_v30 = vadd.f32 %v4772_v12, %v1530_v25  ;;  %v3253_v31 = vpop.f32.mrb[193].mxu1 }
 0x288   : > { %2154 = vst [vmem:[%s3978_s17 + $0x2f8] sm:$0xff] %v1929_v26  ;;  %2267 = vst [vmem:[%s3978_s17 + $0x680] sm:$0xff] %v2042_v27  ;;  %v1705_v32 = vmax.f32 %v966_v28, 2.701001  ;;  %v1818_v33 = vmax.f32 %v1531_v30, 2.701001 }
 0x289   : > { %v970_v34 = vpop.f32.mrb[194].mxu0  ;;  %v1535_v35 = vpop.f32.mrb[194].mxu1 }
 0x28a   : > { %v1930_v36 = vmin.f32 %v1705_v32, 2.998999  ;;  %v2043_v37 = vmin.f32 %v1818_v33, 2.998999  ;;  %v971_v1 = vadd.f32 %v4772_v12, %v970_v34  ;;  %v2917_v38 = vpop.f32.mrb[195].mxu0  ;;  %v1536_v40 = vadd.f32 %v4772_v12, %v1535_v35  ;;  %v3256_v41 = vpop.f32.mrb[195].mxu1 }
 0x28c   : > { %2155 = vst [vmem:[%s3978_s17 + $0x300] sm:$0xff] %v1930_v36  ;;  %2268 = vst [vmem:[%s3978_s17 + $0x688] sm:$0xff] %v2043_v37  ;;  %v1706_v42 = vmax.f32 %v971_v1, 2.701001  ;;  %v1819_v6 = vmax.f32 %v1536_v40, 2.701001 }
 0x28d   : > { %v975_v43 = vpop.f32.mrb[196].mxu0  ;;  %v1540_v44 = vpop.f32.mrb[196].mxu1 }
 0x28e   : > { %v1931_v45 = vmin.f32 %v1706_v42, 2.998999  ;;  %v2044_v46 = vmin.f32 %v1819_v6, 2.998999  ;;  %v976_v47 = vadd.f32 %v4772_v12, %v975_v43  ;;  %v2920_v48 = vpop.f32.mrb[197].mxu0  ;;  %v1541_v49 = vadd.f32 %v4772_v12, %v1540_v44  ;;  %v3259_v50 = vpop.f32.mrb[197].mxu1 }
 0x290   : > { %2156 = vst [vmem:[%s3978_s17 + $0x308] sm:$0xff] %v1931_v45  ;;  %2269 = vst [vmem:[%s3978_s17 + $0x690] sm:$0xff] %v2044_v46  ;;  %v1707_v51 = vmax.f32 %v976_v47, 2.701001  ;;  %v1820_v52 = vmax.f32 %v1541_v49, 2.701001 }
 0x291   : > { %v980_v53 = vpop.f32.mrb[198].mxu0  ;;  %v1545_v54 = vpop.f32.mrb[198].mxu1 }
 0x292   : > { %v1932_v55 = vmin.f32 %v1707_v51, 2.998999  ;;  %v2045_v56 = vmin.f32 %v1820_v52, 2.998999  ;;  %v981_v58 = vadd.f32 %v4960_v57, %v980_v53  ;;  %v2923_v59 = vpop.f32.mrb[199].mxu0  ;;  %v1546_v12 = vadd.f32 %v4960_v57, %v1545_v54  ;;  %v3262_v60 = vpop.f32.mrb[199].mxu1 }
 0x294   : > { %2157 = vst [vmem:[%s3978_s17 + $0x310] sm:$0xff] %v1932_v55  ;;  %2270 = vst [vmem:[%s3978_s17 + $0x698] sm:$0xff] %v2045_v56  ;;  %v1708_v61 = vmax.f32 %v981_v58, 2.701001  ;;  %v1821_v62 = vmax.f32 %v1546_v12, 2.701001 }
 0x295   : > { %v985_v63 = vpop.f32.mrb[200].mxu0  ;;  %v1550_v0 = vpop.f32.mrb[200].mxu1 }
 0x296   : > { %v1933_v2 = vmin.f32 %v1708_v61, 2.998999  ;;  %v2046_v3 = vmin.f32 %v1821_v62, 2.998999  ;;  %v986_v4 = vadd.f32 %v4960_v57, %v985_v63  ;;  %v2926_v5 = vpop.f32.mrb[201].mxu0  ;;  %v1551_v7 = vadd.f32 %v4960_v57, %v1550_v0  ;;  %v3265_v39 = vpop.f32.mrb[201].mxu1 }
 0x298   : > { %2158 = vst [vmem:[%s3978_s17 + $0x318] sm:$0xff] %v1933_v2  ;;  %2271 = vst [vmem:[%s3978_s17 + $0x6a0] sm:$0xff] %v2046_v3  ;;  %v1709_v8 = vmax.f32 %v986_v4, 2.701001  ;;  %v1822_v9 = vmax.f32 %v1551_v7, 2.701001 }
 0x299   : > { %v990_v10 = vpop.f32.mrb[202].mxu0  ;;  %v1555_v11 = vpop.f32.mrb[202].mxu1 }
 0x29a   : > { %v1934_v13 = vmin.f32 %v1709_v8, 2.998999  ;;  %v2047_v14 = vmin.f32 %v1822_v9, 2.998999  ;;  %v991_v15 = vadd.f32 %v4960_v57, %v990_v10  ;;  %v2929_v16 = vpop.f32.mrb[203].mxu0  ;;  %v1556_v17 = vadd.f32 %v4960_v57, %v1555_v11  ;;  %v3268_v18 = vpop.f32.mrb[203].mxu1 }
 0x29c   : > { %2159 = vst [vmem:[%s3978_s17 + $0x320] sm:$0xff] %v1934_v13  ;;  %2272 = vst [vmem:[%s3978_s17 + $0x6a8] sm:$0xff] %v2047_v14  ;;  %v1710_v19 = vmax.f32 %v991_v15, 2.701001  ;;  %v1823_v20 = vmax.f32 %v1556_v17, 2.701001 }
 0x29d   : > { %v995_v21 = vpop.f32.mrb[204].mxu0  ;;  %v1560_v22 = vpop.f32.mrb[204].mxu1 }
 0x29e   : > { %v1935_v23 = vmin.f32 %v1710_v19, 2.998999  ;;  %v2048_v24 = vmin.f32 %v1823_v20, 2.998999  ;;  %v996_v25 = vadd.f32 %v4960_v57, %v995_v21  ;;  %v2932_v26 = vpop.f32.mrb[205].mxu0  ;;  %v1561_v27 = vadd.f32 %v4960_v57, %v1560_v22  ;;  %v3271_v28 = vpop.f32.mrb[205].mxu1 }
 0x2a0   : > { %2160 = vst [vmem:[%s3978_s17 + $0x328] sm:$0xff] %v1935_v23  ;;  %2273 = vst [vmem:[%s3978_s17 + $0x6b0] sm:$0xff] %v2048_v24  ;;  %v1711_v29 = vmax.f32 %v996_v25, 2.701001  ;;  %v1824_v30 = vmax.f32 %v1561_v27, 2.701001 }
 0x2a1   : > { %v1000_v31 = vpop.f32.mrb[206].mxu0  ;;  %v1565_v32 = vpop.f32.mrb[206].mxu1 }
 0x2a2   : > { %v1936_v33 = vmin.f32 %v1711_v29, 2.998999  ;;  %v2049_v34 = vmin.f32 %v1824_v30, 2.998999  ;;  %v1001_v35 = vadd.f32 %v4960_v57, %v1000_v31  ;;  %v2935_v36 = vpop.f32.mrb[207].mxu0  ;;  %v1566_v37 = vadd.f32 %v4960_v57, %v1565_v32  ;;  %v3274_v1 = vpop.f32.mrb[207].mxu1 }
 0x2a4   : > { %2161 = vst [vmem:[%s3978_s17 + $0x330] sm:$0xff] %v1936_v33  ;;  %2274 = vst [vmem:[%s3978_s17 + $0x6b8] sm:$0xff] %v2049_v34  ;;  %v1712_v38 = vmax.f32 %v1001_v35, 2.701001  ;;  %v1825_v40 = vmax.f32 %v1566_v37, 2.701001 }
 0x2a5   : > { %v1005_v41 = vpop.f32.mrb[208].mxu0  ;;  %v1570_v42 = vpop.f32.mrb[208].mxu1 }
 0x2a6   : > { %v1937_v6 = vmin.f32 %v1712_v38, 2.998999  ;;  %v2050_v43 = vmin.f32 %v1825_v40, 2.998999  ;;  %v1006_v44 = vadd.f32 %v4960_v57, %v1005_v41  ;;  %v2938_v45 = vpop.f32.mrb[209].mxu0  ;;  %v1571_v46 = vadd.f32 %v4960_v57, %v1570_v42  ;;  %v3277_v47 = vpop.f32.mrb[209].mxu1 }
 0x2a8   : > { %2162 = vst [vmem:[%s3978_s17 + $0x338] sm:$0xff] %v1937_v6  ;;  %2275 = vst [vmem:[%s3978_s17 + $0x6c0] sm:$0xff] %v2050_v43  ;;  %v1713_v48 = vmax.f32 %v1006_v44, 2.701001  ;;  %v1826_v49 = vmax.f32 %v1571_v46, 2.701001 }
 0x2a9   : > { %v1010_v50 = vpop.f32.mrb[210].mxu0  ;;  %v1575_v51 = vpop.f32.mrb[210].mxu1 }
 0x2aa   : > { %v1938_v52 = vmin.f32 %v1713_v48, 2.998999  ;;  %v2051_v53 = vmin.f32 %v1826_v49, 2.998999  ;;  %v1011_v54 = vadd.f32 %v4960_v57, %v1010_v50  ;;  %v2941_v55 = vpop.f32.mrb[211].mxu0  ;;  %v1576_v56 = vadd.f32 %v4960_v57, %v1575_v51  ;;  %v3280_v58 = vpop.f32.mrb[211].mxu1 }
 0x2ac   : > { %2163 = vst [vmem:[%s3978_s17 + $0x340] sm:$0xff] %v1938_v52  ;;  %2276 = vst [vmem:[%s3978_s17 + $0x6c8] sm:$0xff] %v2051_v53  ;;  %v1714_v59 = vmax.f32 %v1011_v54, 2.701001  ;;  %v1827_v12 = vmax.f32 %v1576_v56, 2.701001 }
 0x2ad   : > { %v1015_v60 = vpop.f32.mrb[212].mxu0  ;;  %v1580_v61 = vpop.f32.mrb[212].mxu1 }
 0x2ae   : > { %v1939_v62 = vmin.f32 %v1714_v59, 2.998999  ;;  %v2052_v63 = vmin.f32 %v1827_v12, 2.998999  ;;  %v1016_v0 = vadd.f32 %v4960_v57, %v1015_v60  ;;  %v2944_v2 = vpop.f32.mrb[213].mxu0  ;;  %v1581_v3 = vadd.f32 %v4960_v57, %v1580_v61  ;;  %v3283_v4 = vpop.f32.mrb[213].mxu1 }
 0x2b0   : > { %2164 = vst [vmem:[%s3978_s17 + $0x348] sm:$0xff] %v1939_v62  ;;  %2277 = vst [vmem:[%s3978_s17 + $0x6d0] sm:$0xff] %v2052_v63  ;;  %v1715_v5 = vmax.f32 %v1016_v0, 2.701001  ;;  %v1828_v7 = vmax.f32 %v1581_v3, 2.701001 }
 0x2b1   : > { %v1020_v39 = vpop.f32.mrb[214].mxu0  ;;  %v1585_v8 = vpop.f32.mrb[214].mxu1 }
 0x2b2   : > { %v1940_v9 = vmin.f32 %v1715_v5, 2.998999  ;;  %v2053_v10 = vmin.f32 %v1828_v7, 2.998999  ;;  %v1021_v11 = vadd.f32 %v4960_v57, %v1020_v39  ;;  %v2947_v13 = vpop.f32.mrb[215].mxu0  ;;  %v1586_v14 = vadd.f32 %v4960_v57, %v1585_v8  ;;  %v3286_v15 = vpop.f32.mrb[215].mxu1 }
 0x2b4   : > { %2165 = vst [vmem:[%s3978_s17 + $0x350] sm:$0xff] %v1940_v9  ;;  %2278 = vst [vmem:[%s3978_s17 + $0x6d8] sm:$0xff] %v2053_v10  ;;  %v1716_v16 = vmax.f32 %v1021_v11, 2.701001  ;;  %v1829_v17 = vmax.f32 %v1586_v14, 2.701001 }
 0x2b5   : > { %v1025_v18 = vpop.f32.mrb[216].mxu0  ;;  %v1590_v19 = vpop.f32.mrb[216].mxu1 }
 0x2b6   : > { %v1941_v20 = vmin.f32 %v1716_v16, 2.998999  ;;  %v2054_v21 = vmin.f32 %v1829_v17, 2.998999  ;;  %v1026_v22 = vadd.f32 %v4960_v57, %v1025_v18  ;;  %v2950_v23 = vpop.f32.mrb[217].mxu0  ;;  %v1591_v24 = vadd.f32 %v4960_v57, %v1590_v19  ;;  %v3289_v25 = vpop.f32.mrb[217].mxu1 }
 0x2b8   : > { %2166 = vst [vmem:[%s3978_s17 + $0x358] sm:$0xff] %v1941_v20  ;;  %2279 = vst [vmem:[%s3978_s17 + $0x6e0] sm:$0xff] %v2054_v21  ;;  %v1717_v26 = vmax.f32 %v1026_v22, 2.701001  ;;  %v1830_v27 = vmax.f32 %v1591_v24, 2.701001 }
 0x2b9   : > { %v1030_v28 = vpop.f32.mrb[218].mxu0  ;;  %v1595_v29 = vpop.f32.mrb[218].mxu1 }
 0x2ba   : > { %v1942_v30 = vmin.f32 %v1717_v26, 2.998999  ;;  %v2055_v31 = vmin.f32 %v1830_v27, 2.998999  ;;  %v1031_v32 = vadd.f32 %v4960_v57, %v1030_v28  ;;  %v2953_v33 = vpop.f32.mrb[219].mxu0  ;;  %v1596_v34 = vadd.f32 %v4960_v57, %v1595_v29  ;;  %v3292_v35 = vpop.f32.mrb[219].mxu1 }
 0x2bc   : > { %2167 = vst [vmem:[%s3978_s17 + $0x360] sm:$0xff] %v1942_v30  ;;  %2280 = vst [vmem:[%s3978_s17 + $0x6e8] sm:$0xff] %v2055_v31  ;;  %v1718_v36 = vmax.f32 %v1031_v32, 2.701001  ;;  %v1831_v37 = vmax.f32 %v1596_v34, 2.701001 }
 0x2bd   : > { %v1035_v1 = vpop.f32.mrb[220].mxu0  ;;  %v1600_v38 = vpop.f32.mrb[220].mxu1 }
 0x2be   : > { %v1943_v40 = vmin.f32 %v1718_v36, 2.998999  ;;  %v2056_v41 = vmin.f32 %v1831_v37, 2.998999  ;;  %v1036_v42 = vadd.f32 %v4960_v57, %v1035_v1  ;;  %v2956_v6 = vpop.f32.mrb[221].mxu0  ;;  %v1601_v43 = vadd.f32 %v4960_v57, %v1600_v38  ;;  %v3295_v44 = vpop.f32.mrb[221].mxu1 }
 0x2c0   : > { %2168 = vst [vmem:[%s3978_s17 + $0x368] sm:$0xff] %v1943_v40  ;;  %2281 = vst [vmem:[%s3978_s17 + $0x6f0] sm:$0xff] %v2056_v41  ;;  %v1719_v45 = vmax.f32 %v1036_v42, 2.701001  ;;  %v1832_v46 = vmax.f32 %v1601_v43, 2.701001 }
 0x2c1   : > { %v1040_v47 = vpop.f32.mrb[222].mxu0  ;;  %v1605_v48 = vpop.f32.mrb[222].mxu1 }
 0x2c2   : > { %v1944_v49 = vmin.f32 %v1719_v45, 2.998999  ;;  %v2057_v50 = vmin.f32 %v1832_v46, 2.998999  ;;  %v1041_v51 = vadd.f32 %v4960_v57, %v1040_v47  ;;  %v2959_v52 = vpop.f32.mrb[223].mxu0  ;;  %v1606_v53 = vadd.f32 %v4960_v57, %v1605_v48  ;;  %v3298_v54 = vpop.f32.mrb[223].mxu1 }
 0x2c4   : > { %2169 = vst [vmem:[%s3978_s17 + $0x370] sm:$0xff] %v1944_v49  ;;  %2282 = vst [vmem:[%s3978_s17 + $0x6f8] sm:$0xff] %v2057_v50  ;;  %v1720_v55 = vmax.f32 %v1041_v51, 2.701001  ;;  %v1833_v56 = vmax.f32 %v1606_v53, 2.701001 }
 0x2c5   : > { %v1045_v58 = vpop.f32.mrb[224].mxu0 }
 0x2c6   : > { %v1945_v59 = vmin.f32 %v1720_v55, 2.998999  ;;  %v2058_v12 = vmin.f32 %v1833_v56, 2.998999  ;;  %v1046_v60 = vadd.f32 %v4960_v57, %v1045_v58  ;;  %v2962_v61 = vpop.f32.mrb[225].mxu0 }
 0x2c8   : > { %2170 = vst [vmem:[%s3978_s17 + $0x378] sm:$0xff] %v1945_v59  ;;  %2283 = vst [vmem:[%s3978_s17 + $0x700] sm:$0xff] %v2058_v12  ;;  %v1721_v62 = vmax.f32 %v1046_v60, 2.701001 }
 0x2ca   : > { %v1946_v63 = vmin.f32 %v1721_v62, 2.998999 }
 0x2cc   : > { %2171 = vst [vmem:[%s3978_s17 + $0x380] sm:$0xff] %v1946_v63 }
 0x2cd PF: > { %s13_s12 = sadd.s32 1, %s3360_s12  }
 0x2ce   : > { %p10_p4 = scmp.ge.s32.totalorder %s13_s12, 18  }
 0x2d0   :  { %12 = sbr.rel (!%p10_p4) target bundleno = 1 (0x1), region = 62 }

</bundles_post_ra>
